<compile_context>
chip_gen: v7x
topology: tpu7x:2x2x1
jax: 0.10.0
libtpu: 0.0.40
codegen_flags: <defaults>
</compile_context>

<pallas_src>
import functools
import math

import jax
import jax.numpy as jnp
from jax.experimental import pallas as pl
from jax.experimental.pallas import tpu as pltpu


# ----------------------------------------------------------------------------
# Pallas kernels
# ----------------------------------------------------------------------------
def _conv3x3_kernel(x_ref, w_ref, b_ref, o_ref, *, relu, pool):
    """Fused 3x3 conv (pad=1, stride=1) + bias + ReLU [+ 2x2 max-pool].

    One batch element per grid step.
      x_ref : (1, H, W, Cin)        input tile (VMEM)
      w_ref : (9*Cin, Cout)         folded weights, rows ordered (dy, dx, cin)
      b_ref : (1, Cout)             bias (f32)
      o_ref : (1, Ho, Wo*Cout)      lane-dense packed output slab
    """
    _, H, W, Cin = x_ref.shape
    Cout = w_ref.shape[-1]
    x = x_ref[0]                                    # (H, W, Cin) value
    dt = x.dtype

    # In-kernel zero halo (pad=1). Replaces the wrapper-side jnp.pad which cost
    # a full extra HBM read+write of every activation as a separate XLA op.
    zrow = jnp.zeros((1, W, Cin), dt)
    zcol = jnp.zeros((H + 2, 1, Cin), dt)
    xp = jnp.concatenate([zrow, x, zrow], axis=0)   # (H+2, W,   Cin)
    xp = jnp.concatenate([zcol, xp, zcol], axis=1)  # (H+2, W+2, Cin)

    # im2col: 9 shifted slabs concatenated on the channel (lane) axis so the
    # whole 3x3 conv is a single MXU matmul with K = 9*Cin.
    slabs = [xp[dy:dy + H, dx:dx + W, :] for dy in range(3) for dx in range(3)]
    patches = jnp.concatenate(slabs, axis=-1).reshape(H * W, 9 * Cin)

    acc = jnp.dot(patches, w_ref[...], preferred_element_type=jnp.float32)
    acc = acc + b_ref[...].astype(jnp.float32)      # f32 bias epilogue
    if relu:
        acc = jnp.maximum(acc, 0.0)

    if pool:
        # Fused 2x2 / stride-2 max-pool while the result is still in VMEM
        # (saves an HBM round trip vs a separate pooling kernel). Pure
        # reshape + max on values: no strided ref indexing.
        Hh, Wh = H // 2, W // 2
        r = acc.reshape(H * Wh, 2, Cout).max(axis=1)   # pool along W
        r = r.reshape(Hh, 2, Wh, Cout).max(axis=1)     # pool along H
        o_ref[0] = r.reshape(Hh, Wh * Cout).astype(o_ref.dtype)
    else:
        o_ref[0] = acc.reshape(H, W * Cout).astype(o_ref.dtype)


def _maxpool2x2_kernel(x_ref, o_ref):
    """Standalone 2x2 max-pool (only used if an 'M' is not preceded by a conv).

      x_ref : (1, H, W, C)
      o_ref : (1, H//2, (W//2)*C)   lane-dense packed output slab
    """
    _, H, W, C = x_ref.shape
    Hh, Wh = H // 2, W // 2
    r = x_ref[0].reshape(H * Wh, 2, C).max(axis=1)   # pool along W
    r = r.reshape(Hh, 2, Wh, C).max(axis=1)          # pool along H
    o_ref[0] = r.reshape(Hh, Wh * C)


def _linear_kernel(x_ref, w_ref, b_ref, o_ref, *, relu):
    """Fused Linear (+ bias, optional ReLU).

      x_ref : (B, Din)
      w_ref : (Din, Dout)
      b_ref : (1, Dout)   (f32)
      o_ref : (B, Dout)
    """
    y = jnp.dot(x_ref[...], w_ref[...], preferred_element_type=jnp.float32)
    y = y + b_ref[...].astype(jnp.float32)
    if relu:
        y = jnp.maximum(y, 0.0)
    o_ref[...] = y.astype(o_ref.dtype)


# ----------------------------------------------------------------------------
# Wrappers
# ----------------------------------------------------------------------------
def conv3x3_relu_pool(x_nhwc, w, b, *, pool, relu=True):
    B, H, W, Cin = x_nhwc.shape
    Cout = w.shape[-1]
    Ho, Wo = (H // 2, W // 2) if pool else (H, W)
    w = w.astype(x_nhwc.dtype)   # matmul inputs follow activation dtype
    out = pl.pallas_call(
        functools.partial(_conv3x3_kernel, relu=relu, pool=pool),
        out_shape=jax.ShapeDtypeStruct((B, Ho, Wo * Cout), x_nhwc.dtype),
        grid=(B,),
        in_specs=[
            pl.BlockSpec((1, H, W, Cin), lambda i: (i, 0, 0, 0)),
            pl.BlockSpec((9 * Cin, Cout), lambda i: (0, 0)),
            pl.BlockSpec((1, Cout), lambda i: (0, 0)),
        ],
        out_specs=pl.BlockSpec((1, Ho, Wo * Cout), lambda i: (i, 0, 0)),
        compiler_params=pltpu.CompilerParams(
            dimension_semantics=("parallel",)),
    )(x_nhwc, w, b)
    # Contiguous metadata reshape back to NHWC for the next layer.
    return out.reshape(B, Ho, Wo, Cout)


def maxpool2x2(x_nhwc):
    B, H, W, C = x_nhwc.shape
    Hh, Wh = H // 2, W // 2
    out = pl.pallas_call(
        _maxpool2x2_kernel,
        out_shape=jax.ShapeDtypeStruct((B, Hh, Wh * C), x_nhwc.dtype),
        grid=(B,),
        in_specs=[pl.BlockSpec((1, H, W, C), lambda i: (i, 0, 0, 0))],
        out_specs=pl.BlockSpec((1, Hh, Wh * C), lambda i: (i, 0, 0)),
        compiler_params=pltpu.CompilerParams(
            dimension_semantics=("parallel",)),
    )(x_nhwc)
    return out.reshape(B, Hh, Wh, C)


def linear(x, w, b, *, relu):
    B, Din = x.shape
    Dout = w.shape[-1]
    w = w.astype(x.dtype)
    return pl.pallas_call(
        functools.partial(_linear_kernel, relu=relu),
        out_shape=jax.ShapeDtypeStruct((B, Dout), x.dtype),
        grid=(1,),
        in_specs=[
            pl.BlockSpec((B, Din), lambda i: (0, 0)),
            pl.BlockSpec((Din, Dout), lambda i: (0, 0)),
            pl.BlockSpec((1, Dout), lambda i: (0, 0)),
        ],
        out_specs=pl.BlockSpec((B, Dout), lambda i: (0, 0)),
    )(x, w, b)


# ----------------------------------------------------------------------------
# Parameter init (matches the PyTorch module's init semantics)
# ----------------------------------------------------------------------------
def init_params(key, cfg, in_channels, spatial, num_classes=10):
    """Conv2d: weight ~ N(0, sqrt(2/(k*k*out_channels))), bias = 0.
    Linear: PyTorch default U(-1/sqrt(fan_in), 1/sqrt(fan_in))."""
    conv_params = []
    c, s = in_channels, spatial
    for v in cfg:
        if v == 'M':
            s //= 2
            continue
        key, wk = jax.random.split(key)
        std = math.sqrt(2.0 / (3 * 3 * v))
        # Weight generated in (kh, kw, Cin, Cout) layout (a torch (Cout,Cin,3,3)
        # weight maps via transpose(2,3,1,0)); folded to (9*Cin, Cout) rows
        # ordered (dy, dx, cin) to match the kernel's im2col concatenation.
        w = jax.random.normal(wk, (3, 3, c, v), jnp.float32) * std
        conv_params.append((w.reshape(9 * c, v), jnp.zeros((1, v), jnp.float32)))
        c = v

    feat_dim = c * s * s
    assert feat_dim == 512, (
        f"feature dim {feat_dim} != 512; the VGG classifier is hardcoded to 512")

    def linear_init(k, fan_in, fan_out):
        kw, kb = jax.random.split(k)
        bound = 1.0 / math.sqrt(fan_in)
        wt = jax.random.uniform(kw, (fan_out, fan_in), jnp.float32, -bound, bound)
        bb = jax.random.uniform(kb, (1, fan_out), jnp.float32, -bound, bound)
        return wt, bb

    key, k1, k2, k3 = jax.random.split(key, 4)
    w1_t, b1 = linear_init(k1, feat_dim, 512)       # torch layout (out, in_nchw)
    w2_t, b2 = linear_init(k2, 512, 512)
    w3_t, b3 = linear_init(k3, 512, num_classes)

    # Permute the first Linear's input axis from torch's NCHW-flatten order to
    # our NHWC-flatten order so we can skip the activation transpose entirely:
    # perm[j_nhwc] = corresponding torch (NCHW) flat index.
    perm = jnp.transpose(jnp.arange(feat_dim).reshape(c, s, s), (1, 2, 0)).reshape(-1)
    w1 = w1_t[:, perm].T           # (in_nhwc, out)
    w2 = w2_t.T
    w3 = w3_t.T
    cls_params = [(w1, b1), (w2, b2), (w3, b3)]
    return conv_params, cls_params


# ----------------------------------------------------------------------------
# Forward pass (== VGG.forward: features -> view(B,-1) -> classifier)
# ----------------------------------------------------------------------------
def vgg_forward(x_nchw, conv_params, cls_params, cfg,
                compute_dtype=jnp.float32):
    # compute_dtype=jnp.bfloat16 on v6e/v7x halves HBM/VMEM traffic and doubles
    # MXU rate; accumulation stays f32 in-kernel. Default f32 matches PyTorch.
    x = jnp.transpose(x_nchw, (0, 2, 3, 1)).astype(compute_dtype)  # NCHW->NHWC
    pi, i = 0, 0
    while i < len(cfg):
        v = cfg[i]
        if v == 'M':
            x = maxpool2x2(x)                       # fallback (normally fused)
            i += 1
        else:
            w, b = conv_params[pi]
            pi += 1
            pool = (i + 1 < len(cfg)) and (cfg[i + 1] == 'M')
            x = conv3x3_relu_pool(x, w, b, pool=pool)
            i += 2 if pool else 1

    # Flatten directly in NHWC order; the first classifier weight was permuted
    # at init, so this equals torch's NCHW x.view(B, -1) path exactly.
    feat = x.reshape(x.shape[0], -1)

    # Classifier: Dropout(=identity at inference) -> Linear+ReLU -> Dropout ->
    # Linear+ReLU -> Linear.
    # TODO(synk): training-mode stochastic dropout (pltpu.prng_*) not implemented.
    (w1, b1), (w2, b2), (w3, b3) = cls_params
    h = linear(feat, w1, b1, relu=True)
    h = linear(h, w2, b2, relu=True)
    out = linear(h, w3, b3, relu=False)
    return out.astype(jnp.float32)


if __name__ == "__main__":
    # Small VGG-style config: conv-relu(+pool fused) blocks ending with 512
    # flattened features, feeding the 512->512->512->10 classifier.
    cfg = [8, 'M', 16, 'M', 32]
    in_channels = 3
    spatial = 16
    num_classes = 10

    key = jax.random.PRNGKey(0)
    pkey, xkey = jax.random.split(key)
    conv_params, cls_params = init_params(pkey, cfg, in_channels, spatial,
                                          num_classes=num_classes)

    # PyTorch-style NCHW input.
    x = jax.random.normal(xkey, (2, in_channels, spatial, spatial), jnp.float32)

    out = vgg_forward(x, conv_params, cls_params, cfg)
    out = jax.block_until_ready(out)

    assert out.shape == (2, num_classes), out.shape
    print("KERNEL_OK")
</pallas_src>

<mosaic_0001>
module attributes {stable_mosaic.version = 11 : i64} {
  func.func @_conv3x3_kernel(%arg0: i32, %arg1: memref<1x16x16x3xf32, #tpu.memory_space<vmem>>, %arg2: memref<27x8xf32, #tpu.memory_space<vmem>>, %arg3: memref<1x8xf32, #tpu.memory_space<vmem>>, %arg4: memref<1x8x64xf32, #tpu.memory_space<vmem>>) attributes {dimension_semantics = [#tpu.dimension_semantics<parallel>], iteration_bounds = array<i64: 2>, scalar_prefetch = 0 : i64, scratch_operands = 0 : i64, tpu.core_type = #tpu.core_type<tc>, window_params = [{transform_indices = @transform_0, window_bounds = array<i64: 1, 16, 16, 3>}, {pipeline_mode = #tpu.pipeline_mode<synchronous>, transform_indices = @transform_1, window_bounds = array<i64: 27, 8>}, {pipeline_mode = #tpu.pipeline_mode<synchronous>, transform_indices = @transform_2, window_bounds = array<i64: 1, 8>}, {transform_indices = @transform_3, window_bounds = array<i64: 1, 8, 64>}]} {
    %c0 = arith.constant 0 : index
    %c0_0 = arith.constant 0 : index
    %c0_1 = arith.constant 0 : index
    %c0_2 = arith.constant 0 : index
    %0 = vector.load %arg1[%c0, %c0_0, %c0_1, %c0_2] : memref<1x16x16x3xf32, #tpu.memory_space<vmem>>, vector<1x16x16x3xf32>
    %1 = vector.shape_cast %0 : vector<1x16x16x3xf32> to vector<16x16x3xf32>
    %cst = arith.constant 0.000000e+00 : f32
    %2 = vector.broadcast %cst : f32 to vector<1x16x3xf32>
    %cst_3 = arith.constant 0.000000e+00 : f32
    %3 = vector.broadcast %cst_3 : f32 to vector<18x1x3xf32>
    %4 = tpu.concatenate %2, %1, %2 in 0 : vector<1x16x3xf32>, vector<16x16x3xf32>, vector<1x16x3xf32> -> vector<18x16x3xf32>
    %5 = tpu.concatenate %3, %4, %3 in 1 : vector<18x1x3xf32>, vector<18x16x3xf32>, vector<18x1x3xf32> -> vector<18x18x3xf32>
    %6 = vector.extract_strided_slice %5 {offsets = [0, 0, 0], sizes = [16, 16, 3], strides = [1, 1, 1]} : vector<18x18x3xf32> to vector<16x16x3xf32>
    %7 = vector.extract_strided_slice %5 {offsets = [0, 1, 0], sizes = [16, 16, 3], strides = [1, 1, 1]} : vector<18x18x3xf32> to vector<16x16x3xf32>
    %8 = vector.extract_strided_slice %5 {offsets = [0, 2, 0], sizes = [16, 16, 3], strides = [1, 1, 1]} : vector<18x18x3xf32> to vector<16x16x3xf32>
    %9 = vector.extract_strided_slice %5 {offsets = [1, 0, 0], sizes = [16, 16, 3], strides = [1, 1, 1]} : vector<18x18x3xf32> to vector<16x16x3xf32>
    %10 = vector.extract_strided_slice %5 {offsets = [1, 1, 0], sizes = [16, 16, 3], strides = [1, 1, 1]} : vector<18x18x3xf32> to vector<16x16x3xf32>
    %11 = vector.extract_strided_slice %5 {offsets = [1, 2, 0], sizes = [16, 16, 3], strides = [1, 1, 1]} : vector<18x18x3xf32> to vector<16x16x3xf32>
    %12 = vector.extract_strided_slice %5 {offsets = [2, 0, 0], sizes = [16, 16, 3], strides = [1, 1, 1]} : vector<18x18x3xf32> to vector<16x16x3xf32>
    %13 = vector.extract_strided_slice %5 {offsets = [2, 1, 0], sizes = [16, 16, 3], strides = [1, 1, 1]} : vector<18x18x3xf32> to vector<16x16x3xf32>
    %14 = vector.extract_strided_slice %5 {offsets = [2, 2, 0], sizes = [16, 16, 3], strides = [1, 1, 1]} : vector<18x18x3xf32> to vector<16x16x3xf32>
    %15 = tpu.concatenate %6, %7, %8, %9, %10, %11, %12, %13, %14 in 2 : vector<16x16x3xf32>, vector<16x16x3xf32>, vector<16x16x3xf32>, vector<16x16x3xf32>, vector<16x16x3xf32>, vector<16x16x3xf32>, vector<16x16x3xf32>, vector<16x16x3xf32>, vector<16x16x3xf32> -> vector<16x16x27xf32>
    %16 = vector.shape_cast %15 : vector<16x16x27xf32> to vector<256x27xf32>
    %c0_4 = arith.constant 0 : index
    %c0_5 = arith.constant 0 : index
    %17 = vector.load %arg2[%c0_4, %c0_5] : memref<27x8xf32, #tpu.memory_space<vmem>>, vector<27x8xf32>
    %cst_6 = arith.constant dense<0.000000e+00> : vector<256x8xf32>
    %18 = tpu.matmul %16, %17, %cst_6 {dimension_numbers = #tpu.dot_dimension_numbers<[1], [0], [0], [1], [0, 0, 1, 1], [], []>} : vector<256x27xf32>, vector<27x8xf32>, vector<256x8xf32> -> vector<256x8xf32>
    %c0_7 = arith.constant 0 : index
    %c0_8 = arith.constant 0 : index
    %19 = vector.load %arg3[%c0_7, %c0_8] : memref<1x8xf32, #tpu.memory_space<vmem>>, vector<1x8xf32>
    %20 = vector.broadcast %19 : vector<1x8xf32> to vector<256x8xf32>
    %21 = arith.addf %18, %20 : vector<256x8xf32>
    %cst_9 = arith.constant 0.000000e+00 : f32
    %22 = vector.broadcast %cst_9 : f32 to vector<256x8xf32>
    %23 = arith.maximumf %21, %22 : vector<256x8xf32>
    %24 = vector.shape_cast %23 : vector<256x8xf32> to vector<128x2x8xf32>
    %cst_10 = arith.constant dense<0xFF800000> : vector<128x8xf32>
    %25 = vector.multi_reduction <maximumf>, %24, %cst_10 [1] : vector<128x2x8xf32> to vector<128x8xf32>
    %26 = vector.shape_cast %25 : vector<128x8xf32> to vector<8x2x8x8xf32>
    %cst_11 = arith.constant dense<0xFF800000> : vector<8x8x8xf32>
    %27 = vector.multi_reduction <maximumf>, %26, %cst_11 [1] : vector<8x2x8x8xf32> to vector<8x8x8xf32>
    %28 = vector.shape_cast %27 : vector<8x8x8xf32> to vector<8x64xf32>
    %c0_12 = arith.constant 0 : index
    %c0_13 = arith.constant 0 : index
    %c0_14 = arith.constant 0 : index
    %29 = vector.load %arg4[%c0_12, %c0_13, %c0_14] : memref<1x8x64xf32, #tpu.memory_space<vmem>>, vector<1x8x64xf32>
    %30 = vector.shape_cast %29 : vector<1x8x64xf32> to vector<8x64xf32>
    %31 = vector.shape_cast %28 : vector<8x64xf32> to vector<1x8x64xf32>
    tpu.vector_store %arg4[%c0_12, %c0_13, %c0_14], %31 {strides = array<i32>} : memref<1x8x64xf32, #tpu.memory_space<vmem>>, vector<1x8x64xf32>,
    return
  }
  func.func @transform_0(%arg0: i32) -> (i32, i32, i32, i32) {
    %c0_i32 = arith.constant 0 : i32
    %c0_i32_0 = arith.constant 0 : i32
    %c0_i32_1 = arith.constant 0 : i32
    %c0_i32_2 = arith.constant 0 : i32
    return %arg0, %c0_i32, %c0_i32_0, %c0_i32_1 : i32, i32, i32, i32
  }
  func.func @transform_1(%arg0: i32) -> (i32, i32) {
    %c0_i32 = arith.constant 0 : i32
    %c0_i32_0 = arith.constant 0 : i32
    %c0_i32_1 = arith.constant 0 : i32
    return %c0_i32, %c0_i32_0 : i32, i32
  }
  func.func @transform_2(%arg0: i32) -> (i32, i32) {
    %c0_i32 = arith.constant 0 : i32
    %c0_i32_0 = arith.constant 0 : i32
    %c0_i32_1 = arith.constant 0 : i32
    return %c0_i32, %c0_i32_0 : i32, i32
  }
  func.func @transform_3(%arg0: i32) -> (i32, i32, i32) {
    %c0_i32 = arith.constant 0 : i32
    %c0_i32_0 = arith.constant 0 : i32
    %c0_i32_1 = arith.constant 0 : i32
    return %arg0, %c0_i32, %c0_i32_0 : i32, i32, i32
  }
}

</mosaic_0001>

<bundles_post_ra>
// kernel: tpu_custom_call.1
= control target key start
LH: loop header
LB: loop body
LE: loop exit
PB: predicated region body
PF: predicated region fallthrough
CT: control target
= control target key end

     0   :  { %8 = vsyncpa [#allocation3], 0  ;;  %s7358_s0 = inlined_call_operand.vmem [shape: f32[2,16,16,3], index: 0, kind: input, shape index: {}]   ;;  %s7359_s1 = inlined_call_operand.vmem [shape: f32[27,8], index: 1, kind: input, shape index: {}]   ;;  %s7360_s2 = inlined_call_operand.vmem [shape: f32[1,8], index: 2, kind: input, shape index: {}]   ;;  %s7361_s3 = inlined_call_operand.hbm [shape: f32[2,8,64], index: 3, kind: output, shape index: {}]  }
   0x1   :  { %10 = vsyncpa [#allocation3 + $0x1], 0  ;;  %s4494_s12 = smov 0   ;;  %s4496_s13 = smov 0  }
   0x2   :  { %s4498_s14 = smov 0   ;;  %s4500_s15 = smov 0  }
   0x3 LB: > { %s4515_s16 = sadd.s32 4294967295, %s4453_s15   ;;  %s4155_s17 = sadd.s32 4294967294, %s4453_s15   ;;  %s4453_s15 = sphi %s4500_s15, %s7732_s15   ;;  %s4449_s14 = sphi %s4498_s14, %s7731_s14   ;;  %s4445_s13 = sphi %s4496_s13, %s7730_s13   ;;  %s4441_s12 = sphi %s4494_s12, %s7729_s12  }
   0x4   : > { %s4519_s18 = sadd.s32 1, %s4453_s15   ;;  %s91_s19 = sadd.s32 1, %s4449_s14 }
   0x5   : > { %s88_s20 = ssub.s32 %s4453_s15, %s4519_s18  ;;  %p101_p0 = scmp.ne.s32.totalorder %s4449_s14, %s4445_s13 }
   0x6   : > { %p89_p1 = scmp.eq.s32.totalorder %s88_s20, 0  ;;  %p102_p2 = scmp.eq.s32.totalorder %s4515_s16, 1 }
   0x7   : > { %p107_p3 = scmp.ne.s32.totalorder %s4445_s13, %s4441_s12  ;;  %p108_p4 = scmp.eq.s32.totalorder %s4155_s17, 1 }
   0x8   : > { %s4530_s21 = scalar_select %p89_p1, %s4449_s14, %s91_s19  }
   0x9   : > { %p4532_p5 = por %p102_p2, %p101_p0  ;;  %p4536_p6 = por %p108_p4, %p107_p3 }
   0xa   : > { %p4158_p7 = scmp.ge.s32.totalorder %s4453_s15, 1  ;;  %p140_p8 = scmp.lt.s32.totalorder %s4453_s15, 3 }
   0xc   : > { %p141_p9 = pnand %p4158_p7, %p140_p8 }
   0xe   : > { %144 = sbr.rel (%p141_p9) target bundleno = 1096 (0x448), region = 32 }
  0x15   : > { %vm234_vm0 = vcmask 1040384   ;;  %p164_p10 = scmp.lt.s32.totalorder %s4515_s16, 1  ;;  %v4455_v0 = vmov 0.0   ;;  %vm400_vm1 = vcmask 1046528   ;;  %s4456_s29 = smov 3   ;;  %vm577_vm2 = vcmask 1045504  }
  0x16   : > { %v4543_v1 = vrot.slane %v4455_v0, 7  ;;  %s4457_s30 = smov 6   ;;  %s4458_s4 = smov 9   ;;  %vm1714_vm3 = vcmask 1042432   ;;  %vm4463_vm4 = vmmov 1   ;;  %vm1342_vm6 = vcmask 23552  }
  0x17   : > { %s165_s24 = scalar_select %p164_p10, %s4515_s16, 1  ;;  %vm4298_vm5 = vmpackc.low %vm1714_vm3, %vm4463_vm4  ;;  %vm1408_vm7 = vcmask 72704   ;;  %vm1375_vm8 = vcmask 48128   ;;  %vm1441_vm9 = vcmask 97280   ;;  %vm1474_vm10 = vcmask 121856  }
  0x18   : > { %7473 = vst [vmem:[#allocation5_spill] sm:$0xff] %v4543_v1  ;;  %v4548_v2 = vsel %vm234_vm0, 0.0, %v4543_v1  ;;  %v4552_v3 = vsel %vm234_vm0, %v4543_v1, 0.0  ;;  %v402_v4 = vrot.slane %v4543_v1, 1  ;;  %s4459_s5 = smov 12   ;;  %s4460_s6 = smov 15  }
  0x19   : > { %7474 = vst [vmem:[#allocation6_spill] sm:$0xff] %v4548_v2  ;;  %v401_v5 = vrot.slane %v4548_v2, 1  ;;  %v404_v6 = vrot.slane %v4552_v3, 1  ;;  %s4200_s25 = sshll.u32 %s165_s24, 8  ;;  %s4461_s7 = smov 18   ;;  %vm1507_vm11 = vcmask 146432  }
  0x1a   : > { %s4560_s28 = scalar_lea.vmem %s7358_s0, %s4200_s25  ;;  %s4462_s8 = smov 21   ;;  %vm1540_vm12 = vcmask 171008   ;;  %vm1573_vm13 = vcmask 195584   ;;  %vm1617_vm14 = vcmask 220160   ;;  %vm2679_vm15 = vcmask 58368  }
  0x1b   : > { %v403_v7 = vsel %vm400_vm1, %v401_v5, %v402_v4  ;;  %v405_v8 = vsel %vm400_vm1, %v402_v4, %v404_v6  ;;  %v169_v9 = vld [vmem:[%s4560_s28] sm:$0xff]  ;;  %v170_v10 = vld [vmem:[%s4560_s28 + $0x8] sm:$0xff]  ;;  %v171_v11 = vld [vmem:[%s4560_s28 + $0x10] sm:$0xff]  ;;  %s4464_s26 = smov 24   ;;  %vm3837_vm3 = vcmask 1043459   ;;  %vm3839_vm4 = vcmask 1044484  }
  0x1c   : > { %v4567_v12 = vpack.i.bf16 %v405_v8, %v403_v7  ;;  %v237_v13 = vrot.slane %v169_v9, 7  ;;  %v238_v14 = vrot.slane %v170_v10, 7  ;;  %v172_v15 = vld [vmem:[%s4560_s28 + $0x18] sm:$0xff]  ;;  %v173_v16 = vld [vmem:[%s4560_s28 + $0x20] sm:$0xff]  ;;  %v174_v17 = vld [vmem:[%s4560_s28 + $0x28] sm:$0xff]  ;;  %v240_v18 = vrot.slane %v171_v11, 7 }
  0x1d   : > { %v241_v19 = vrot.slane %v172_v15, 7  ;;  %v243_v20 = vrot.slane %v173_v16, 7  ;;  %v244_v21 = vrot.slane %v174_v17, 7  ;;  %v175_v22 = vld [vmem:[%s4560_s28 + $0x30] sm:$0xff]  ;;  %v176_v31 = vld [vmem:[%s4560_s28 + $0x38] sm:$0xff]  ;;  %v177_v40 = vld [vmem:[%s4560_s28 + $0x40] sm:$0xff] }
  0x1e   : > { %7475 = vst [vmem:[#allocation7_spill] sm:$0xff] %v4567_v12  ;;  %4365 = vrot.lane.b32.xlu0 %v4567_v12, %s4456_s29  ;;  %v4576_v23 = vsel %vm234_vm0, %v237_v13, %v238_v14  ;;  %v4579_v24 = vsel %vm234_vm0, %v238_v14, 0.0  ;;  %v4582_v25 = vsel %vm234_vm0, 0.0, %v237_v13  ;;  %v246_v26 = vrot.slane %v175_v22, 7  ;;  %v178_v49 = vld [vmem:[%s4560_s28 + $0x48] sm:$0xff]  ;;  %v179_v50 = vld [vmem:[%s4560_s28 + $0x50] sm:$0xff] }
  0x1f   : > { %v407_v27 = vrot.slane %v4576_v23, 1  ;;  %v409_v28 = vrot.slane %v4579_v24, 1  ;;  %v406_v29 = vrot.slane %v4582_v25, 1  ;;  %v4588_v30 = vsel %vm234_vm0, %v240_v18, %v241_v19  ;;  %v180_v55 = vld [vmem:[%s4560_s28 + $0x58] sm:$0xff]  ;;  %v181_v4 = vld [vmem:[%s4560_s28 + $0x60] sm:$0xff]  ;;  %v182_v5 = vld [vmem:[%s4560_s28 + $0x68] sm:$0xff] }
  0x20   : > { %7476 = vst [vmem:[#allocation8_spill] sm:$0xff] %v4588_v30  ;;  %v4592_v32 = vsel %vm234_vm0, 0.0, %v240_v18  ;;  %v412_v33 = vrot.slane %v4588_v30, 1  ;;  %v4596_v34 = vsel %vm234_vm0, %v241_v19, 0.0  ;;  %v4599_v35 = vsel %vm234_vm0, %v243_v20, %v244_v21  ;;  %v183_v19 = vld [vmem:[%s4560_s28 + $0x70] sm:$0xff]  ;;  %s4470_s9 = smov 48  }
  0x21   : > { %7477 = vst [vmem:[#allocation9_spill] sm:$0xff] %v4592_v32  ;;  %7478 = vst [vmem:[#allocation10_spill] sm:$0xff] %v4599_v35  ;;  %v4602_v36 = vsel %vm400_vm1, %v407_v27, %v409_v28  ;;  %v4605_v37 = vsel %vm400_vm1, %v406_v29, %v407_v27  ;;  %v411_v38 = vrot.slane %v4592_v32, 1  ;;  %v414_v39 = vrot.slane %v4596_v34, 1  ;;  %v191_v12 = vld [vmem:[%s4560_s28 + $0xb0] sm:$0xff]  ;;  %s4471_s10 = smov 40  }
  0x22   : > { %487 = vrot.lane.b32.xlu1 %v4602_v36, %s4456_s29  ;;  %485 = vrot.lane.b32.xlu0 %v4605_v37, %s4456_s29  ;;  %v4615_v41 = vsel %vm234_vm0, 0.0, %v243_v20  ;;  %v417_v42 = vrot.slane %v4599_v35, 1  ;;  %v4619_v43 = vsel %vm234_vm0, %v244_v21, 0.0  ;;  %v247_v44 = vrot.slane %v176_v31, 7  ;;  %v184_v20 = vld [vmem:[%s4560_s28 + $0x78] sm:$0xff]  ;;  %s4472_s11 = smov 56  }
  0x23   : > { %7479 = vst [vmem:[#allocation11_spill] sm:$0xff] %v4615_v41  ;;  %v4622_v45 = vsel %vm400_vm1, %v411_v38, %v412_v33  ;;  %v4625_v46 = vsel %vm400_vm1, %v412_v33, %v414_v39  ;;  %v416_v47 = vrot.slane %v4615_v41, 1  ;;  %v419_v48 = vrot.slane %v4619_v43, 1  ;;  %v185_v39 = vld [vmem:[%s4560_s28 + $0x80] sm:$0xff]  ;;  %s161_s17 = sand.u32 1, %s4445_s13   ;;  %s4197_s20 = sshll.u32 %s4515_s16, 7 }
  0x24   : > { %v4632_v51 = vsel %vm234_vm0, %v246_v26, %v247_v44  ;;  %v4635_v52 = vsel %vm234_vm0, 0.0, %v246_v26  ;;  %v4638_v53 = vsel %vm234_vm0, %v247_v44, 0.0  ;;  %v249_v54 = vrot.slane %v177_v40, 7  ;;  %v186_v40 = vld [vmem:[%s4560_s28 + $0x88] sm:$0xff]  ;;  %s4159_s19 = sshll.u32 %s161_s17, 3 }
  0x25   : > { %7480 = vst [vmem:[#allocation12_spill] sm:$0xff] %v4632_v51  ;;  %7481 = vst [vmem:[#allocation13_spill] sm:$0xff] %v4635_v52  ;;  %v4642_v56 = vsel %vm400_vm1, %v416_v47, %v417_v42  ;;  %v4649_v57 = vsel %vm400_vm1, %v417_v42, %v419_v48  ;;  %v250_v58 = vrot.slane %v178_v49, 7  ;;  %v252_v60 = vrot.slane %v179_v50, 7  ;;  %s163_s24 = scalar_lea.vmem [#allocation2], %s4159_s19 }
  0x26   : > { %489 = vrot.lane.b32.xlu1 %v4622_v45, %s4456_s29  ;;  %491 = vrot.lane.b32.xlu0 %v4625_v46, %s4456_s29  ;;  %7482 = vst [vmem:[#allocation14_spill] sm:$0xff] %v4649_v57  ;;  %v4652_v59 = vsel %vm234_vm0, 0.0, %v249_v54  ;;  %v421_v61 = vrot.slane %v4635_v52, 1  ;;  %v422_v62 = vrot.slane %v4632_v51, 1  ;;  %v424_v63 = vrot.slane %v4638_v53, 1  ;;  %s4096_s25 = sshll.u32 %s163_s24, 4  ;;  %s7318_s25 = int_to_ptr.vmem [resolvable:$true] %s4096_s25 }
  0x27   : > { %v253_v0 = vrot.slane %v180_v55, 7  ;;  %v4660_v6 = vsel %vm234_vm0, %v249_v54, %v250_v58  ;;  %v4663_v7 = vsel %vm234_vm0, %v250_v58, 0.0  ;;  %v426_v8 = vrot.slane %v4652_v59, 1  ;;  %v187_v54 = vld [vmem:[%s4560_s28 + $0x90] sm:$0xff]  ;;  %s4391_s16 = scalar_lea.vmem %s7318_s25, 128 }
  0x28   : > { %v427_v9 = vrot.slane %v4660_v6, 1  ;;  %v4672_v10 = vsel %vm234_vm0, 0.0, %v252_v60  ;;  %v255_v11 = vrot.slane %v181_v4, 7  ;;  %v256_v13 = vrot.slane %v182_v5, 7  ;;  %p4392_p11 = scmp.ne.s32.totalorder %s7318_s25, %s4391_s16 }
  0x29   : > { %v4675_v14 = vsel %vm400_vm1, %v421_v61, %v422_v62  ;;  %v4678_v15 = vsel %vm400_vm1, %v422_v62, %v424_v63  ;;  %v429_v16 = vrot.slane %v4663_v7, 1  ;;  %v4682_v17 = vsel %vm234_vm0, %v252_v60, %v253_v0  ;;  %v188_v63 = vld [vmem:[%s4560_s28 + $0x98] sm:$0xff] }
  0x2a   : > { %493 = vrot.lane.b32.xlu1 %v4642_v56, %s4456_s29  ;;  %495 = vrot.lane.b32.xlu0 %v4649_v57, %s4456_s29  ;;  %7483 = vst [vmem:[#allocation15_spill] sm:$0xff] %v4675_v14  ;;  %7484 = vst [vmem:[#allocation16_spill] sm:$0xff] %v4678_v15  ;;  %v4685_v18 = vsel %vm234_vm0, %v253_v0, 0.0  ;;  %v431_v21 = vrot.slane %v4672_v10, 1  ;;  %v4695_v22 = vsel %vm400_vm1, %v426_v8, %v427_v9  ;;  %v432_v26 = vrot.slane %v4682_v17, 1  ;;  %v198_v57 = vld [vmem:[%s4560_s28 + $0xe8] sm:$0xff]  ;;  %p4393_p12 = pnand %p4392_p11, %p4532_p5 }
  0x2b   : > { %7485 = vst [vmem:[#allocation17_spill] sm:$0xff] %v4682_v17  ;;  %7486 = vst [vmem:[#allocation18_spill] sm:$0xff] %v4695_v22  ;;  %v4699_v27 = vsel %vm234_vm0, %v255_v11, %v256_v13  ;;  %v4702_v28 = vsel %vm234_vm0, 0.0, %v255_v11  ;;  %v4705_v29 = vsel %vm400_vm1, %v427_v9, %v429_v16  ;;  %v434_v31 = vrot.slane %v4685_v18, 1 }
  0x2c   : > { %7487 = vst [vmem:[#allocation19_spill] sm:$0xff] %v4699_v27  ;;  %7488 = vst [vmem:[#allocation20_spill] sm:$0xff] %v4702_v28  ;;  %v258_v33 = vrot.slane %v183_v19, 7  ;;  %v259_v38 = vrot.slane %v184_v20, 7  ;;  %v4711_v42 = vsel %vm234_vm0, %v256_v13, 0.0  ;;  %v436_v44 = vrot.slane %v4702_v28, 1  ;;  %p4394_p13 = pneg %p4393_p12 }
  0x2d   : > { %7489 = vst [vmem:[#allocation21_spill] sm:$0xff] %v4705_v29  ;;  %v437_v47 = vrot.slane %v4699_v27, 1  ;;  %v4720_v48 = vsel %vm400_vm1, %v431_v21, %v432_v26  ;;  %v261_v49 = vrot.slane %v185_v39, 7  ;;  %v262_v50 = vrot.slane %v186_v40, 7  ;;  %v189_v21 = vld [vmem:[%s4560_s28 + $0xa0] sm:$0xff] }
  0x2e   : > { %497 = vrot.lane.b32.xlu1 %v4675_v14, %s4456_s29  ;;  %499 = vrot.lane.b32.xlu0 %v4678_v15, %s4456_s29  ;;  %7490 = vst [vmem:[#allocation22_spill] sm:$0xff] %v4720_v48  ;;  %v4724_v55 = vsel %vm400_vm1, %v432_v26, %v434_v31  ;;  %v439_v58 = vrot.slane %v4711_v42, 1  ;;  %v4728_v60 = vsel %vm234_vm0, %v258_v33, %v259_v38  ;;  %v4731_v61 = vsel %vm234_vm0, 0.0, %v258_v33  ;;  %v190_v26 = vld [vmem:[%s4560_s28 + $0xa8] sm:$0xff]  ;;  %v197_v15 = vld [vmem:[%s4560_s28 + $0xe0] sm:$0xff] }
  0x2f   : > { %7491 = vst [vmem:[#allocation23_spill] sm:$0xff] %v4724_v55  ;;  %7492 = vst [vmem:[#allocation24_spill] sm:$0xff] %v4731_v61  ;;  %v4734_v62 = vsel %vm234_vm0, %v259_v38, 0.0  ;;  %v4738_v0 = vsel %vm400_vm1, %v436_v44, %v437_v47  ;;  %v264_v4 = vrot.slane %v187_v54, 7  ;;  %v441_v5 = vrot.slane %v4731_v61, 1 }
  0x30   : > { %7493 = vst [vmem:[#allocation25_spill] sm:$0xff] %v4738_v0  ;;  %v442_v8 = vrot.slane %v4728_v60, 1  ;;  %v4747_v9 = vsel %vm234_vm0, %v261_v49, %v262_v50  ;;  %v4750_v11 = vsel %vm234_vm0, 0.0, %v261_v49  ;;  %v4753_v13 = vsel %vm400_vm1, %v437_v47, %v439_v58 }
  0x31   : > { %7494 = vst [vmem:[#allocation26_spill] sm:$0xff] %v4753_v13  ;;  %v444_v16 = vrot.slane %v4734_v62, 1  ;;  %v4757_v19 = vsel %vm234_vm0, %v262_v50, 0.0  ;;  %v265_v20 = vrot.slane %v188_v63, 7  ;;  %v579_v31 = vrot.slane %v4543_v1, 2 }
  0x32   : > { %501 = vrot.lane.b32.xlu1 %v4695_v22, %s4456_s29  ;;  %503 = vrot.lane.b32.xlu0 %v4705_v29, %s4456_s29  ;;  %v581_v33 = vrot.slane %v4552_v3, 2  ;;  %v446_v38 = vrot.slane %v4750_v11, 1  ;;  %v447_v39 = vrot.slane %v4747_v9, 1  ;;  %v578_v40 = vrot.slane %v4548_v2, 2  ;;  %v195_v29 = vld [vmem:[%s4560_s28 + $0xd0] sm:$0xff] }
  0x33   : > { %v4771_v44 = vsel %vm400_vm1, %v441_v5, %v442_v8  ;;  %v449_v47 = vrot.slane %v4757_v19, 1  ;;  %v4775_v49 = vsel %vm234_vm0, 0.0, %v264_v4  ;;  %v267_v3 = vrot.slane %v189_v21, 7  ;;  %v192_v5 = vld [vmem:[%s4560_s28 + $0xb8] sm:$0xff] }
  0x34   : > { %7495 = vst [vmem:[#allocation27_spill] sm:$0xff] %v4771_v44  ;;  %7496 = vst [vmem:[#allocation28_spill] sm:$0xff] %v4775_v49  ;;  %v4778_v50 = vsel %vm400_vm1, %v442_v8, %v444_v16  ;;  %v4781_v54 = vsel %vm234_vm0, %v264_v4, %v265_v20  ;;  %v4784_v58 = vsel %vm234_vm0, %v265_v20, 0.0  ;;  %v268_v63 = vrot.slane %v190_v26, 7 }
  0x35   : > { %7497 = vst [vmem:[#allocation29_spill] sm:$0xff] %v4778_v50  ;;  %7498 = vst [vmem:[#allocation30_spill] sm:$0xff] %v4781_v54  ;;  %v580_v21 = vsel %vm577_vm2, %v578_v40, %v579_v31  ;;  %v582_v8 = vsel %vm577_vm2, %v579_v31, %v581_v33  ;;  %v4799_v4 = vsel %vm400_vm1, %v447_v39, %v449_v47  ;;  %v452_v16 = vrot.slane %v4781_v54, 1 }
  0x36   : > { %505 = vrot.lane.b32.xlu1 %v4720_v48, %s4456_s29  ;;  %507 = vrot.lane.b32.xlu0 %v4724_v55, %s4456_s29  ;;  %7500 = vst [vmem:[#allocation32_spill] sm:$0xff] %v4799_v4  ;;  %v454_v20 = vrot.slane %v4784_v58, 1  ;;  %v4804_v26 = vsel %vm234_vm0, 0.0, %v267_v3  ;;  %v4810_v31 = vsel %vm234_vm0, %v268_v63, 0.0  ;;  %v270_v33 = vrot.slane %v191_v12, 7 }
  0x37   : > { %7501 = vst [vmem:[#allocation33_spill] sm:$0xff] %v4804_v26  ;;  %v271_v40 = vrot.slane %v192_v5, 7  ;;  %v456_v47 = vrot.slane %v4804_v26, 1  ;;  %v459_v5 = vrot.slane %v4810_v31, 1  ;;  %v276_v1 = vrot.slane %v195_v29, 7 }
  0x38   : > { %v4825_v12 = vsel %vm400_vm1, %v452_v16, %v454_v20 }
  0x39   : > { %v4836_v55 = vsel %vm234_vm0, %v271_v40, 0.0 }
  0x3a   : > { %509 = vrot.lane.b32.xlu1 %v4738_v0, %s4456_s29  ;;  %511 = vrot.lane.b32.xlu0 %v4753_v13, %s4456_s29  ;;  %v4789_v13 = vsel %vm400_vm1, %v446_v38, %v447_v39  ;;  %v451_v0 = vrot.slane %v4775_v49, 1  ;;  %v4807_v38 = vsel %vm234_vm0, %v267_v3, %v268_v63  ;;  %v4813_v39 = vpack.i.bf16 %v582_v8, %v580_v21 }
  0x3b   : > { %7499 = vst [vmem:[#allocation31_spill] sm:$0xff] %v4789_v13  ;;  %7502 = vst [vmem:[#allocation34_spill] sm:$0xff] %v4807_v38  ;;  %v457_v63 = vrot.slane %v4807_v38, 1  ;;  %v4830_v21 = vsel %vm234_vm0, %v270_v33, %v271_v40  ;;  %v4833_v8 = vsel %vm234_vm0, 0.0, %v270_v33  ;;  %v464_v40 = vrot.slane %v4836_v55, 1 }
  0x3c   : > { %7503 = vst [vmem:[#allocation35_spill] sm:$0xff] %v4813_v39  ;;  %v4822_v3 = vsel %vm400_vm1, %v451_v0, %v452_v16  ;;  %7504 = vst [vmem:[#allocation36_spill] sm:$0xff] %v4830_v21  ;;  %v196_v16 = vld [vmem:[%s4560_s28 + $0xd8] sm:$0xff]  ;;  %v461_v33 = vrot.slane %v4833_v8, 1  ;;  %v462_v22 = vrot.slane %v4830_v21, 1 }
  0x3d   : > { %7505 = vst [vmem:[#allocation37_spill] sm:$0xff] %v4833_v8  ;;  %7506 = vst [vmem:[#allocation38_spill] sm:$0xff] %v4836_v55  ;;  %v4845_v20 = vsel %vm400_vm1, %v456_v47, %v457_v63  ;;  %v277_v2 = vrot.slane %v196_v16, 7 }
  0x3e   : > { %513 = vrot.lane.b32.xlu1 %v4771_v44, %s4456_s29  ;;  %515 = vrot.lane.b32.xlu0 %v4778_v50, %s4456_s29  ;;  %v193_v50 = vld [vmem:[%s4560_s28 + $0xc0] sm:$0xff]  ;;  %v194_v44 = vld [vmem:[%s4560_s28 + $0xc8] sm:$0xff]  ;;  %7507 = vst [vmem:[#allocation39_spill] sm:$0xff] %v4845_v20  ;;  %v4872_v29 = vsel %vm400_vm1, %v462_v22, %v464_v40 }
  0x3f   : > { %v273_v48 = vrot.slane %v193_v50, 7  ;;  %v274_v0 = vrot.slane %v194_v44, 7  ;;  %v4851_v44 = vsel %vm400_vm1, %v457_v63, %v459_v5  ;;  %v4869_v63 = vsel %vm400_vm1, %v461_v33, %v462_v22 }
  0x40   : > { %7508 = vst [vmem:[#allocation40_spill] sm:$0xff] %v4851_v44  ;;  %v4878_v55 = vsel %vm234_vm0, %v276_v1, %v277_v2  ;;  %v280_v33 = vrot.slane %v198_v57, 7 }
  0x41   : > { %v4854_v50 = vsel %vm234_vm0, 0.0, %v273_v48  ;;  %v4858_v14 = vsel %vm234_vm0, %v273_v48, %v274_v0  ;;  %v4861_v47 = vsel %vm234_vm0, %v274_v0, 0.0  ;;  %v279_v48 = vrot.slane %v197_v15, 7  ;;  %7511 = vst [vmem:[#allocation43_spill] sm:$0xff] %v4878_v55 }
  0x42   : > { %517 = vrot.lane.b32.xlu1 %v4789_v13, %s4456_s29  ;;  %519 = vrot.lane.b32.xlu0 %v4799_v4, %s4456_s29  ;;  %7509 = vst [vmem:[#allocation41_spill] sm:$0xff] %v4858_v14  ;;  %7510 = vst [vmem:[#allocation42_spill] sm:$0xff] %v4861_v47  ;;  %v466_v5 = vrot.slane %v4854_v50, 1  ;;  %v467_v16 = vrot.slane %v4858_v14, 1  ;;  %v469_v0 = vrot.slane %v4861_v47, 1  ;;  %v472_v22 = vrot.slane %v4878_v55, 1 }
  0x43   : > { %v4900_v57 = vsel %vm234_vm0, 0.0, %v279_v48  ;;  %v4903_v47 = vsel %vm234_vm0, %v279_v48, %v280_v33  ;;  %v4906_v14 = vsel %vm234_vm0, %v280_v33, 0.0 }
  0x44   : > { %v4893_v40 = vsel %vm400_vm1, %v466_v5, %v467_v16  ;;  %7513 = vst [vmem:[#allocation45_spill] sm:$0xff] %v4900_v57  ;;  %7514 = vst [vmem:[#allocation46_spill] sm:$0xff] %v4903_v47  ;;  %v476_v5 = vrot.slane %v4900_v57, 1  ;;  %v477_v48 = vrot.slane %v4903_v47, 1  ;;  %v601_v47 = vrot.slane %v4638_v53, 2 }
  0x45   : > { %7515 = vst [vmem:[#allocation47_spill] sm:$0xff] %v4906_v14 }
  0x46   : > { %521 = vrot.lane.b32.xlu1 %v4822_v3, %s4456_s29  ;;  %523 = vrot.lane.b32.xlu0 %v4825_v12, %s4456_s29  ;;  %v4926_v33 = vsel %vm400_vm1, %v476_v5, %v477_v48  ;;  %v588_v5 = vrot.slane %v4592_v32, 2 }
  0x47   : > { %7518 = vst [vmem:[#allocation50_spill] sm:$0xff] %v4926_v33 }
  0x4a   : > { %525 = vrot.lane.b32.xlu1 %v4845_v20, %s4456_s29  ;;  %527 = vrot.lane.b32.xlu0 %v4851_v44, %s4456_s29  ;;  %v4881_v20 = vsel %vm234_vm0, 0.0, %v276_v1  ;;  %v4884_v44 = vsel %vm234_vm0, %v277_v2, 0.0  ;;  %v4896_v1 = vsel %vm400_vm1, %v467_v16, %v469_v0 }
  0x4b   : > { %7512 = vst [vmem:[#allocation44_spill] sm:$0xff] %v4884_v44  ;;  %v471_v15 = vrot.slane %v4881_v20, 1  ;;  %v474_v2 = vrot.slane %v4884_v44, 1  ;;  %v479_v44 = vrot.slane %v4906_v14, 1  ;;  %v586_v14 = vrot.slane %v4579_v24, 2 }
  0x4c   : > { %v593_v24 = vrot.slane %v4615_v41, 2 }
  0x4d   : > { %v4914_v16 = vsel %vm400_vm1, %v471_v15, %v472_v22  ;;  %v4917_v0 = vsel %vm400_vm1, %v472_v22, %v474_v2  ;;  %v4929_v57 = vsel %vm400_vm1, %v477_v48, %v479_v44  ;;  %v583_v15 = vrot.slane %v4582_v25, 2 }
  0x4e   : > { %529 = vrot.lane.b32.xlu1 %v4869_v63, %s4456_s29  ;;  %531 = vrot.lane.b32.xlu0 %v4872_v29, %s4456_s29  ;;  %7516 = vst [vmem:[#allocation48_spill] sm:$0xff] %v4914_v16  ;;  %7517 = vst [vmem:[#allocation49_spill] sm:$0xff] %v4917_v0  ;;  %v584_v22 = vrot.slane %v4576_v23, 2  ;;  %v589_v44 = vrot.slane %v4588_v30, 2  ;;  %v591_v48 = vrot.slane %v4596_v34, 2 }
  0x4f   : > { %7519 = vst [vmem:[#allocation51_spill] sm:$0xff] %v4929_v57 }
  0x50   : > { %v4938_v2 = vsel %vm577_vm2, %v583_v15, %v584_v22  ;;  %v4952_v15 = vsel %vm577_vm2, %v588_v5, %v589_v44  ;;  %v599_v5 = vrot.slane %v4632_v51, 2 }
  0x52   : > { %533 = vrot.lane.b32.xlu1 %v4893_v40, %s4456_s29  ;;  %535 = vrot.lane.b32.xlu0 %v4896_v1, %s4456_s29  ;;  %v4988_v53 = vsel %vm577_vm2, %v599_v5, %v601_v47 }
  0x56   : > { %537 = vrot.lane.b32.xlu1 %v4914_v16, %s4456_s29  ;;  %539 = vrot.lane.b32.xlu0 %v4917_v0, %s4456_s29  ;;  %v606_v0 = vrot.slane %v4663_v7, 2  ;;  %v611_v16 = vrot.slane %v4685_v18, 2 }
  0x5a   : > { %541 = vrot.lane.b32.xlu1 %v4926_v33, %s4456_s29  ;;  %543 = vrot.lane.b32.xlu0 %v4929_v57, %s4456_s29  ;;  %v4949_v57 = vsel %vm577_vm2, %v584_v22, %v586_v14  ;;  %v594_v33 = vrot.slane %v4599_v35, 2  ;;  %v596_v14 = vrot.slane %v4619_v43, 2  ;;  %v598_v22 = vrot.slane %v4635_v52, 2  ;;  %s4083_s29 = scalar_lea.sflag [#allocation3], %s161_s17 }
  0x5b   : > { %v603_v43 = vrot.slane %v4652_v59, 2 }
  0x5c   : > { %v4964_v34 = vsel %vm577_vm2, %v593_v24, %v594_v33  ;;  %v604_v24 = vrot.slane %v4660_v6, 2 }
  0x5e   : > { %4370 = vrot.lane.b32.xlu1 %v4813_v39, %s4457_s30  ;;  %662 = vrot.lane.b32.xlu0 %v4938_v2, %s4457_s30  ;;  %v4961_v39 = vsel %vm577_vm2, %v589_v44, %v591_v48  ;;  %v4975_v44 = vsel %vm577_vm2, %v594_v33, %v596_v14  ;;  %v4978_v48 = vsel %vm577_vm2, %v598_v22, %v599_v5  ;;  %v608_v14 = vrot.slane %v4672_v10, 2 }
  0x5f   : > { %v4991_v33 = vsel %vm577_vm2, %v603_v43, %v604_v24  ;;  %v609_v22 = vrot.slane %v4682_v17, 2  ;;  %v5001_v7 = vsel %vm577_vm2, %v604_v24, %v606_v0  ;;  %v613_v5 = vrot.slane %v4702_v28, 2 }
  0x60   : > { %v614_v43 = vrot.slane %v4699_v27, 2  ;;  %v616_v0 = vrot.slane %v4711_v42, 2  ;;  %v618_v24 = vrot.slane %v4731_v61, 2  ;;  %v621_v27 = vrot.slane %v4734_v62, 2 }
  0x61   : > { %v5004_v47 = vsel %vm577_vm2, %v608_v14, %v609_v22  ;;  %v5013_v55 = vsel %vm577_vm2, %v609_v22, %v611_v16  ;;  %v619_v14 = vrot.slane %v4728_v60, 2  ;;  %v623_v42 = vrot.slane %v4750_v11, 2 }
  0x62   : > { %664 = vrot.lane.b32.xlu1 %v4949_v57, %s4457_s30  ;;  %666 = vrot.lane.b32.xlu0 %v4952_v15, %s4457_s30  ;;  %7520 = vst [vmem:[#allocation52_spill] sm:$0xff] %v5004_v47  ;;  %7521 = vst [vmem:[#allocation53_spill] sm:$0xff] %v5013_v55  ;;  %v5016_v18 = vsel %vm577_vm2, %v613_v5, %v614_v43  ;;  %v5027_v16 = vsel %vm577_vm2, %v614_v43, %v616_v0  ;;  %v624_v5 = vrot.slane %v4747_v9, 2 }
  0x63   : > { %7522 = vst [vmem:[#allocation54_spill] sm:$0xff] %v5016_v18  ;;  %7523 = vst [vmem:[#allocation55_spill] sm:$0xff] %v5027_v16  ;;  %v5030_v22 = vsel %vm577_vm2, %v618_v24, %v619_v14  ;;  %v5040_v62 = vsel %vm577_vm2, %v619_v14, %v621_v27  ;;  %v628_v0 = vrot.slane %v4775_v49, 2  ;;  %v629_v24 = vrot.slane %v4781_v54, 2 }
  0x64   : > { %7524 = vst [vmem:[#allocation56_spill] sm:$0xff] %v5030_v22  ;;  %7525 = vst [vmem:[#allocation57_spill] sm:$0xff] %v5040_v62  ;;  %v5043_v43 = vsel %vm577_vm2, %v623_v42, %v624_v5  ;;  %v633_v14 = vrot.slane %v4804_v26, 2  ;;  %v634_v42 = vrot.slane %v4807_v38, 2 }
  0x65   : > { %7526 = vst [vmem:[#allocation58_spill] sm:$0xff] %v5043_v43  ;;  %v5056_v27 = vsel %vm577_vm2, %v628_v0, %v629_v24  ;;  %v7424_v0 = vrot.slane %v4830_v21, 2 }
  0x66   : > { %668 = vrot.lane.b32.xlu1 %v4961_v39, %s4457_s30  ;;  %670 = vrot.lane.b32.xlu0 %v4964_v34, %s4457_s30 }
  0x6a   : > { %672 = vrot.lane.b32.xlu1 %v4975_v44, %s4457_s30  ;;  %674 = vrot.lane.b32.xlu0 %v4978_v48, %s4457_s30 }
  0x6e   : > { %676 = vrot.lane.b32.xlu1 %v4988_v53, %s4457_s30  ;;  %678 = vrot.lane.b32.xlu0 %v4991_v33, %s4457_s30 }
  0x72   : > { %680 = vrot.lane.b32.xlu1 %v5001_v7, %s4457_s30  ;;  %682 = vrot.lane.b32.xlu0 %v5004_v47, %s4457_s30 }
  0x76   : > { %684 = vrot.lane.b32.xlu1 %v5013_v55, %s4457_s30  ;;  %686 = vrot.lane.b32.xlu0 %v5016_v18, %s4457_s30  ;;  %v626_v18 = vrot.slane %v4757_v19, 2  ;;  %v7574_v55 = vld [vmem:[#allocation38_spill] sm:$0xff] }
  0x78   : > { %v5053_v19 = vsel %vm577_vm2, %v624_v5, %v626_v18  ;;  %v636_v18 = vrot.slane %v4810_v31, 2  ;;  %v638_v5 = vrot.slane %v4833_v8, 2 }
  0x79   : > { %7527 = vst [vmem:[#allocation59_spill] sm:$0xff] %v5053_v19 }
  0x7a   : > { %688 = vrot.lane.b32.xlu1 %v5027_v16, %s4457_s30  ;;  %690 = vrot.lane.b32.xlu0 %v5030_v22, %s4457_s30  ;;  %v631_v22 = vrot.slane %v4784_v58, 2  ;;  %v5068_v58 = vsel %vm577_vm2, %v633_v14, %v634_v42  ;;  %v5078_v16 = vsel %vm577_vm2, %v634_v42, %v636_v18 }
  0x7e   : > { %692 = vrot.lane.b32.xlu1 %v5040_v62, %s4457_s30  ;;  %694 = vrot.lane.b32.xlu0 %v5043_v43, %s4457_s30  ;;  %v5065_v62 = vsel %vm577_vm2, %v629_v24, %v631_v22  ;;  %v5083_v22 = vsel %vm577_vm2, %v638_v5, %v7424_v0 }
  0x82   : > { %696 = vrot.lane.b32.xlu1 %v5053_v19, %s4457_s30  ;;  %698 = vrot.lane.b32.xlu0 %v5056_v27, %s4457_s30 }
  0x86   : > { %700 = vrot.lane.b32.xlu1 %v5065_v62, %s4457_s30  ;;  %702 = vrot.lane.b32.xlu0 %v5068_v58, %s4457_s30 }
  0x8a   : > { %704 = vrot.lane.b32.xlu1 %v5078_v16, %s4457_s30  ;;  %706 = vrot.lane.b32.xlu0 %v5083_v22, %s4457_s30 }
  0x8e   : > { %755 = vrot.lane.b32.xlu1 %v4582_v25, %s4458_s4  ;;  %787 = vrot.lane.b32.xlu0 %v4750_v11, %s4458_s4 }
  0x90   : > { %v5093_v31 = vpop.permute.xlu0 %4365 }
  0x92   : > { %757 = vrot.lane.b32.xlu1 %v4576_v23, %s4458_s4  ;;  %789 = vrot.lane.b32.xlu0 %v4747_v9, %s4458_s4 }
  0x94   : > { %v5099_v24 = vpop.permute.xlu1 %487  ;;  %v5101_v14 = vpop.permute.xlu0 %485 }
  0x96   : > { %857 = vrot.lane.b32.xlu1 %v4605_v37, %s4459_s5  ;;  %889 = vrot.lane.b32.xlu0 %v4789_v13, %s4459_s5 }
  0x98   : > { %v5107_v42 = vpop.permute.xlu1 %489  ;;  %v5109_v18 = vpop.permute.xlu0 %491 }
  0x99   : > { %7528 = vst [vmem:[#allocation60_spill] sm:$0xff] %v5107_v42  ;;  %7529 = vst [vmem:[#allocation61_spill] sm:$0xff] %v5109_v18 }
  0x9a   : > { %859 = vrot.lane.b32.xlu1 %v4602_v36, %s4459_s5  ;;  %891 = vrot.lane.b32.xlu0 %v4799_v4, %s4459_s5 }
  0x9c   : > { %v5115_v5 = vpop.permute.xlu1 %493  ;;  %v5117_v0 = vpop.permute.xlu0 %495 }
  0x9d   : > { %7530 = vst [vmem:[#allocation62_spill] sm:$0xff] %v5115_v5  ;;  %7531 = vst [vmem:[#allocation63_spill] sm:$0xff] %v5117_v0 }
  0x9e   : > { %958 = vrot.lane.b32.xlu1 %v4938_v2, %s4460_s6  ;;  %990 = vrot.lane.b32.xlu0 %v5043_v43, %s4460_s6 }
  0xa0   : > { %v5123_v37 = vpop.permute.xlu1 %497  ;;  %v5125_v13 = vpop.permute.xlu0 %499 }
  0xa1   : > { %7532 = vst [vmem:[#allocation64_spill] sm:$0xff] %v5123_v37  ;;  %7533 = vst [vmem:[#allocation65_spill] sm:$0xff] %v5125_v13 }
  0xa2   : > { %960 = vrot.lane.b32.xlu1 %v4949_v57, %s4460_s6  ;;  %992 = vrot.lane.b32.xlu0 %v5053_v19, %s4460_s6 }
  0xa4   : > { %v5131_v36 = vpop.permute.xlu1 %501  ;;  %v5133_v4 = vpop.permute.xlu0 %503 }
  0xa5   : > { %7534 = vst [vmem:[#allocation66_spill] sm:$0xff] %v5131_v36  ;;  %7535 = vst [vmem:[#allocation67_spill] sm:$0xff] %v5133_v4  ;;  %v1606_v4 = vld [vmem:[%s7359_s1] sm:$0xff]  ;;  %v1607_v36 = vld [vmem:[%s7359_s1 + $0x8] sm:$0xff] }
  0xa6   : > { %1054 = vrot.lane.b32.xlu1 %v4592_v32, %s4461_s7  ;;  %1086 = vrot.lane.b32.xlu0 %v4775_v49, %s4461_s7  ;;  %v4293_v0 = vpack.c.bf16 %v1607_v36, %v1606_v4  ;;  %v1609_v4 = vld [vmem:[%s7359_s1 + $0x18] sm:$0x7] }
  0xa8   : > { %v5139_v2 = vpop.permute.xlu1 %505  ;;  %v5141_v43 = vpop.permute.xlu0 %507  ;;  %4294 = vmatprep.subr.bf16.mxu0 %v4293_v0  ;;  %4303 = vmatprep.subr.bf16.mxu1 %v4293_v0 }
  0xa9   : > { %7536 = vst [vmem:[#allocation68_spill] sm:$0xff] %v5139_v2  ;;  %7537 = vst [vmem:[#allocation69_spill] sm:$0xff] %v5141_v43  ;;  %4296 = vmatpush3.bf16.msra.mxu0 %v4293_v0  ;;  %4305 = vmatpush3.bf16.msra.mxu1 %v4293_v0 }
  0xaa   : > { %759 = vrot.lane.b32.xlu1 %v4592_v32, %s4458_s4  ;;  %791 = vrot.lane.b32.xlu0 %v4775_v49, %s4458_s4  ;;  %v7577_v32 = vrot.slane %v4830_v21, 2 }
  0xac   : > { %v5147_v57 = vpop.permute.xlu1 %509  ;;  %v5149_v19 = vpop.permute.xlu0 %511 }
  0xad   : > { %7538 = vst [vmem:[#allocation70_spill] sm:$0xff] %v5147_v57  ;;  %7539 = vst [vmem:[#allocation71_spill] sm:$0xff] %v5149_v19 }
  0xae   : > { %1056 = vrot.lane.b32.xlu1 %v4588_v30, %s4461_s7  ;;  %1088 = vrot.lane.b32.xlu0 %v4781_v54, %s4461_s7 }
  0xb0   : > { %v5155_v13 = vpop.permute.xlu1 %513  ;;  %v5157_v2 = vpop.permute.xlu0 %515 }
  0xb1   : > { %v1359_v47 = vsel %vm1342_vm6, %v4731_v61, %v5155_v13 }
  0xb2   : > { %1150 = vrot.lane.b32.xlu1 %v4622_v45, %s4462_s8  ;;  %1182 = vrot.lane.b32.xlu0 %v4822_v3, %s4462_s8 }
  0xb4   : > { %v5163_v57 = vpop.permute.xlu1 %517  ;;  %v5165_v19 = vpop.permute.xlu0 %519 }
  0xb6   : > { %761 = vrot.lane.b32.xlu1 %v4588_v30, %s4458_s4  ;;  %793 = vrot.lane.b32.xlu0 %v4781_v54, %s4458_s4  ;;  %v1608_v54 = vld [vmem:[%s7359_s1 + $0x10] sm:$0xff]  ;;  %v7573_v30 = vld [vmem:[#allocation16_spill] sm:$0xff] }
  0xb8   : > { %v5171_v43 = vpop.permute.xlu1 %521  ;;  %v5173_v37 = vpop.permute.xlu0 %523 }
  0xb9   : > { %7540 = vst [vmem:[#allocation72_spill] sm:$0xff] %v5171_v43  ;;  %7541 = vst [vmem:[#allocation73_spill] sm:$0xff] %v5173_v37  ;;  %v4367_v43 = vunpack.i.l.bf16 %v5093_v31 }
  0xba   : > { %861 = vrot.lane.b32.xlu1 %v4622_v45, %s4459_s5  ;;  %893 = vrot.lane.b32.xlu0 %v4822_v3, %s4459_s5  ;;  %v4297_v45 = vpack.c.bf16 %v1609_v4, %v1608_v54 }
  0xbc   : > { %v5185_v5 = vpop.permute.xlu1 %525  ;;  %v5187_v28 = vpop.permute.xlu0 %527  ;;  %4299 = vmatprep.subr.msk.bf16.mxu0 %vm4298_vm5, %v4297_v45  ;;  %4304 = vmatprep.subr.msk.bf16.mxu1 %vm4298_vm5, %v4297_v45 }
  0xbd   : > { %7542 = vst [vmem:[#allocation74_spill] sm:$0xff] %v5185_v5  ;;  %7543 = vst [vmem:[#allocation75_spill] sm:$0xff] %v5187_v28  ;;  %4302 = vmatpush3.bf16.msk.msra.mxu0 %vm4298_vm5, %v4297_v45  ;;  %4306 = vmatpush3.bf16.msk.msra.mxu1 %vm4298_vm5, %v4297_v45  ;;  %vm3841_vm5 = vcmask 1045509  }
  0xbe   : > { %1152 = vrot.lane.b32.xlu1 %v4625_v46, %s4462_s8  ;;  %1184 = vrot.lane.b32.xlu0 %v4825_v12, %s4462_s8 }
  0xc0   : > { %v5199_v3 = vpop.permute.xlu1 %529  ;;  %v5201_v0 = vpop.permute.xlu0 %531 }
  0xc1   : > { %7544 = vst [vmem:[#allocation76_spill] sm:$0xff] %v5199_v3  ;;  %7545 = vst [vmem:[#allocation77_spill] sm:$0xff] %v5201_v0 }
  0xc2   : > { %1246 = vrot.lane.b32.xlu1 %v4952_v15, %s4464_s26  ;;  %1278 = vrot.lane.b32.xlu0 %v5056_v27, %s4464_s26 }
  0xc4   : > { %v5207_v54 = vpop.permute.xlu1 %533  ;;  %v5209_v36 = vpop.permute.xlu0 %535 }
  0xc5   : > { %7546 = vst [vmem:[#allocation78_spill] sm:$0xff] %v5207_v54  ;;  %7547 = vst [vmem:[#allocation79_spill] sm:$0xff] %v5209_v36  ;;  %v7559_v36 = vld [vmem:[#allocation39_spill] sm:$0xff] }
  0xc6   : > { %863 = vrot.lane.b32.xlu1 %v4625_v46, %s4459_s5  ;;  %895 = vrot.lane.b32.xlu0 %v4825_v12, %s4459_s5 }
  0xc8   : > { %v5215_v4 = vpop.permute.xlu1 %537  ;;  %v5217_v45 = vpop.permute.xlu0 %539 }
  0xc9   : > { %7548 = vst [vmem:[#allocation80_spill] sm:$0xff] %v5215_v4  ;;  %7549 = vst [vmem:[#allocation81_spill] sm:$0xff] %v5217_v45 }
  0xca   : > { %962 = vrot.lane.b32.xlu1 %v4952_v15, %s4460_s6  ;;  %994 = vrot.lane.b32.xlu0 %v5056_v27, %s4460_s6 }
  0xcc   : > { %v5223_v0 = vpop.permute.xlu1 %541  ;;  %v5225_v3 = vpop.permute.xlu0 %543 }
  0xcd   : > { %7550 = vst [vmem:[#allocation82_spill] sm:$0xff] %v5223_v0  ;;  %7551 = vst [vmem:[#allocation83_spill] sm:$0xff] %v5225_v3 }
  0xce   : > { %1248 = vrot.lane.b32.xlu1 %v4961_v39, %s4464_s26  ;;  %1280 = vrot.lane.b32.xlu0 %v5065_v62, %s4464_s26 }
  0xd0   : > { %v5231_v46 = vpop.permute.xlu1 %4370  ;;  %v5233_v12 = vpop.permute.xlu0 %662 }
  0xd2   : > { %964 = vrot.lane.b32.xlu1 %v4961_v39, %s4460_s6  ;;  %996 = vrot.lane.b32.xlu0 %v5065_v62, %s4460_s6 }
  0xd4   : > { %v5239_v15 = vpop.permute.xlu1 %664  ;;  %v5241_v27 = vpop.permute.xlu0 %666 }
  0xd5   : > { %7552 = vst [vmem:[#allocation84_spill] sm:$0xff] %v5241_v27 }
  0xd6   : > { %1058 = vrot.lane.b32.xlu1 %v4615_v41, %s4461_s7  ;;  %1090 = vrot.lane.b32.xlu0 %v4804_v26, %s4461_s7 }
  0xd8   : > { %v5247_v3 = vpop.permute.xlu1 %668  ;;  %v5249_v0 = vpop.permute.xlu0 %670 }
  0xd9   : > { %7553 = vst [vmem:[#allocation85_spill] sm:$0xff] %v5247_v3  ;;  %7554 = vst [vmem:[#allocation86_spill] sm:$0xff] %v5249_v0  ;;  %v7572_v0 = vld [vmem:[#allocation15_spill] sm:$0xff] }
  0xda   : > { %763 = vrot.lane.b32.xlu1 %v4615_v41, %s4458_s4  ;;  %795 = vrot.lane.b32.xlu0 %v4804_v26, %s4458_s4 }
  0xdc   : > { %v5255_v39 = vpop.permute.xlu1 %672  ;;  %v5257_v62 = vpop.permute.xlu0 %674 }
  0xdd   : > { %7555 = vst [vmem:[#allocation87_spill] sm:$0xff] %v5255_v39  ;;  %7556 = vst [vmem:[#allocation88_spill] sm:$0xff] %v5257_v62  ;;  %v7566_v39 = vld [vmem:[#allocation40_spill] sm:$0xff] }
  0xde   : > { %1060 = vrot.lane.b32.xlu1 %v4599_v35, %s4461_s7  ;;  %1092 = vrot.lane.b32.xlu0 %v4807_v38, %s4461_s7 }
  0xe0   : > { %v5263_v45 = vpop.permute.xlu1 %676  ;;  %v5265_v4 = vpop.permute.xlu0 %678 }
  0xe1   : > { %7557 = vst [vmem:[#allocation89_spill] sm:$0xff] %v5263_v45  ;;  %7558 = vst [vmem:[#allocation90_spill] sm:$0xff] %v5265_v4 }
  0xe2   : > { %1154 = vrot.lane.b32.xlu1 %v4642_v56, %s4462_s8  ;;  %1186 = vrot.lane.b32.xlu0 %v7559_v36, %s4462_s8 }
  0xe4   : > { %v5271_v54 = vpop.permute.xlu1 %680  ;;  %v5273_v28 = vpop.permute.xlu0 %682 }
  0xe5   : > { %7560 = vst [vmem:[#allocation39_spill] sm:$0xff] %v5271_v54  ;;  %7561 = vst [vmem:[#allocation91_spill] sm:$0xff] %v5273_v28  ;;  %v7565_v28 = vld [vmem:[#allocation14_spill] sm:$0xff] }
  0xe6   : > { %765 = vrot.lane.b32.xlu1 %v4599_v35, %s4458_s4  ;;  %797 = vrot.lane.b32.xlu0 %v4807_v38, %s4458_s4 }
  0xe8   : > { %v5279_v62 = vpop.permute.xlu1 %684  ;;  %v5281_v45 = vpop.permute.xlu0 %686 }
  0xe9   : > { %7562 = vst [vmem:[#allocation92_spill] sm:$0xff] %v5279_v62  ;;  %7563 = vst [vmem:[#allocation93_spill] sm:$0xff] %v5281_v45 }
  0xea   : > { %865 = vrot.lane.b32.xlu1 %v4642_v56, %s4459_s5  ;;  %897 = vrot.lane.b32.xlu0 %v7559_v36, %s4459_s5 }
  0xec   : > { %v5287_v4 = vpop.permute.xlu1 %688  ;;  %v5289_v54 = vpop.permute.xlu0 %690 }
  0xed   : > { %7564 = vst [vmem:[#allocation94_spill] sm:$0xff] %v5287_v4 }
  0xee   : > { %1156 = vrot.lane.b32.xlu1 %v7565_v28, %s4462_s8  ;;  %1188 = vrot.lane.b32.xlu0 %v7566_v39, %s4462_s8 }
  0xf0   : > { %v5295_v38 = vpop.permute.xlu1 %692  ;;  %v5297_v62 = vpop.permute.xlu0 %694 }
  0xf2   : > { %1250 = vrot.lane.b32.xlu1 %v4964_v34, %s4464_s26  ;;  %1282 = vrot.lane.b32.xlu0 %v5068_v58, %s4464_s26 }
  0xf4   : > { %v5303_v56 = vpop.permute.xlu1 %696  ;;  %v5305_v36 = vpop.permute.xlu0 %698 }
  0xf5   : > { %7567 = vst [vmem:[#allocation14_spill] sm:$0xff] %v5305_v36  ;;  %v641_v36 = vrot.slane %v7574_v55, 2 }
  0xf6   : > { %867 = vrot.lane.b32.xlu1 %v7565_v28, %s4459_s5  ;;  %899 = vrot.lane.b32.xlu0 %v7566_v39, %s4459_s5 }
  0xf8   : > { %v5311_v4 = vpop.permute.xlu1 %700  ;;  %v5313_v45 = vpop.permute.xlu0 %702 }
  0xf9   : > { %7568 = vst [vmem:[#allocation40_spill] sm:$0xff] %v5311_v4  ;;  %7569 = vst [vmem:[#allocation95_spill] sm:$0xff] %v5313_v45 }
  0xfa   : > { %966 = vrot.lane.b32.xlu1 %v4964_v34, %s4460_s6  ;;  %998 = vrot.lane.b32.xlu0 %v5068_v58, %s4460_s6 }
  0xfc   : > { %v5319_v35 = vpop.permute.xlu1 %704  ;;  %v5321_v26 = vpop.permute.xlu0 %706 }
  0xfd   : > { %7570 = vst [vmem:[#allocation96_spill] sm:$0xff] %v5319_v35  ;;  %7571 = vst [vmem:[#allocation97_spill] sm:$0xff] %v5321_v26 }
  0xfe   : > { %1252 = vrot.lane.b32.xlu1 %v4975_v44, %s4464_s26  ;;  %1284 = vrot.lane.b32.xlu0 %v5078_v16, %s4464_s26 }
 0x100   : > { %v756_v28 = vpop.permute.xlu1 %755  ;;  %v788_v39 = vpop.permute.xlu0 %787 }
 0x102   : > { %968 = vrot.lane.b32.xlu1 %v4975_v44, %s4460_s6  ;;  %1000 = vrot.lane.b32.xlu0 %v5078_v16, %s4460_s6 }
 0x104   : > { %v5331_v34 = vpop.permute.xlu1 %757  ;;  %v5333_v58 = vpop.permute.xlu0 %789 }
 0x106   : > { %1062 = vrot.lane.b32.xlu1 %v4635_v52, %s4461_s7  ;;  %1094 = vrot.lane.b32.xlu0 %v4833_v8, %s4461_s7 }
 0x108   : > { %v858_v26 = vpop.permute.xlu1 %857  ;;  %v890_v35 = vpop.permute.xlu0 %889 }
 0x10a   : > { %767 = vrot.lane.b32.xlu1 %v4635_v52, %s4458_s4  ;;  %799 = vrot.lane.b32.xlu0 %v4833_v8, %s4458_s4 }
 0x10c   : > { %v5343_v44 = vpop.permute.xlu1 %859  ;;  %v5345_v16 = vpop.permute.xlu0 %891 }
 0x10e   : > { %1064 = vrot.lane.b32.xlu1 %v4632_v51, %s4461_s7  ;;  %1096 = vrot.lane.b32.xlu0 %v4830_v21, %s4461_s7 }
 0x110   : > { %v959_v45 = vpop.permute.xlu1 %958  ;;  %v991_v5 = vpop.permute.xlu0 %990 }
 0x112   : > { %1158 = vrot.lane.b32.xlu1 %v7572_v0, %s4462_s8  ;;  %1190 = vrot.lane.b32.xlu0 %v4869_v63, %s4462_s8 }
 0x114   : > { %v5355_v52 = vpop.permute.xlu1 %960  ;;  %v5357_v8 = vpop.permute.xlu0 %992 }
 0x116   : > { %769 = vrot.lane.b32.xlu1 %v4632_v51, %s4458_s4  ;;  %801 = vrot.lane.b32.xlu0 %v4830_v21, %s4458_s4 }
 0x118   : > { %v1055_v41 = vpop.permute.xlu1 %1054  ;;  %v1087_v4 = vpop.permute.xlu0 %1086 }
 0x11a   : > { %869 = vrot.lane.b32.xlu1 %v7572_v0, %s4459_s5  ;;  %901 = vrot.lane.b32.xlu0 %v4869_v63, %s4459_s5 }
 0x11c   : > { %v5367_v3 = vpop.permute.xlu1 %759  ;;  %v5369_v37 = vpop.permute.xlu0 %791 }
 0x11e   : > { %1160 = vrot.lane.b32.xlu1 %v7573_v30, %s4462_s8  ;;  %1192 = vrot.lane.b32.xlu0 %v4872_v29, %s4462_s8 }
 0x120   : > { %v5375_v51 = vpop.permute.xlu1 %1056  ;;  %v5377_v18 = vpop.permute.xlu0 %1088 }
 0x122   : > { %1254 = vrot.lane.b32.xlu1 %v4978_v48, %s4464_s26  ;;  %1286 = vrot.lane.b32.xlu0 %v5083_v22, %s4464_s26 }
 0x124   : > { %v1151_v63 = vpop.permute.xlu1 %1150  ;;  %v1183_v0 = vpop.permute.xlu0 %1182 }
 0x126   : > { %871 = vrot.lane.b32.xlu1 %v7573_v30, %s4459_s5  ;;  %903 = vrot.lane.b32.xlu0 %v4872_v29, %s4459_s5  ;;  %v4372_v30 = vunpack.i.l.bf16 %v5231_v46  ;;  %v642_v29 = vsel %vm577_vm2, %v7577_v32, %v641_v36  ;;  %v1392_v32 = vsel %vm1375_vm8, %v1359_v47, %v5289_v54 }
 0x127   : > { %v1425_v13 = vsel %vm1408_vm7, %v1392_v32, %v788_v39 }
 0x128   : > { %v5388_v27 = vpop.permute.xlu1 %761  ;;  %v5390_v49 = vpop.permute.xlu0 %793 }
 0x129   : > { %7575 = vst [vmem:[#allocation15_spill] sm:$0xff] %v5388_v27  ;;  %7576 = vst [vmem:[#allocation16_spill] sm:$0xff] %v5390_v49 }
 0x12a   : > { %970 = vrot.lane.b32.xlu1 %v4978_v48, %s4460_s6  ;;  %1002 = vrot.lane.b32.xlu0 %v5083_v22, %s4460_s6  ;;  %v7578_v48 = vld [vmem:[#allocation6_spill] sm:$0xff] }
 0x12b   : > { %v1343_v22 = vsel %vm1342_vm6, %v7578_v48, %v4367_v43  ;;  %v1458_v48 = vsel %vm1441_vm9, %v1425_v13, %v890_v35 }
 0x12c   : > { %v5401_v55 = vpop.permute.xlu1 %861  ;;  %v5403_v42 = vpop.permute.xlu0 %893  ;;  %v1376_v36 = vsel %vm1375_vm8, %v1343_v22, %v4372_v30  ;;  %v1491_v27 = vsel %vm1474_vm10, %v1458_v48, %v991_v5 }
 0x12d   : > { %v1409_v21 = vsel %vm1408_vm7, %v1376_v36, %v756_v28  ;;  %v1524_v54 = vsel %vm1507_vm11, %v1491_v27, %v1087_v4  ;;  %v7579_v27 = vld [vmem:[#allocation5_spill] sm:$0xff] }
 0x12e   : > { %1256 = vrot.lane.b32.xlu1 %v4988_v53, %s4464_s26  ;;  %1288 = vrot.lane.b32.xlu0 %v642_v29, %s4464_s26  ;;  %v1442_v43 = vsel %vm1441_vm9, %v1409_v21, %v858_v26  ;;  %v1557_v35 = vsel %vm1540_vm12, %v1524_v54, %v1183_v0 }
 0x12f   : > { %v1475_v49 = vsel %vm1474_vm10, %v1442_v43, %v959_v45  ;;  %v7580_v43 = vld [vmem:[#allocation41_spill] sm:$0xff] }
 0x130   : > { %v1153_v61 = vpop.permute.xlu1 %1152  ;;  %v1185_v17 = vpop.permute.xlu0 %1184  ;;  %v1508_v47 = vsel %vm1507_vm11, %v1475_v49, %v1055_v41  ;;  %v4373_v41 = vunpack.i.h.bf16 %v5231_v46 }
 0x131   : > { %v1541_v26 = vsel %vm1540_vm12, %v1508_v47, %v1151_v63 }
 0x132   : > { %972 = vrot.lane.b32.xlu1 %v4988_v53, %s4460_s6  ;;  %1004 = vrot.lane.b32.xlu0 %v642_v29, %s4460_s6  ;;  %v4368_v53 = vunpack.i.h.bf16 %v5093_v31  ;;  %v1360_v31 = vsel %vm1342_vm6, %v4728_v60, %v5157_v2 }
 0x133   : > { %v1393_v46 = vsel %vm1375_vm8, %v1360_v31, %v5295_v38 }
 0x134   : > { %v1247_v21 = vpop.permute.xlu1 %1246  ;;  %v1279_v28 = vpop.permute.xlu0 %1278  ;;  %v1344_v39 = vsel %vm1342_vm6, %v7579_v27, %v4368_v53  ;;  %v1426_v30 = vsel %vm1408_vm7, %v1393_v46, %v5333_v58  ;;  %v7583_v46 = vld [vmem:[#allocation42_spill] sm:$0xff] }
 0x135   : > { %v1574_v45 = vsel %vm1573_vm13, %v1541_v26, %v1247_v21  ;;  %v1590_v5 = vsel %vm1573_vm13, %v1557_v35, %v1279_v28  ;;  %v1377_v63 = vsel %vm1375_vm8, %v1344_v39, %v4373_v41  ;;  %v1459_v38 = vsel %vm1441_vm9, %v1426_v30, %v5345_v16  ;;  %v7582_v35 = vld [vmem:[#allocation21_spill] sm:$0xff] }
 0x136   : > { %1066 = vrot.lane.b32.xlu1 %v4652_v59, %s4461_s7  ;;  %4245 = vmatprep.mubr.msk.f32.mxu0 %vm1617_vm14, %v1574_v45  ;;  %v1410_v0 = vsel %vm1408_vm7, %v1377_v63, %v5331_v34  ;;  %v1492_v32 = vsel %vm1474_vm10, %v1459_v38, %v5357_v8  ;;  %v643_v21 = vrot.slane %v4854_v50, 2  ;;  %v644_v28 = vrot.slane %v7580_v43, 2 }
 0x137   : > { %1098 = vrot.lane.b32.xlu0 %v4854_v50, %s4461_s7  ;;  %4269 = vmatprep.mubr.msk.f32.mxu1 %vm1617_vm14, %v1590_v5  ;;  %v1525_v58 = vsel %vm1507_vm11, %v1492_v32, %v5377_v18  ;;  %v646_v63 = vrot.slane %v7583_v46, 2  ;;  %v1361_v38 = vsel %vm1342_vm6, %v4750_v11, %v5163_v57 }
 0x138   : > { %v5439_v49 = vpop.permute.xlu1 %863  ;;  %v5441_v4 = vpop.permute.xlu0 %895  ;;  %v1558_v16 = vsel %vm1540_vm12, %v1525_v58, %v1185_v17  ;;  %v645_v53 = vsel %vm577_vm2, %v643_v21, %v644_v28 }
 0x13a   : > { %708 = vrot.lane.b32.xlu1 %v642_v29, %s4457_s30  ;;  %v1443_v29 = vsel %vm1441_vm9, %v1410_v0, %v5343_v44 }
 0x13b   : > { %771 = vrot.lane.b32.xlu0 %v4652_v59, %s4458_s4  ;;  %v1476_v22 = vsel %vm1474_vm10, %v1443_v29, %v5355_v52  ;;  %v1345_v29 = vsel %vm1342_vm6, %v4582_v25, %v5101_v14 }
 0x13c   : > { %v5458_v2 = vpop.permute.xlu1 %962  ;;  %v5460_v48 = vpop.permute.xlu0 %994  ;;  %v1509_v34 = vsel %vm1507_vm11, %v1476_v22, %v5375_v51  ;;  %v7581_v51 = vld [vmem:[#allocation18_spill] sm:$0xff]  ;;  %v647_v22 = vsel %vm577_vm2, %v644_v28, %v646_v63 }
 0x13d   : > { %v1542_v44 = vsel %vm1540_vm12, %v1509_v34, %v1153_v61 }
 0x13e   : > { %803 = vrot.lane.b32.xlu1 %v4854_v50, %s4458_s4 }
 0x13f   : > { %1068 = vrot.lane.b32.xlu0 %v4660_v6, %s4461_s7 }
 0x140   : > { %v1249_v52 = vpop.permute.xlu1 %1248  ;;  %v1281_v36 = vpop.permute.xlu0 %1280 }
 0x141   : > { %v1575_v8 = vsel %vm1573_vm13, %v1542_v44, %v1249_v52  ;;  %v1591_v13 = vsel %vm1573_vm13, %v1558_v16, %v1281_v36 }
 0x142   : > { %1100 = vrot.lane.b32.xlu1 %v7580_v43, %s4461_s7  ;;  %4246 = vmatmul.mubr.msk.f32.vlgmr.msra.gmra.mrb[0].mxu0 %vm1617_vm14, %v1575_v8  ;;  %v1346_v8 = vsel %vm1342_vm6, %v4576_v23, %v5099_v24  ;;  %v7585_v23 = vld [vmem:[#allocation16_spill] sm:$0xff] }
 0x143   : > { %1162 = vrot.lane.b32.xlu0 %v7581_v51, %s4462_s8  ;;  %4270 = vmatmul.mubr.msk.f32.vlgmr.msra.gmra.mrb[0].mxu1 %vm1617_vm14, %v1591_v13  ;;  %v1362_v13 = vsel %vm1342_vm6, %v4747_v9, %v5165_v19 }
 0x144   : > { %v5488_v18 = vpop.permute.xlu1 %964  ;;  %v5490_v61 = vpop.permute.xlu0 %996 }
 0x146   : > { %1194 = vrot.lane.b32.xlu1 %v4893_v40, %s4462_s8 }
 0x147   : > { %773 = vrot.lane.b32.xlu0 %v4660_v6, %s4458_s4 }
 0x148   : > { %v1059_v17 = vpop.permute.xlu1 %1058  ;;  %v1091_v47 = vpop.permute.xlu0 %1090 }
 0x14a   : > { %805 = vrot.lane.b32.xlu1 %v7580_v43, %s4458_s4 }
 0x14b   : > { %873 = vrot.lane.b32.xlu0 %v7581_v51, %s4459_s5  ;;  %v1395_v51 = vsel %vm1375_vm8, %v1362_v13, %v5303_v56  ;;  %v7594_v13 = vld [vmem:[#allocation9_spill] sm:$0xff] }
 0x14c   : > { %v5500_v54 = vpop.permute.xlu1 %763  ;;  %v5502_v26 = vpop.permute.xlu0 %795  ;;  %v1428_v24 = vsel %vm1408_vm7, %v1395_v51, %v7585_v23  ;;  %v7595_v51 = vld [vmem:[#allocation72_spill] sm:$0xff] }
 0x14d   : > { %v7597_v23 = vld [vmem:[#allocation84_spill] sm:$0xff] }
 0x14e   : > { %905 = vrot.lane.b32.xlu1 %v4893_v40, %s4459_s5 }
 0x14f   : > { %1164 = vrot.lane.b32.xlu0 %v7582_v35, %s4462_s8 }
 0x150   : > { %v5510_v45 = vpop.permute.xlu1 %1060  ;;  %v5512_v5 = vpop.permute.xlu0 %1092 }
 0x152   : > { %1196 = vrot.lane.b32.xlu1 %v4896_v1, %s4462_s8 }
 0x153   : > { %1258 = vrot.lane.b32.xlu0 %v4991_v33, %s4464_s26 }
 0x154   : > { %v1155_v40 = vpop.permute.xlu1 %1154  ;;  %v1187_v41 = vpop.permute.xlu0 %1186 }
 0x156   : > { %1290 = vrot.lane.b32.xlu1 %v645_v53, %s4464_s26 }
 0x157   : > { %875 = vrot.lane.b32.xlu0 %v7582_v35, %s4459_s5 }
 0x158   : > { %v5522_v31 = vpop.permute.xlu1 %765  ;;  %v5524_v39 = vpop.permute.xlu0 %797 }
 0x15a   : > { %907 = vrot.lane.b32.xlu1 %v4896_v1, %s4459_s5  ;;  %v1378_v1 = vsel %vm1375_vm8, %v1345_v29, %v5233_v12  ;;  %v7587_v29 = vld [vmem:[#allocation43_spill] sm:$0xff] }
 0x15b   : > { %974 = vrot.lane.b32.xlu0 %v4991_v33, %s4460_s6  ;;  %v1394_v33 = vsel %vm1375_vm8, %v1361_v38, %v5297_v62  ;;  %v1411_v25 = vsel %vm1408_vm7, %v1378_v1, %v5367_v3  ;;  %v7588_v38 = vld [vmem:[#allocation22_spill] sm:$0xff] }
 0x15c   : > { %v5531_v0 = vpop.permute.xlu1 %865  ;;  %v5533_v30 = vpop.permute.xlu0 %897  ;;  %v1427_v14 = vsel %vm1408_vm7, %v1394_v33, %v5369_v37  ;;  %v1444_v34 = vsel %vm1441_vm9, %v1411_v25, %v5401_v55 }
 0x15d   : > { %v1460_v12 = vsel %vm1441_vm9, %v1427_v14, %v5403_v42  ;;  %v1477_v62 = vsel %vm1474_vm10, %v1444_v34, %v5458_v2  ;;  %v7590_v34 = vld [vmem:[#allocation23_spill] sm:$0xff] }
 0x15e   : > { %1006 = vrot.lane.b32.xlu1 %v645_v53, %s4460_s6  ;;  %v1493_v58 = vsel %vm1474_vm10, %v1460_v12, %v5460_v48  ;;  %v1510_v3 = vsel %vm1507_vm11, %v1477_v62, %v1059_v17  ;;  %v7584_v17 = vld [vmem:[#allocation15_spill] sm:$0xff]  ;;  %v648_v12 = vrot.slane %v4881_v20, 2  ;;  %v649_v62 = vrot.slane %v7587_v29, 2 }
 0x15f   : > { %1260 = vrot.lane.b32.xlu0 %v5001_v7, %s4464_s26  ;;  %v1526_v37 = vsel %vm1507_vm11, %v1493_v58, %v1091_v47  ;;  %v1543_v44 = vsel %vm1540_vm12, %v1510_v3, %v1155_v40 }
 0x160   : > { %v1157_v57 = vpop.permute.xlu1 %1156  ;;  %v1189_v32 = vpop.permute.xlu0 %1188  ;;  %v1559_v55 = vsel %vm1540_vm12, %v1526_v37, %v1187_v41  ;;  %v7591_v37 = vld [vmem:[#allocation49_spill] sm:$0xff] }
 0x162   : > { %1292 = vrot.lane.b32.xlu1 %v647_v22, %s4464_s26 }
 0x163   : > { %710 = vrot.lane.b32.xlu0 %v645_v53, %s4457_s30 }
 0x164   : > { %v1251_v16 = vpop.permute.xlu1 %1250  ;;  %v1283_v42 = vpop.permute.xlu0 %1282 }
 0x165   : > { %v1576_v52 = vsel %vm1573_vm13, %v1543_v44, %v1251_v16  ;;  %v1592_v2 = vsel %vm1573_vm13, %v1559_v55, %v1283_v42  ;;  %v7592_v44 = vld [vmem:[#allocation52_spill] sm:$0xff]  ;;  %v650_v55 = vsel %vm577_vm2, %v648_v12, %v649_v62 }
 0x166   : > { %976 = vrot.lane.b32.xlu1 %v5001_v7, %s4460_s6  ;;  %4248 = vmatprep.mubr.msk.f32.mxu0 %vm1617_vm14, %v1576_v52  ;;  %v1379_v7 = vsel %vm1375_vm8, %v1346_v8, %v5239_v15  ;;  %v1461_v15 = vsel %vm1441_vm9, %v1428_v24, %v5441_v4  ;;  %v7593_v8 = vld [vmem:[#allocation60_spill] sm:$0xff] }
 0x167   : > { %1008 = vrot.lane.b32.xlu0 %v647_v22, %s4460_s6  ;;  %4272 = vmatprep.mubr.msk.f32.mxu1 %vm1617_vm14, %v1592_v2  ;;  %v1412_v47 = vsel %vm1408_vm7, %v1379_v7, %v7584_v17  ;;  %v1494_v28 = vsel %vm1474_vm10, %v1461_v15, %v5490_v61  ;;  %v1347_v7 = vsel %vm1342_vm6, %v7594_v13, %v7593_v8  ;;  %v7596_v17 = vld [vmem:[#allocation28_spill] sm:$0xff]  ;;  %v7605_v13 = vld [vmem:[#allocation85_spill] sm:$0xff] }
 0x168   : > { %v5574_v48 = vpop.permute.xlu1 %867  ;;  %v5576_v36 = vpop.permute.xlu0 %899  ;;  %v1445_v21 = vsel %vm1441_vm9, %v1412_v47, %v5439_v49  ;;  %v1527_v40 = vsel %vm1507_vm11, %v1494_v28, %v5512_v5  ;;  %v1363_v47 = vsel %vm1342_vm6, %v7596_v17, %v7595_v51  ;;  %v1380_v24 = vsel %vm1375_vm8, %v1347_v7, %v7597_v23  ;;  %v7606_v7 = vld [vmem:[#allocation40_spill] sm:$0xff] }
 0x169   : > { %v1478_v56 = vsel %vm1474_vm10, %v1445_v21, %v5488_v18  ;;  %v1560_v4 = vsel %vm1540_vm12, %v1527_v40, %v1189_v32  ;;  %v7598_v21 = vld [vmem:[#allocation14_spill] sm:$0xff] }
 0x16a   : > { %1070 = vrot.lane.b32.xlu1 %v4672_v10, %s4461_s7  ;;  %v1511_v53 = vsel %vm1507_vm11, %v1478_v56, %v5510_v45  ;;  %v7586_v45 = vld [vmem:[#allocation17_spill] sm:$0xff]  ;;  %v1396_v15 = vsel %vm1375_vm8, %v1363_v47, %v7598_v21  ;;  %v7599_v56 = vld [vmem:[#allocation44_spill] sm:$0xff] }
 0x16b   : > { %1102 = vrot.lane.b32.xlu0 %v4881_v20, %s4461_s7  ;;  %v1544_v49 = vsel %vm1540_vm12, %v1511_v53, %v1157_v57  ;;  %v651_v28 = vrot.slane %v7599_v56, 2  ;;  %v1413_v53 = vsel %vm1408_vm7, %v1380_v24, %v5500_v54  ;;  %v1429_v40 = vsel %vm1408_vm7, %v1396_v15, %v5502_v26 }
 0x16c   : > { %v5596_v35 = vpop.permute.xlu1 %966  ;;  %v5598_v19 = vpop.permute.xlu0 %998 }
 0x16e   : > { %712 = vrot.lane.b32.xlu1 %v647_v22, %s4457_s30  ;;  %v7589_v22 = vld [vmem:[#allocation48_spill] sm:$0xff] }
 0x16f   : > { %775 = vrot.lane.b32.xlu0 %v4672_v10, %s4458_s4 }
 0x170   : > { %v1253_v41 = vpop.permute.xlu1 %1252  ;;  %v1285_v18 = vpop.permute.xlu0 %1284 }
 0x171   : > { %v1577_v46 = vsel %vm1573_vm13, %v1544_v49, %v1253_v41  ;;  %v1593_v61 = vsel %vm1573_vm13, %v1560_v4, %v1285_v18  ;;  %v1446_v41 = vsel %vm1441_vm9, %v1413_v53, %v5531_v0  ;;  %v1462_v18 = vsel %vm1441_vm9, %v1429_v40, %v5533_v30 }
 0x172   : > { %807 = vrot.lane.b32.xlu1 %v4881_v20, %s4458_s4  ;;  %4249 = vmatmul.mubr.msk.f32.gmra.mrb[2].mxu0 %vm1617_vm14, %v1577_v46  ;;  %v1479_v46 = vsel %vm1474_vm10, %v1446_v41, %v5596_v35  ;;  %v652_v0 = vsel %vm577_vm2, %v649_v62, %v651_v28  ;;  %v7601_v62 = vld [vmem:[#allocation61_spill] sm:$0xff] }
 0x173   : > { %1072 = vrot.lane.b32.xlu0 %v7586_v45, %s4461_s7  ;;  %4273 = vmatmul.mubr.msk.f32.gmra.mrb[2].mxu1 %vm1617_vm14, %v1593_v61  ;;  %v1495_v61 = vsel %vm1474_vm10, %v1462_v18, %v5598_v19 }
 0x174   : > { %v5625_v5 = vpop.permute.xlu1 %968  ;;  %v5627_v63 = vpop.permute.xlu0 %1000 }
 0x176   : > { %1104 = vrot.lane.b32.xlu1 %v7587_v29, %s4461_s7 }
 0x177   : > { %1166 = vrot.lane.b32.xlu0 %v7588_v38, %s4462_s8 }
 0x178   : > { %v1063_v1 = vpop.permute.xlu1 %1062  ;;  %v1095_v33 = vpop.permute.xlu0 %1094 }
 0x179   : > { %v1512_v54 = vsel %vm1507_vm11, %v1479_v46, %v1063_v1  ;;  %v1528_v26 = vsel %vm1507_vm11, %v1495_v61, %v1095_v33  ;;  %v7610_v61 = vld [vmem:[#allocation46_spill] sm:$0xff] }
 0x17a   : > { %1198 = vrot.lane.b32.xlu1 %v7589_v22, %s4462_s8 }
 0x17b   : > { %777 = vrot.lane.b32.xlu0 %v7586_v45, %s4458_s4 }
 0x17c   : > { %v5637_v25 = vpop.permute.xlu1 %767  ;;  %v5639_v14 = vpop.permute.xlu0 %799 }
 0x17e   : > { %809 = vrot.lane.b32.xlu1 %v7587_v29, %s4458_s4 }
 0x17f   : > { %877 = vrot.lane.b32.xlu0 %v7588_v38, %s4459_s5  ;;  %v7600_v38 = vld [vmem:[#allocation53_spill] sm:$0xff] }
 0x180   : > { %v5645_v57 = vpop.permute.xlu1 %1064  ;;  %v5647_v32 = vpop.permute.xlu0 %1096 }
 0x182   : > { %909 = vrot.lane.b32.xlu1 %v7589_v22, %s4459_s5 }
 0x183   : > { %1168 = vrot.lane.b32.xlu0 %v7590_v34, %s4462_s8 }
 0x184   : > { %v1159_v58 = vpop.permute.xlu1 %1158  ;;  %v1191_v3 = vpop.permute.xlu0 %1190 }
 0x185   : > { %v1545_v22 = vsel %vm1540_vm12, %v1512_v54, %v1159_v58  ;;  %v1561_v30 = vsel %vm1540_vm12, %v1528_v26, %v1191_v3  ;;  %v7602_v58 = vld [vmem:[#allocation8_spill] sm:$0xff]  ;;  %v7611_v54 = vld [vmem:[#allocation25_spill] sm:$0xff] }
 0x186   : > { %1200 = vrot.lane.b32.xlu1 %v7591_v37, %s4462_s8  ;;  %v1348_v3 = vsel %vm1342_vm6, %v7602_v58, %v7601_v62  ;;  %v654_v62 = vrot.slane %v7610_v61, 2 }
 0x187   : > { %1262 = vrot.lane.b32.xlu0 %v7592_v44, %s4464_s26 }
 0x188   : > { %v5660_v16 = vpop.permute.xlu1 %769  ;;  %v5662_v42 = vpop.permute.xlu0 %801 }
 0x18a   : > { %1294 = vrot.lane.b32.xlu1 %v650_v55, %s4464_s26 }
 0x18b   : > { %879 = vrot.lane.b32.xlu0 %v7590_v34, %s4459_s5 }
 0x18c   : > { %v5667_v52 = vpop.permute.xlu1 %869  ;;  %v5669_v2 = vpop.permute.xlu0 %901 }
 0x18e   : > { %911 = vrot.lane.b32.xlu1 %v7591_v37, %s4459_s5  ;;  %v7603_v37 = vld [vmem:[#allocation73_spill] sm:$0xff] }
 0x18f   : > { %978 = vrot.lane.b32.xlu0 %v7592_v44, %s4460_s6  ;;  %v7604_v44 = vld [vmem:[#allocation30_spill] sm:$0xff] }
 0x190   : > { %v1161_v49 = vpop.permute.xlu1 %1160  ;;  %v1193_v4 = vpop.permute.xlu0 %1192  ;;  %v1364_v8 = vsel %vm1342_vm6, %v7604_v44, %v7603_v37  ;;  %v7614_v37 = vld [vmem:[#allocation51_spill] sm:$0xff]  ;;  %v7615_v44 = vld [vmem:[#allocation54_spill] sm:$0xff] }
 0x191   : > { %v1397_v51 = vsel %vm1375_vm8, %v1364_v8, %v7606_v7  ;;  %v7616_v7 = vld [vmem:[#allocation62_spill] sm:$0xff] }
 0x192   : > { %1010 = vrot.lane.b32.xlu1 %v650_v55, %s4460_s6  ;;  %v1430_v47 = vsel %vm1408_vm7, %v1397_v51, %v5524_v39  ;;  %v7617_v51 = vld [vmem:[#allocation11_spill] sm:$0xff] }
 0x193   : > { %1264 = vrot.lane.b32.xlu0 %v7600_v38, %s4464_s26  ;;  %v1463_v15 = vsel %vm1441_vm9, %v1430_v47, %v5576_v36  ;;  %v7618_v47 = vld [vmem:[#allocation86_spill] sm:$0xff] }
 0x194   : > { %v1255_v34 = vpop.permute.xlu1 %1254  ;;  %v1287_v35 = vpop.permute.xlu0 %1286  ;;  %v1496_v28 = vsel %vm1474_vm10, %v1463_v15, %v5627_v63 }
 0x195   : > { %v1578_v12 = vsel %vm1573_vm13, %v1545_v22, %v1255_v34  ;;  %v1594_v19 = vsel %vm1573_vm13, %v1561_v30, %v1287_v35  ;;  %v1529_v53 = vsel %vm1507_vm11, %v1496_v28, %v5647_v32 }
 0x196   : > { %1296 = vrot.lane.b32.xlu1 %v652_v0, %s4464_s26  ;;  %4251 = vmatprep.mubr.msk.f32.mxu0 %vm1617_vm14, %v1578_v12  ;;  %v1562_v40 = vsel %vm1540_vm12, %v1529_v53, %v1193_v4  ;;  %v7613_v12 = vld [vmem:[#allocation26_spill] sm:$0xff]  ;;  %v7620_v53 = vld [vmem:[#allocation33_spill] sm:$0xff] }
 0x197   : > { %714 = vrot.lane.b32.xlu0 %v650_v55, %s4457_s30  ;;  %4275 = vmatprep.mubr.msk.f32.mxu1 %vm1617_vm14, %v1594_v19  ;;  %v1381_v55 = vsel %vm1375_vm8, %v1348_v3, %v7605_v13 }
 0x198   : > { %v5712_v1 = vpop.permute.xlu1 %871  ;;  %v5714_v33 = vpop.permute.xlu0 %903  ;;  %v1414_v17 = vsel %vm1408_vm7, %v1381_v55, %v5522_v31  ;;  %v7607_v31 = vld [vmem:[#allocation20_spill] sm:$0xff] }
 0x199   : > { %v1447_v21 = vsel %vm1441_vm9, %v1414_v17, %v5574_v48  ;;  %v7608_v48 = vld [vmem:[#allocation45_spill] sm:$0xff]  ;;  %v1349_v17 = vsel %vm1342_vm6, %v7617_v51, %v7616_v7 }
 0x19a   : > { %980 = vrot.lane.b32.xlu1 %v7600_v38, %s4460_s6  ;;  %v1480_v56 = vsel %vm1474_vm10, %v1447_v21, %v5625_v5  ;;  %v653_v19 = vrot.slane %v7608_v48, 2  ;;  %v1382_v21 = vsel %vm1375_vm8, %v1349_v17, %v7618_v47  ;;  %v7625_v47 = vld [vmem:[#allocation10_spill] sm:$0xff] }
 0x19b   : > { %1012 = vrot.lane.b32.xlu0 %v652_v0, %s4460_s6  ;;  %v1513_v39 = vsel %vm1507_vm11, %v1480_v56, %v5645_v57  ;;  %v1415_v56 = vsel %vm1408_vm7, %v1382_v21, %v5637_v25  ;;  %v7622_v25 = vld [vmem:[#allocation47_spill] sm:$0xff] }
 0x19c   : > { %v971_v23 = vpop.permute.xlu1 %970  ;;  %v5733_v24 = vpop.permute.xlu0 %1002  ;;  %v1546_v36 = vsel %vm1540_vm12, %v1513_v39, %v1161_v49  ;;  %v7609_v49 = vld [vmem:[#allocation19_spill] sm:$0xff]  ;;  %v655_v8 = vsel %vm577_vm2, %v653_v19, %v654_v62  ;;  %v7619_v39 = vld [vmem:[#allocation74_spill] sm:$0xff] }
 0x19e   : > { %1074 = vrot.lane.b32.xlu1 %v7607_v31, %s4461_s7 }
 0x19f   : > { %1106 = vrot.lane.b32.xlu0 %v7608_v48, %s4461_s7 }
 0x1a0   : > { %v1257_v5 = vpop.permute.xlu1 %1256  ;;  %v1289_v41 = vpop.permute.xlu0 %1288 }
 0x1a1   : > { %v1579_v63 = vsel %vm1573_vm13, %v1546_v36, %v1257_v5  ;;  %v1595_v18 = vsel %vm1573_vm13, %v1562_v40, %v1289_v41  ;;  %v1365_v36 = vsel %vm1342_vm6, %v7620_v53, %v7619_v39  ;;  %v1448_v40 = vsel %vm1441_vm9, %v1415_v56, %v5667_v52  ;;  %v7621_v5 = vld [vmem:[#allocation95_spill] sm:$0xff] }
 0x1a2   : > { %716 = vrot.lane.b32.xlu1 %v652_v0, %s4457_s30  ;;  %4252 = vmatmul.mubr.msk.f32.gmra.mrb[4].mxu0 %vm1617_vm14, %v1579_v63  ;;  %v7612_v0 = vld [vmem:[#allocation50_spill] sm:$0xff]  ;;  %v1398_v41 = vsel %vm1375_vm8, %v1365_v36, %v7621_v5  ;;  %v1481_v63 = vsel %vm1474_vm10, %v1448_v40, %v971_v23  ;;  %v7626_v56 = vld [vmem:[#allocation87_spill] sm:$0xff] }
 0x1a3   : > { %779 = vrot.lane.b32.xlu0 %v7607_v31, %s4458_s4  ;;  %4276 = vmatmul.mubr.msk.f32.gmra.mrb[4].mxu1 %vm1617_vm14, %v1595_v18  ;;  %v656_v18 = vrot.slane %v7622_v25, 2  ;;  %v7627_v40 = vld [vmem:[#allocation75_spill] sm:$0xff]  ;;  %v7628_v5 = vld [vmem:[#allocation34_spill] sm:$0xff] }
 0x1a4   : > { %v5760_v57 = vpop.permute.xlu1 %972  ;;  %v5762_v32 = vpop.permute.xlu0 %1004 }
 0x1a6   : > { %811 = vrot.lane.b32.xlu1 %v7608_v48, %s4458_s4 }
 0x1a7   : > { %1076 = vrot.lane.b32.xlu0 %v7609_v49, %s4461_s7 }
 0x1a8   : > { %v1067_v4 = vpop.permute.xlu1 %1066 }
 0x1a9   : > { %v1099_v46 = vpop.permute.xlu0 %1098 }
 0x1aa   : > { %1108 = vrot.lane.b32.xlu1 %v7610_v61, %s4461_s7 }
 0x1ab   : > { %1170 = vrot.lane.b32.xlu0 %v7611_v54, %s4462_s8 }
 0x1ac   : > { %v5772_v26 = vpop.permute.xlu1 %708 }
 0x1ad   : > { %v5774_v38 = vpop.permute.xlu0 %771 }
 0x1ae   : > { %1202 = vrot.lane.b32.xlu1 %v7612_v0, %s4462_s8 }
 0x1af   : > { %781 = vrot.lane.b32.xlu0 %v7609_v49, %s4458_s4 }
 0x1b0   : > { %v5780_v22 = vpop.permute.xlu1 %803 }
 0x1b1   : > { %v5782_v30 = vpop.permute.xlu0 %1068 }
 0x1b2   : > { %813 = vrot.lane.b32.xlu1 %v7610_v61, %s4458_s4 }
 0x1b3   : > { %881 = vrot.lane.b32.xlu0 %v7611_v54, %s4459_s5  ;;  %v1431_v54 = vsel %vm1408_vm7, %v1398_v41, %v5639_v14  ;;  %v7623_v14 = vld [vmem:[#allocation55_spill] sm:$0xff]  ;;  %v1366_v41 = vsel %vm1342_vm6, %v7628_v5, %v7627_v40 }
 0x1b4   : > { %v5788_v34 = vpop.permute.xlu1 %1100 }
 0x1b5   : > { %v1163_v35 = vpop.permute.xlu0 %1162 }
 0x1b6   : > { %913 = vrot.lane.b32.xlu1 %v7612_v0, %s4459_s5  ;;  %v1514_v0 = vsel %vm1507_vm11, %v1481_v63, %v1067_v4  ;;  %v657_v4 = vsel %vm577_vm2, %v654_v62, %v656_v18 }
 0x1b7   : > { %1172 = vrot.lane.b32.xlu0 %v7613_v12, %s4462_s8  ;;  %v1547_v19 = vsel %vm1540_vm12, %v1514_v0, %v1163_v35 }
 0x1b8   : > { %v1195_v58 = vpop.permute.xlu1 %1194 }
 0x1b9   : > { %v5796_v3 = vpop.permute.xlu0 %773 }
 0x1ba   : > { %1204 = vrot.lane.b32.xlu1 %v7614_v37, %s4462_s8 }
 0x1bb   : > { %1266 = vrot.lane.b32.xlu0 %v7615_v44, %s4464_s26 }
 0x1bc   : > { %v5803_v13 = vpop.permute.xlu1 %805 }
 0x1bd   : > { %v5805_v55 = vpop.permute.xlu0 %873 }
 0x1be   : > { %1298 = vrot.lane.b32.xlu1 %v655_v8, %s4464_s26 }
 0x1bf   : > { %883 = vrot.lane.b32.xlu0 %v7613_v12, %s4459_s5  ;;  %v1464_v12 = vsel %vm1441_vm9, %v1431_v54, %v5669_v2 }
 0x1c0   : > { %v5815_v15 = vpop.permute.xlu1 %905  ;;  %v1497_v23 = vsel %vm1474_vm10, %v1464_v12, %v5733_v24  ;;  %v199_v24 = vld [vmem:[%s4560_s28 + $0xf0] sm:$0xff] }
 0x1c1   : > { %v1165_v28 = vpop.permute.xlu0 %1164  ;;  %v1530_v7 = vsel %vm1507_vm11, %v1497_v23, %v1099_v46  ;;  %v7624_v46 = vld [vmem:[#allocation63_spill] sm:$0xff]  ;;  %v282_v39 = vrot.slane %v199_v24, 7 }
 0x1c2   : > { %915 = vrot.lane.b32.xlu1 %v7614_v37, %s4459_s5  ;;  %v1563_v2 = vsel %vm1540_vm12, %v1530_v7, %v1195_v58  ;;  %v1350_v21 = vsel %vm1342_vm6, %v7625_v47, %v7624_v46 }
 0x1c3   : > { %982 = vrot.lane.b32.xlu0 %v7615_v44, %s4460_s6  ;;  %v1383_v62 = vsel %vm1375_vm8, %v1350_v21, %v7626_v56  ;;  %v7632_v21 = vld [vmem:[#allocation27_spill] sm:$0xff] }
 0x1c4   : > { %v1197_v52 = vpop.permute.xlu1 %1196  ;;  %v1416_v53 = vsel %vm1408_vm7, %v1383_v62, %v5660_v16  ;;  %v7633_v62 = vld [vmem:[#allocation66_spill] sm:$0xff] }
 0x1c5   : > { %v1259_v37 = vpop.permute.xlu0 %1258  ;;  %v1449_v63 = vsel %vm1441_vm9, %v1416_v53, %v5712_v1  ;;  %v5885_v1 = vsel %vm234_vm0, 0.0, %v282_v39  ;;  %v7634_v53 = vld [vmem:[#allocation79_spill] sm:$0xff] }
 0x1c6   : > { %v1580_v44 = vsel %vm1573_vm13, %v1547_v19, %v1259_v37  ;;  %1014 = vrot.lane.b32.xlu1 %v655_v8, %s4460_s6  ;;  %v1482_v18 = vsel %vm1474_vm10, %v1449_v63, %v5760_v57  ;;  %v200_v57 = vld [vmem:[%s4560_s28 + $0xf8] sm:$0xff]  ;;  %v1370_v40 = vsel %vm1342_vm6, %v7580_v43, %v7634_v53  ;;  %s7316_s28 = scalar_lea.hbm %s7361_s3, %s4197_s20 }
 0x1c7   : > { %1268 = vrot.lane.b32.xlu0 %v7623_v14, %s4464_s26  ;;  %4254 = vmatprep.mubr.msk.f32.mxu0 %vm1617_vm14, %v1580_v44  ;;  %v1515_v54 = vsel %vm1507_vm11, %v1482_v18, %v5782_v30  ;;  %v7630_v44 = vld [vmem:[#allocation24_spill] sm:$0xff]  ;;  %v283_v7 = vrot.slane %v200_v57, 7 }
 0x1c8   : > { %v1291_v35 = vpop.permute.xlu1 %1290  ;;  %v1548_v19 = vsel %vm1540_vm12, %v1515_v54, %v1165_v28 }
 0x1c9   : > { %v1596_v51 = vsel %vm1573_vm13, %v1563_v2, %v1291_v35  ;;  %v5849_v17 = vpop.permute.xlu0 %875 }
 0x1ca   : > { %1300 = vrot.lane.b32.xlu1 %v657_v4, %s4464_s26  ;;  %4278 = vmatprep.mubr.msk.f32.mxu1 %vm1617_vm14, %v1596_v51 }
 0x1cb   : > { %718 = vrot.lane.b32.xlu0 %v655_v8, %s4457_s30  ;;  %v7629_v8 = vld [vmem:[#allocation96_spill] sm:$0xff] }
 0x1cc   : > { %v5860_v58 = vpop.permute.xlu1 %907  ;;  %v1399_v25 = vsel %vm1375_vm8, %v1366_v41, %v7629_v8  ;;  %v7635_v41 = vld [vmem:[#allocation90_spill] sm:$0xff] }
 0x1cd   : > { %v5864_v36 = vpop.permute.xlu0 %974  ;;  %v1432_v16 = vsel %vm1408_vm7, %v1399_v25, %v5662_v42 }
 0x1ce   : > { %984 = vrot.lane.b32.xlu1 %v7623_v14, %s4460_s6  ;;  %v1465_v12 = vsel %vm1441_vm9, %v1432_v16, %v5714_v33  ;;  %v7631_v14 = vld [vmem:[#allocation78_spill] sm:$0xff] }
 0x1cf   : > { %1016 = vrot.lane.b32.xlu0 %v657_v4, %s4460_s6  ;;  %v1498_v23 = vsel %vm1474_vm10, %v1465_v12, %v5762_v32  ;;  %v1369_v32 = vsel %vm1342_vm6, %v4854_v50, %v7631_v14  ;;  %v852_v50 = vrot.slane %v5885_v1, 1 }
 0x1d0   : > { %v5882_v0 = vpop.permute.xlu1 %1006  ;;  %v1531_v30 = vsel %vm1507_vm11, %v1498_v23, %v5788_v34  ;;  %v7636_v23 = vld [vmem:[#allocation29_spill] sm:$0xff] }
 0x1d1   : > { %v1261_v37 = vpop.permute.xlu0 %1260  ;;  %v1564_v33 = vsel %vm1540_vm12, %v1531_v30, %v1197_v52  ;;  %v5914_v52 = vsel %vm234_vm0, %v282_v39, %v283_v7  ;;  %v1353_v39 = vsel %vm1342_vm6, %v4652_v59, %v7633_v62  ;;  %v367_v59 = vsel %vm234_vm0, %v283_v7, 0.0 }
 0x1d2   : > { %v1581_v42 = vsel %vm1573_vm13, %v1548_v19, %v1261_v37  ;;  %1078 = vrot.lane.b32.xlu1 %v7630_v44, %s4461_s7  ;;  %v1386_v63 = vsel %vm1375_vm8, %v1353_v39, %v7635_v41  ;;  %v855_v12 = vrot.slane %v367_v59, 1  ;;  %v954_v57 = vrot.slane %v5914_v52, 2  ;;  %v7643_v41 = vld [vmem:[#allocation76_spill] sm:$0xff] }
 0x1d3   : > { %1110 = vrot.lane.b32.xlu0 %v5885_v1, %s4461_s7  ;;  %4255 = vmatmul.mubr.msk.f32.gmra.mrb[6].mxu0 %vm1617_vm14, %v1581_v42  ;;  %vm3576_vm0 = vcmask 64512  }
 0x1d4   : > { %v1293_v28 = vpop.permute.xlu1 %1292 }
 0x1d5   : > { %v1597_v2 = vsel %vm1573_vm13, %v1564_v33, %v1293_v28  ;;  %v711_v35 = vpop.permute.xlu0 %710  ;;  %v7638_v28 = vld [vmem:[#allocation39_spill] sm:$0xff] }
 0x1d6   : > { %v1402_v51 = vsel %vm1375_vm8, %v1369_v32, %v711_v35  ;;  %720 = vrot.lane.b32.xlu1 %v657_v4, %s4457_s30  ;;  %4279 = vmatmul.mubr.msk.f32.gmra.mrb[6].mxu1 %vm1617_vm14, %v1597_v2  ;;  %v853_v4 = vrot.slane %v5914_v52, 1  ;;  %s4473_s30 = smov [#allocation2]  }
 0x1d7   : > { %783 = vrot.lane.b32.xlu0 %v7630_v44, %s4458_s4  ;;  %v7637_v44 = vld [vmem:[#allocation67_spill] sm:$0xff] }
 0x1d8   : > { %v5911_v34 = vpop.permute.xlu1 %976  ;;  %v854_v56 = vsel %vm400_vm1, %v852_v50, %v853_v4  ;;  %v856_v42 = vsel %vm400_vm1, %v853_v4, %v855_v12  ;;  %v1354_v30 = vsel %vm1342_vm6, %v4660_v6, %v7637_v44  ;;  %v7640_v50 = vld [vmem:[#allocation64_spill] sm:$0xff]  ;;  %v7641_v4 = vld [vmem:[#allocation13_spill] sm:$0xff]  ;;  %vm3833_vm1 = vcmask 1041409  }
 0x1d9   : > { %v5916_v24 = vpop.permute.xlu0 %1008  ;;  %v1387_v7 = vsel %vm1375_vm8, %v1354_v30, %v7638_v28 }
 0x1da   : > { %815 = vrot.lane.b32.xlu1 %v5885_v1, %s4458_s4 }
 0x1db   : > { %1080 = vrot.lane.b32.xlu0 %v4728_v60, %s4461_s7 }
 0x1dc   : > { %v1071_v46 = vpop.permute.xlu1 %1070 }
 0x1dd   : > { %v5924_v47 = vpop.permute.xlu0 %1102 }
 0x1de   : > { %1112 = vrot.lane.b32.xlu1 %v5914_v52, %s4461_s7 }
 0x1df   : > { %1174 = vrot.lane.b32.xlu0 %v7632_v21, %s4462_s8 }
 0x1e0   : > { %v713_v5 = vpop.permute.xlu1 %712 }
 0x1e1   : > { %v1403_v8 = vsel %vm1375_vm8, %v1370_v40, %v713_v5  ;;  %v776_v25 = vpop.permute.xlu0 %775 }
 0x1e2   : > { %v1419_v18 = vsel %vm1408_vm7, %v1386_v63, %v776_v25  ;;  %1206 = vrot.lane.b32.xlu1 %v854_v56, %s4462_s8  ;;  %v7644_v63 = vld [vmem:[#allocation37_spill] sm:$0xff] }
 0x1e3   : > { %785 = vrot.lane.b32.xlu0 %v4728_v60, %s4458_s4  ;;  %v953_v60 = vrot.slane %v5885_v1, 2  ;;  %v7639_v1 = vld [vmem:[#allocation56_spill] sm:$0xff] }
 0x1e4   : > { %v808_v16 = vpop.permute.xlu1 %807 }
 0x1e5   : > { %v1435_v54 = vsel %vm1408_vm7, %v1402_v51, %v808_v16  ;;  %v5946_v43 = vpop.permute.xlu0 %1072  ;;  %v955_v2 = vsel %vm577_vm2, %v953_v60, %v954_v57 }
 0x1e6   : > { %817 = vrot.lane.b32.xlu1 %v5914_v52, %s4458_s4  ;;  %s4395_s4 = sshll.u32 %s4473_s30, 4  ;;  %s4396_s4 = int_to_ptr.vmem [resolvable:$false] %s4395_s4 }
 0x1e7   : > { %885 = vrot.lane.b32.xlu0 %v7632_v21, %s4459_s5  ;;  %v1351_v21 = vsel %vm1342_vm6, %v7641_v4, %v7640_v50  ;;  %v7651_v50 = vld [vmem:[#allocation36_spill] sm:$0xff]  ;;  %p4398_p0 = scmp.lt.s32.totalorder %s7318_s25, %s4396_s4 }
 0x1e8   : > { %v5952_v19 = vpop.permute.xlu1 %1104 }
 0x1e9   : > { %v1167_v37 = vpop.permute.xlu0 %1166 }
 0x1ea   : > { %917 = vrot.lane.b32.xlu1 %v854_v56, %s4459_s5  ;;  %v7642_v56 = vld [vmem:[#allocation88_spill] sm:$0xff] }
 0x1eb   : > { %1176 = vrot.lane.b32.xlu0 %v7636_v23, %s4462_s8  ;;  %v1384_v62 = vsel %vm1375_vm8, %v1351_v21, %v7642_v56  ;;  %v7652_v56 = vld [vmem:[#allocation6_spill] sm:$0xff] }
 0x1ec   : > { %v1199_v33 = vpop.permute.xlu1 %1198  ;;  %v1417_v53 = vsel %vm1408_vm7, %v1384_v62, %v5774_v38  ;;  %v956_v38 = vrot.slane %v367_v59, 2  ;;  %v4374_v62 = vpack.i.bf16 %v7579_v27, %v7652_v56 }
 0x1ed   : > { %v778_v14 = vpop.permute.xlu0 %777  ;;  %v1450_v25 = vsel %vm1441_vm9, %v1417_v53, %v5805_v55 }
 0x1ee   : > { %v1420_v32 = vsel %vm1408_vm7, %v1387_v7, %v778_v14  ;;  %1208 = vrot.lane.b32.xlu1 %v856_v42, %s4462_s8  ;;  %v1483_v12 = vsel %vm1474_vm10, %v1450_v25, %v5864_v36  ;;  %v7648_v14 = vld [vmem:[#allocation12_spill] sm:$0xff] }
 0x1ef   : > { %1270 = vrot.lane.b32.xlu0 %v7639_v1, %s4464_s26  ;;  %v1516_v60 = vsel %vm1507_vm11, %v1483_v12, %v1071_v46 }
 0x1f0   : > { %v810_v35 = vpop.permute.xlu1 %809 }
 0x1f1   : > { %v5971_v51 = vsel %vm1408_vm7, %v1403_v8, %v810_v35  ;;  %v878_v52 = vpop.permute.xlu0 %877  ;;  %v1367_v8 = vsel %vm1342_vm6, %v7644_v63, %v7643_v41 }
 0x1f2   : > { %v5974_v6 = vsel %vm1441_vm9, %v1419_v18, %v878_v52  ;;  %1302 = vrot.lane.b32.xlu1 %v955_v2, %s4464_s26  ;;  %v7645_v18 = vld [vmem:[#allocation97_spill] sm:$0xff] }
 0x1f3   : > { %887 = vrot.lane.b32.xlu0 %v7636_v23, %s4459_s5  ;;  %v1400_v16 = vsel %vm1375_vm8, %v1367_v8, %v7645_v18  ;;  %v7650_v52 = vld [vmem:[#allocation77_spill] sm:$0xff] }
 0x1f4   : > { %v910_v39 = vpop.permute.xlu1 %909  ;;  %v1368_v4 = vsel %vm1342_vm6, %v7651_v50, %v7650_v52 }
 0x1f5   : > { %v5987_v40 = vsel %vm1441_vm9, %v1435_v54, %v910_v39  ;;  %v1169_v5 = vpop.permute.xlu0 %1168  ;;  %v1433_v54 = vsel %vm1408_vm7, %v1400_v16, %v5780_v22  ;;  %v7646_v22 = vld [vmem:[#allocation57_spill] sm:$0xff]  ;;  %v1401_v39 = vsel %vm1375_vm8, %v1368_v4, %v5772_v26  ;;  %v7654_v16 = vld [vmem:[#allocation31_spill] sm:$0xff] }
 0x1f6   : > { %919 = vrot.lane.b32.xlu1 %v856_v42, %s4459_s5  ;;  %v1466_v55 = vsel %vm1441_vm9, %v1433_v54, %v5815_v15  ;;  %v1549_v42 = vsel %vm1540_vm12, %v1516_v60, %v1167_v37  ;;  %v957_v15 = vsel %vm577_vm2, %v954_v57, %v956_v38  ;;  %v7649_v57 = vld [vmem:[#allocation89_spill] sm:$0xff]  ;;  %v1434_v53 = vsel %vm1408_vm7, %v1401_v39, %v5803_v13  ;;  %v7656_v38 = vld [vmem:[#allocation32_spill] sm:$0xff]  ;;  %s4397_s5 = scalar_lea.vmem %s4396_s4, 256 }
 0x1f7   : > { %986 = vrot.lane.b32.xlu0 %v7639_v1, %s4460_s6  ;;  %v1499_v30 = vsel %vm1474_vm10, %v1466_v55, %v5882_v0  ;;  %v1467_v27 = vsel %vm1441_vm9, %v1434_v53, %v5860_v58  ;;  %v2011_v60 = vlaneseq  ;;  %vm3835_vm2 = vcmask 1042434   ;;  %p4399_p1 = scmp.lt.s32.totalorder %s4397_s5, %s4391_s16 }
 0x1f8   : > { %v1201_v23 = vpop.permute.xlu1 %1200  ;;  %v1532_v59 = vsel %vm1507_vm11, %v1499_v30, %v5924_v47  ;;  %v7647_v47 = vld [vmem:[#allocation65_spill] sm:$0xff] }
 0x1f9   : > { %v1263_v44 = vpop.permute.xlu0 %1262  ;;  %v1565_v46 = vsel %vm1540_vm12, %v1532_v59, %v1199_v33  ;;  %v1352_v1 = vsel %vm1342_vm6, %v7648_v14, %v7647_v47  ;;  %v7660_v59 = vld [vmem:[#allocation59_spill] sm:$0xff]  ;;  %p4400_p2 = por %p4399_p1, %p4398_p0 }
 0x1fa   : > { %v1582_v36 = vsel %vm1573_vm13, %v1549_v42, %v1263_v44  ;;  %1018 = vrot.lane.b32.xlu1 %v955_v2, %s4460_s6  ;;  %v1385_v33 = vsel %vm1375_vm8, %v1352_v1, %v7649_v57  ;;  %v7658_v44 = vld [vmem:[#allocation35_spill] sm:$0xff] }
 0x1fb   : > { %1272 = vrot.lane.b32.xlu0 %v7646_v22, %s4464_s26  ;;  %4257 = vmatprep.mubr.msk.f32.mxu0 %vm1617_vm14, %v1582_v36  ;;  %v6094_v36 = vshrl.u32 %v2011_v60, 7  ;;  %v7664_v47 = vld [vmem:[#allocation91_spill] sm:$0xff]  ;;  %p4401_p3 = pnand %p4400_p2, %p4394_p13 }
 0x1fc   : > { %v1295_v37 = vpop.permute.xlu1 %1294 }
 0x1fd   : > { %v1598_v28 = vsel %vm1573_vm13, %v1565_v46, %v1295_v37  ;;  %v880_v0 = vpop.permute.xlu0 %879  ;;  %7659 = vst [vmem:[#allocation38_spill] sm:$0xff] %v6094_v36  ;;  %v7663_v37 = vld [vmem:[#allocation81_spill] sm:$0xff] }
 0x1fe   : > { %v6020_v7 = vsel %vm1441_vm9, %v1420_v32, %v880_v0  ;;  %1304 = vrot.lane.b32.xlu1 %v957_v15, %s4464_s26  ;;  %4281 = vmatprep.mubr.msk.f32.mxu1 %vm1617_vm14, %v1598_v28  ;;  %v1418_v32 = vsel %vm1408_vm7, %v1385_v33, %v5796_v3  ;;  %v1372_v28 = vsel %vm1342_vm6, %v7587_v29, %v7663_v37 }
 0x1ff   : > { %988 = vrot.lane.b32.xlu0 %v7646_v22, %s4460_s6  ;;  %v1451_v21 = vsel %vm1441_vm9, %v1418_v32, %v5849_v17  ;;  %v6101_v22 = vld [vmem:[%s7360_s2] ss:$0 sm:$0xff] }
 0x200   : > { %v6031_v2 = vpop.permute.xlu1 %911  ;;  %v1484_v3 = vsel %vm1474_vm10, %v1451_v21, %v5911_v34  ;;  %v1500_v34 = vsel %vm1474_vm10, %v1467_v27, %v5916_v24  ;;  %7661 = vst [vmem:[#allocation5_spill] sm:$0xff] %v6101_v22 }
 0x201   : > { %v6035_v35 = vpop.permute.xlu0 %978  ;;  %v1517_v17 = vsel %vm1507_vm11, %v1484_v3, %v5946_v43  ;;  %v7653_v43 = vld [vmem:[#allocation80_spill] sm:$0xff] }
 0x202   : > { %1020 = vrot.lane.b32.xlu1 %v957_v15, %s4460_s6  ;;  %v1550_v63 = vsel %vm1540_vm12, %v1517_v17, %v1169_v5  ;;  %v1371_v5 = vsel %vm1342_vm6, %v4881_v20, %v7653_v43  ;;  %v4465_v20 = vmov 1983009808   ;;  %v7662_v15 = vld [vmem:[#allocation68_spill] sm:$0xff]  ;;  %v7666_v17 = vld [vmem:[#allocation69_spill] sm:$0xff]  ;;  %s4467_s6 = smov 16  }
 0x203   : > { %1082 = vrot.lane.b32.xlu0 %v4750_v11, %s4461_s7  ;;  %v1533_v11 = vsel %vm1507_vm11, %v1500_v34, %v5952_v19  ;;  %v2009_v54 = vunpack.c.l.s4 %v4465_v20  ;;  %v1355_v46 = vsel %vm1342_vm6, %v4672_v10, %v7662_v15  ;;  %v1356_v27 = vsel %vm1342_vm6, %v7586_v45, %v7666_v17  ;;  %v7667_v34 = vld [vmem:[#allocation70_spill] sm:$0xff] }
 0x204   : > { %v6055_v41 = vpop.permute.xlu1 %1010  ;;  %v1566_v13 = vsel %vm1540_vm12, %v1533_v11, %v1201_v23  ;;  %v7657_v23 = vld [vmem:[#allocation58_spill] sm:$0xff]  ;;  %v1388_v14 = vsel %vm1375_vm8, %v1355_v46, %v7664_v47 }
 0x205   : > { %v1265_v26 = vpop.permute.xlu0 %1264  ;;  %v2010_v30 = vunpack.c.0.s8 %v2009_v54  ;;  %v7668_v11 = vld [vmem:[#allocation82_spill] sm:$0xff] }
 0x206   : > { %v1583_v8 = vsel %vm1573_vm13, %v1550_v63, %v1265_v26  ;;  %4375 = vrot.lane.b32.xlu1 %v4374_v62, %s4461_s7 }
 0x207   : > { %1084 = vrot.lane.b32.xlu0 %v4747_v9, %s4461_s7  ;;  %4258 = vmatmul.mubr.msk.f32.gmra.mrb[8].mxu0 %vm1617_vm14, %v1583_v8  ;;  %v7655_v9 = vld [vmem:[#allocation7_spill] sm:$0xff]  ;;  %v6119_v10 = vsub.s32 %v2010_v30, %v6094_v36  ;;  %v1357_v8 = vsel %vm1342_vm6, %v7607_v31, %v7667_v34  ;;  %s4468_s7 = smov 8  }
 0x208   : > { %v1297_v58 = vpop.permute.xlu1 %1296  ;;  %v7669_v34 = vld [vmem:[#allocation83_spill] sm:$0xff] }
 0x209   : > { %v1599_v24 = vsel %vm1573_vm13, %v1566_v13, %v1297_v58  ;;  %v715_v25 = vpop.permute.xlu0 %714  ;;  %7665 = vst [vmem:[#allocation41_spill] sm:$0xff] %v6119_v10  ;;  %v6137_v13 = vsel %vm1342_vm6, %v7608_v48, %v7668_v11  ;;  %v6163_v11 = vsel %vm1342_vm6, %v7610_v61, %v7669_v34 }
 0x20a   : > { %v1404_v18 = vsel %vm1375_vm8, %v1371_v5, %v715_v25  ;;  %1178 = vrot.lane.b32.xlu1 %v7654_v16, %s4462_s8  ;;  %4282 = vmatmul.mubr.msk.f32.gmra.mrb[8].mxu1 %vm1617_vm14, %v1599_v24  ;;  %7670 = vst [vmem:[#allocation18_spill] sm:$0xff] %v6163_v11 }
 0x20b   : > { %4380 = vrot.lane.b32.xlu0 %v7655_v9, %s4462_s8 }
 0x20c   : > { %v6080_v19 = vpop.permute.xlu1 %980 }
 0x20d   : > { %v6082_v12 = vpop.permute.xlu0 %1012 }
 0x20e   : > { %1180 = vrot.lane.b32.xlu1 %v7656_v38, %s4462_s8  ;;  %s4469_s8 = smov 32  }
 0x20f   : > { %1274 = vrot.lane.b32.xlu0 %v7657_v23, %s4464_s26 }
 0x210   : > { %v6088_v55 = vpop.permute.xlu1 %1074 }
 0x211   : > { %v6090_v42 = vpop.permute.xlu0 %1106 }
 0x212   : > { %4385 = vrot.lane.b32.xlu1 %v7658_v44, %s4464_s26 }
 0x213   : > { %1276 = vrot.lane.b32.xlu0 %v7660_v59, %s4464_s26 }
 0x214   : > { %v717_v0 = vpop.permute.xlu1 %716 }
 0x215   : > { %v6112_v1 = vsel %vm1375_vm8, %v1372_v28, %v717_v0  ;;  %v780_v57 = vpop.permute.xlu0 %779  ;;  %v4247_v33 = vpop.f32.mrb[0].mxu0 }
 0x216   : > { %v6115_v32 = vsel %vm1408_vm7, %v1388_v14, %v780_v57  ;;  %v1790_v52 = vadd.f32 %v4247_v33, %v6101_v22  ;;  %v4271_v50 = vpop.f32.mrb[0].mxu1  ;;  %v1784_v4 = vpop.f32.mrb[1].mxu0 }
 0x217   : > { %v1870_v29 = vadd.f32 %v4271_v50, %v6101_v22  ;;  %v1864_v21 = vpop.f32.mrb[1].mxu1  ;;  %v1785_v25 = vadd.f32 %v6101_v22, %v1784_v4 }
 0x218   : > { %v1944_v56 = vmax.f32 %v1790_v52, 0.0  ;;  %v812_v62 = vpop.permute.xlu1 %811 }
 0x219   : > { %v1960_v39 = vmax.f32 %v1870_v29, 0.0  ;;  %v6123_v3 = vsel %vm1408_vm7, %v1404_v18, %v812_v62  ;;  %v6125_v53 = vpop.permute.xlu0 %1076 }
 0x21a   : > { %v2024_v63 = vcombine.high %v1944_v56, %v1944_v56  ;;  %v2031_v26 = vrot.slane %v1944_v56, %v6119_v10 }
 0x21b   : > { %v2296_v58 = vcombine.high %v1960_v39, %v1960_v39  ;;  %v2303_v43 = vrot.slane %v1960_v39, %v6119_v10 }
 0x21c   : > { %v2038_v5 = vrot.slane %v2024_v63, %v6119_v10  ;;  %v2039_v24 = vcombine.high %v2031_v26, %v2031_v26  ;;  %v2708_v45 = vsel %vm2679_vm15, %v2031_v26, -inf  ;;  %v6143_v18 = vpop.permute.xlu1 %1108  ;;  %v1943_v63 = vmax.f32 %v1785_v25, 0.0 }
 0x21d   : > { %v2709_v16 = vrot.slane %v2708_v45, 4  ;;  %v2310_v31 = vrot.slane %v2296_v58, %v6119_v10  ;;  %v2311_v9 = vcombine.high %v2303_v43, %v2303_v43  ;;  %v3156_v38 = vsel %vm2679_vm15, %v2303_v43, -inf  ;;  %v6147_v48 = vpop.permute.xlu0 %1170 }
 0x21e   : > { %v2040_v20 = vcombine.high %v2038_v5, %v2038_v5  ;;  %v2715_v54 = vsel %vm2679_vm15, %v2039_v24, -inf  ;;  %v2722_v60 = vsel %vm2679_vm15, %v2038_v5, -inf  ;;  %v3157_v23 = vrot.slane %v3156_v38, 4 }
 0x21f   : > { %v2710_v44 = vmax.f32 %v2708_v45, %v2709_v16  ;;  %v2716_v30 = vrot.slane %v2715_v54, 4  ;;  %v2723_v59 = vrot.slane %v2722_v60, 4  ;;  %v2312_v15 = vcombine.high %v2310_v31, %v2310_v31  ;;  %v7671_v45 = vld [vmem:[#allocation92_spill] sm:$0xff] }
 0x220   : > { %v2729_v46 = vsel %vm2679_vm15, %v2040_v20, -inf  ;;  %v3158_v37 = vmax.f32 %v3156_v38, %v3157_v23  ;;  %v3163_v28 = vsel %vm2679_vm15, %v2311_v9, -inf  ;;  %v3170_v0 = vsel %vm2679_vm15, %v2310_v31, -inf  ;;  %v6154_v47 = vpop.permute.xlu1 %1202  ;;  %v7672_v31 = vld [vmem:[#allocation93_spill] sm:$0xff] }
 0x221   : > { %v2711_v14 = vrot.slane %v2710_v44, 2  ;;  %v2717_v57 = vmax.f32 %v2715_v54, %v2716_v30  ;;  %v2724_v33 = vmax.f32 %v2722_v60, %v2723_v59  ;;  %v2730_v52 = vrot.slane %v2729_v46, 4  ;;  %v6156_v50 = vpop.permute.xlu0 %781 }
 0x222   : > { %v3159_v4 = vrot.slane %v3158_v37, 2  ;;  %v3164_v29 = vrot.slane %v3163_v28, 4  ;;  %v3171_v56 = vrot.slane %v3170_v0, 4  ;;  %v3177_v62 = vsel %vm2679_vm15, %v2312_v15, -inf }
 0x223   : > { %v2712_v39 = vmax.f32 %v2710_v44, %v2711_v14  ;;  %v2718_v17 = vrot.slane %v2717_v57, 2  ;;  %v1865_v26 = vadd.f32 %v6101_v22, %v1864_v21  ;;  %v2725_v58 = vrot.slane %v2724_v33, 2 }
 0x224   : > { %v2731_v43 = vmax.f32 %v2729_v46, %v2730_v52  ;;  %v3178_v5 = vrot.slane %v3177_v62, 4  ;;  %v6165_v24 = vpop.permute.xlu1 %813  ;;  %v6169_v16 = vsel %vm1375_vm8, %v1356_v27, %v7671_v45  ;;  %v6173_v9 = vsel %vm1375_vm8, %v1357_v8, %v7672_v31 }
 0x225   : > { %7673 = vst [vmem:[#allocation21_spill] sm:$0xff] %v6173_v9  ;;  %v1469_v21 = vsel %vm1441_vm9, %v5971_v51, %v6031_v2  ;;  %v3160_v25 = vmax.f32 %v3158_v37, %v3159_v4  ;;  %v6178_v61 = vpop.permute.xlu0 %881  ;;  %v1485_v38 = vsel %vm1474_vm10, %v5974_v6, %v6035_v35  ;;  %v2719_v20 = vmax.f32 %v2717_v57, %v2718_v17 }
 0x226   : > { %v3165_v54 = vmax.f32 %v3163_v28, %v3164_v29  ;;  %v3172_v60 = vmax.f32 %v3170_v0, %v3171_v56  ;;  %v1501_v27 = vsel %vm1474_vm10, %v5987_v40, %v6055_v41  ;;  %v2713_v8 = vrot.slane %v2712_v39, 1 }
 0x227   : > { %v2007_v23 = vcombine.high %v1943_v63, %v1943_v63  ;;  %v1959_v44 = vmax.f32 %v1865_v26, 0.0  ;;  %v2726_v30 = vmax.f32 %v2724_v33, %v2725_v58  ;;  %v2732_v59 = vrot.slane %v2731_v43, 2 }
 0x228   : > { %v3179_v51 = vmax.f32 %v3177_v62, %v3178_v5  ;;  %v2014_v2 = vrot.slane %v1943_v63, %v6119_v10  ;;  %v6187_v15 = vpop.permute.xlu1 %913  ;;  %v1486_v6 = vsel %vm1474_vm10, %v6020_v7, %v6080_v19  ;;  %v6194_v35 = vsel %vm1474_vm10, %v1469_v21, %v6082_v12 }
 0x229   : > { %v6198_v40 = vsel %vm1507_vm11, %v1485_v38, %v6088_v55  ;;  %v3161_v41 = vrot.slane %v3160_v25, 1  ;;  %v6200_v46 = vpop.permute.xlu0 %1172  ;;  %v6204_v37 = vsel %vm1507_vm11, %v1501_v27, %v6090_v42  ;;  %v2720_v28 = vrot.slane %v2719_v20, 1 }
 0x22a   : > { %v3166_v0 = vrot.slane %v3165_v54, 2  ;;  %v3173_v14 = vrot.slane %v3172_v60, 2  ;;  %v6206_v57 = vmax.f32 %v2712_v39, %v2713_v8  ;;  %v2021_v7 = vrot.slane %v2007_v23, %v6119_v10 }
 0x22b   : > { %v2279_v19 = vcombine.high %v1959_v44, %v1959_v44  ;;  %v6211_v12 = vsel %vm1507_vm11, %v1486_v6, %v6125_v53  ;;  %v2727_v55 = vrot.slane %v2726_v30, 1  ;;  %v6213_v33 = vmax.f32 %v2731_v43, %v2732_v59 }
 0x22c   : > { %v3180_v52 = vrot.slane %v3179_v51, 2  ;;  %v2022_v4 = vcombine.high %v2014_v2, %v2014_v2  ;;  %v6215_v29 = vpop.permute.xlu1 %1204  ;;  %v6217_v42 = vmax.f32 %v3160_v25, %v3161_v41  ;;  %v2023_v56 = vcombine.high %v2021_v7, %v2021_v7 }
 0x22d   : > { %v2680_v62 = vsel %vm2679_vm15, %v2014_v2, -inf  ;;  %v2694_v39 = vsel %vm2679_vm15, %v2021_v7, -inf  ;;  %v6221_v17 = vpop.permute.xlu0 %1266  ;;  %v2721_v63 = vmax.f32 %v2719_v20, %v2720_v28  ;;  %v6223_v26 = vmax.f32 %v3165_v54, %v3166_v0 }
 0x22e   : > { %v6225_v53 = vmax.f32 %v3172_v60, %v3173_v14  ;;  %v2681_v34 = vrot.slane %v2680_v62, 4  ;;  %v2687_v58 = vsel %vm2679_vm15, %v2022_v4, -inf  ;;  %v2695_v43 = vrot.slane %v2694_v39, 4 }
 0x22f   : > { %v2701_v5 = vsel %vm2679_vm15, %v2023_v56, -inf  ;;  %v2286_v45 = vrot.slane %v1959_v44, %v6119_v10  ;;  %v3181_v31 = vmax.f32 %v3179_v51, %v3180_v52  ;;  %v2688_v25 = vrot.slane %v2687_v58, 4 }
 0x230   : > { %v2682_v21 = vmax.f32 %v2680_v62, %v2681_v34  ;;  %v2702_v38 = vrot.slane %v2701_v5, 4  ;;  %v6230_v27 = vpop.permute.xlu1 %1298  ;;  %v2696_v20 = vmax.f32 %v2694_v39, %v2695_v43  ;;  %v2293_v54 = vrot.slane %v2279_v19, %v6119_v10 }
 0x231   : > { %v2294_v60 = vcombine.high %v2286_v45, %v2286_v45  ;;  %v3128_v8 = vsel %vm2679_vm15, %v2286_v45, -inf  ;;  %v6234_v23 = vpop.permute.xlu0 %883  ;;  %v2689_v2 = vmax.f32 %v2687_v58, %v2688_v25  ;;  %v2728_v56 = vmax.f32 %v2726_v30, %v2727_v55 }
 0x232   : > { %v2683_v59 = vrot.slane %v2682_v21, 2  ;;  %v2703_v6 = vmax.f32 %v2701_v5, %v2702_v38  ;;  %v3129_v41 = vrot.slane %v3128_v8, 4  ;;  %v2697_v28 = vrot.slane %v2696_v20, 2 }
 0x233   : > { %v2295_v44 = vcombine.high %v2293_v54, %v2293_v54  ;;  %v3135_v51 = vsel %vm2679_vm15, %v2294_v60, -inf  ;;  %v3142_v0 = vsel %vm2679_vm15, %v2293_v54, -inf  ;;  %v2690_v7 = vrot.slane %v2689_v2, 2 }
 0x234   : > { %v2684_v14 = vmax.f32 %v2682_v21, %v2683_v59  ;;  %v2704_v52 = vrot.slane %v2703_v6, 2  ;;  %v3130_v4 = vmax.f32 %v3128_v8, %v3129_v41  ;;  %v6238_v19 = vpop.permute.xlu1 %915  ;;  %v3136_v62 = vrot.slane %v3135_v51, 4 }
 0x235   : > { %v3143_v39 = vrot.slane %v3142_v0, 4  ;;  %v3149_v34 = vsel %vm2679_vm15, %v2295_v44, -inf  ;;  %v6241_v58 = vpop.permute.xlu0 %982  ;;  %v2734_v43 = vrot.slane %v6213_v33, 1  ;;  %v3168_v5 = vrot.slane %v6223_v26, 1 }
 0x236   : > { %7674 = vst [vmem:[#allocation42_spill] sm:$0xff] %v6241_v58  ;;  %v3175_v45 = vrot.slane %v6225_v53, 1  ;;  %v3131_v25 = vrot.slane %v3130_v4, 2  ;;  %v2698_v21 = vmax.f32 %v2696_v20, %v2697_v28  ;;  %v3137_v38 = vmax.f32 %v3135_v51, %v3136_v62 }
 0x237   : > { %v3144_v54 = vmax.f32 %v3142_v0, %v3143_v39  ;;  %v3150_v60 = vrot.slane %v3149_v34, 4  ;;  %v3182_v8 = vrot.slane %v3181_v31, 1  ;;  %v2685_v59 = vrot.slane %v2684_v14, 1 }
 0x238   : > { %v2691_v30 = vmax.f32 %v2689_v2, %v2690_v7  ;;  %v2705_v55 = vmax.f32 %v2703_v6, %v2704_v52  ;;  %v6246_v41 = vpop.permute.xlu1 %1014  ;;  %v3132_v44 = vmax.f32 %v3130_v4, %v3131_v25  ;;  %v3138_v36 = vrot.slane %v3137_v38, 2 }
 0x239   : > { %v3145_v49 = vrot.slane %v3144_v54, 2  ;;  %v3151_v9 = vmax.f32 %v3149_v34, %v3150_v60  ;;  %v1269_v10 = vpop.permute.xlu0 %1268  ;;  %v2735_v11 = vmax.f32 %v6213_v33, %v2734_v43  ;;  %v6251_v58 = vsel %vm3576_vm0, %v6206_v57, -inf }
 0x23a   : > { %v6254_v20 = vsel %vm3576_vm0, %v2721_v63, -inf  ;;  %v6258_v2 = vsel %vm3576_vm0, %v6217_v42, -inf  ;;  %v2699_v6 = vrot.slane %v2698_v21, 1  ;;  %v3139_v28 = vmax.f32 %v3137_v38, %v3138_v36 }
 0x23b   : > { %7675 = vst [vmem:[#allocation15_spill] sm:$0xff] %v6254_v20  ;;  %7676 = vst [vmem:[#allocation16_spill] sm:$0xff] %v6258_v2  ;;  %v3146_v51 = vmax.f32 %v3144_v54, %v3145_v49  ;;  %v3152_v0 = vrot.slane %v3151_v9, 2  ;;  %v6261_v7 = vsel %vm3576_vm0, %v2728_v56, -inf  ;;  %v3169_v33 = vmax.f32 %v6223_v26, %v3168_v5 }
 0x23c   : > { %7677 = vst [vmem:[#allocation17_spill] sm:$0xff] %v6261_v7  ;;  %v3176_v52 = vmax.f32 %v6225_v53, %v3175_v45  ;;  %v2692_v57 = vrot.slane %v2691_v30, 1  ;;  %v1301_v4 = vpop.permute.xlu1 %1300  ;;  %v3183_v62 = vmax.f32 %v3181_v31, %v3182_v8  ;;  %v2686_v63 = vmax.f32 %v2684_v14, %v2685_v59 }
 0x23d   : > { %v2706_v39 = vrot.slane %v2705_v55, 1  ;;  %v3133_v34 = vrot.slane %v3132_v44, 1  ;;  %v719_v43 = vpop.permute.xlu0 %718  ;;  %v3140_v42 = vrot.slane %v3139_v28, 1  ;;  %v3153_v25 = vmax.f32 %v3151_v9, %v3152_v0 }
 0x23e   : > { %v1422_v49 = vsel %vm1408_vm7, %v6169_v16, %v6156_v50  ;;  %v1438_v36 = vsel %vm1408_vm7, %v6112_v1, %v6165_v24  ;;  %v2700_v26 = vmax.f32 %v2698_v21, %v2699_v6  ;;  %v3147_v56 = vrot.slane %v3146_v51, 1 }
 0x23f   : > { %v1551_v53 = vsel %vm1540_vm12, %v6198_v40, %v6147_v48  ;;  %v1454_v31 = vsel %vm1441_vm9, %v6115_v32, %v6178_v61  ;;  %v2693_v14 = vmax.f32 %v2691_v30, %v2692_v57  ;;  %v1567_v9 = vsel %vm1540_vm12, %v6204_v37, %v6154_v47  ;;  %v7682_v57 = vld [vmem:[#allocation42_spill] sm:$0xff] }
 0x240   : > { %v1470_v50 = vsel %vm1441_vm9, %v6123_v3, %v6187_v15  ;;  %v1584_v1 = vsel %vm1573_vm13, %v1551_v53, %v6221_v17  ;;  %v6285_v24 = vpop.permute.xlu1 %984  ;;  %v2707_v16 = vmax.f32 %v2705_v55, %v2706_v39  ;;  %v3134_v48 = vmax.f32 %v3132_v44, %v3133_v34  ;;  %v7685_v53 = vld [vmem:[#allocation21_spill] sm:$0xff] }
 0x241   : > { %v1535_v32 = vsel %vm1507_vm11, %v6194_v35, %v6143_v18  ;;  %4260 = vmatprep.mubr.msk.f32.mxu0 %vm1617_vm14, %v1584_v1  ;;  %v1600_v47 = vsel %vm1573_vm13, %v1567_v9, %v6230_v27  ;;  %v6293_v61 = vpop.permute.xlu0 %1016  ;;  %v3141_v40 = vmax.f32 %v3139_v28, %v3140_v42  ;;  %v3154_v3 = vrot.slane %v3153_v25, 1  ;;  %v7683_v42 = vld [vmem:[#allocation18_spill] sm:$0xff] }
 0x242   : > { %v1552_v15 = vsel %vm1540_vm12, %v6211_v12, %v6200_v46  ;;  %v1568_v37 = vsel %vm1540_vm12, %v1535_v32, %v6215_v29  ;;  %4284 = vmatprep.mubr.msk.f32.mxu1 %vm1617_vm14, %v1600_v47  ;;  %v3148_v17 = vmax.f32 %v3146_v51, %v3147_v56  ;;  %v6305_v27 = vsel %vm1375_vm8, %v6137_v13, %v719_v43 }
 0x243   : > { %v1585_v18 = vsel %vm1573_vm13, %v1552_v15, %v1269_v10  ;;  %v1601_v35 = vsel %vm1573_vm13, %v1568_v37, %v1301_v4  ;;  %v6308_v5 = vsel %vm3576_vm0, %v2735_v11, -inf  ;;  %v6311_v45 = vsel %vm3576_vm0, %v3169_v33, -inf }
 0x244   : > { %7678 = vst [vmem:[#allocation43_spill] sm:$0xff] %v6308_v5  ;;  %7679 = vst [vmem:[#allocation22_spill] sm:$0xff] %v6311_v45  ;;  %v6314_v46 = vsel %vm3576_vm0, %v3176_v52, -inf  ;;  %v6317_v12 = vsel %vm3576_vm0, %v3183_v62, -inf  ;;  %4261 = vmatmul.mubr.msk.f32.gmra.mrb[10].mxu0 %vm1617_vm14, %v1585_v18  ;;  %4285 = vmatmul.mubr.msk.f32.gmra.mrb[10].mxu1 %vm1617_vm14, %v1601_v35  ;;  %v6321_v10 = vpop.permute.xlu1 %1078  ;;  %v6324_v13 = vsel %vm3576_vm0, %v2686_v63, -inf  ;;  %v6327_v11 = vsel %vm3576_vm0, %v2693_v14, -inf }
 0x245   : > { %7680 = vst [vmem:[#allocation48_spill] sm:$0xff] %v6314_v46  ;;  %7681 = vst [vmem:[#allocation23_spill] sm:$0xff] %v6317_v12  ;;  %v6330_v29 = vsel %vm3576_vm0, %v2700_v26, -inf  ;;  %v6333_v21 = vsel %vm3576_vm0, %v2707_v16, -inf  ;;  %v6335_v38 = vpop.permute.xlu0 %1110  ;;  %v4250_v54 = vpop.f32.mrb[2].mxu0  ;;  %v6337_v60 = vmax.f32 %v3153_v25, %v3154_v3  ;;  %v6340_v8 = vsel %vm3576_vm0, %v3134_v48, -inf }
 0x246   : > { %v6343_v59 = vsel %vm3576_vm0, %v3141_v40, -inf  ;;  %v1800_v30 = vadd.f32 %v4250_v54, %v6101_v22  ;;  %v4274_v55 = vpop.f32.mrb[2].mxu1  ;;  %v1794_v44 = vpop.f32.mrb[3].mxu0  ;;  %v6347_v6 = vsel %vm3576_vm0, %v3148_v17, -inf  ;;  %v6351_v28 = vsel %vm1441_vm9, %v1422_v49, %v6234_v23 }
 0x247   : > { %v1880_v51 = vadd.f32 %v4274_v55, %v6101_v22  ;;  %v1795_v0 = vadd.f32 %v6101_v22, %v1794_v44  ;;  %v1874_v33 = vpop.f32.mrb[3].mxu1  ;;  %v6357_v52 = vsel %vm1441_vm9, %v1438_v36, %v6238_v19  ;;  %v6361_v4 = vsel %vm1474_vm10, %v1454_v31, %v7682_v57  ;;  %v7684_v36 = vld [vmem:[#allocation41_spill] sm:$0xff] }
 0x248   : > { %v1946_v62 = vmax.f32 %v1800_v30, 0.0  ;;  %v1875_v63 = vadd.f32 %v6101_v22, %v1874_v33  ;;  %v721_v39 = vpop.permute.xlu1 %720  ;;  %v6366_v23 = vsel %vm1474_vm10, %v1470_v50, %v6246_v41 }
 0x249   : > { %v1962_v34 = vmax.f32 %v1880_v51, 0.0  ;;  %v6368_v43 = vmax.f32 %v1795_v0, 0.0  ;;  %v6372_v25 = vsel %vm1375_vm8, %v7683_v42, %v721_v39  ;;  %v784_v19 = vpop.permute.xlu0 %783 }
 0x24a   : > { %v2058_v49 = vcombine.high %v1946_v62, %v1946_v62  ;;  %v2065_v26 = vrot.slane %v1946_v62, %v7684_v36  ;;  %v6375_v56 = vmax.f32 %v1875_v63, 0.0  ;;  %v6379_v31 = vsel %vm1408_vm7, %v7685_v53, %v784_v19 }
 0x24b   : > { %7686 = vst [vmem:[#allocation49_spill] sm:$0xff] %v6379_v31  ;;  %v2330_v14 = vcombine.high %v1962_v34, %v1962_v34  ;;  %v2337_v41 = vrot.slane %v1962_v34, %v7684_v36  ;;  %v6386_v50 = vrot.slane %v6368_v43, %v7684_v36 }
 0x24c   : > { %v2072_v1 = vrot.slane %v2058_v49, %v7684_v36  ;;  %v2073_v16 = vcombine.high %v2065_v26, %v2065_v26  ;;  %v2764_v48 = vsel %vm2679_vm15, %v2065_v26, -inf  ;;  %v6392_v47 = vpop.permute.xlu1 %815 }
 0x24d   : > { %v2765_v40 = vrot.slane %v2764_v48, 4  ;;  %v2344_v3 = vrot.slane %v2330_v14, %v7684_v36  ;;  %v2345_v15 = vcombine.high %v2337_v41, %v2337_v41  ;;  %v3212_v37 = vsel %vm2679_vm15, %v2337_v41, -inf  ;;  %v6396_v17 = vpop.permute.xlu0 %1080 }
 0x24e   : > { %v2074_v18 = vcombine.high %v2072_v1, %v2072_v1  ;;  %v2771_v35 = vsel %vm2679_vm15, %v2073_v16, -inf  ;;  %v2778_v54 = vsel %vm2679_vm15, %v2072_v1, -inf  ;;  %v3213_v30 = vrot.slane %v3212_v37, 4 }
 0x24f   : > { %v2766_v55 = vmax.f32 %v2764_v48, %v2765_v40  ;;  %v2772_v44 = vrot.slane %v2771_v35, 4  ;;  %v2779_v51 = vrot.slane %v2778_v54, 4  ;;  %v2346_v0 = vcombine.high %v2344_v3, %v2344_v3 }
 0x250   : > { %v2785_v33 = vsel %vm2679_vm15, %v2074_v18, -inf  ;;  %v3214_v57 = vmax.f32 %v3212_v37, %v3213_v30  ;;  %v3219_v62 = vsel %vm2679_vm15, %v2345_v15, -inf  ;;  %v3226_v63 = vsel %vm2679_vm15, %v2344_v3, -inf  ;;  %v6403_v39 = vpop.permute.xlu1 %1112 }
 0x251   : > { %7687 = vst [vmem:[#allocation52_spill] sm:$0xff] %v6403_v39  ;;  %v2767_v34 = vrot.slane %v2766_v55, 2  ;;  %v2773_v42 = vmax.f32 %v2771_v35, %v2772_v44  ;;  %v2780_v19 = vmax.f32 %v2778_v54, %v2779_v51  ;;  %v2786_v49 = vrot.slane %v2785_v33, 4  ;;  %v6405_v26 = vpop.permute.xlu0 %1174 }
 0x252   : > { %7688 = vst [vmem:[#allocation60_spill] sm:$0xff] %v6405_v26  ;;  %v3215_v53 = vrot.slane %v3214_v57, 2  ;;  %v3220_v14 = vrot.slane %v3219_v62, 4  ;;  %v3227_v41 = vrot.slane %v3226_v63, 4  ;;  %v3233_v1 = vsel %vm2679_vm15, %v2346_v0, -inf }
 0x253   : > { %v2768_v16 = vmax.f32 %v2766_v55, %v2767_v34  ;;  %v2774_v48 = vrot.slane %v2773_v42, 2  ;;  %v2781_v40 = vrot.slane %v2780_v19, 2  ;;  %v2787_v37 = vmax.f32 %v2785_v33, %v2786_v49 }
 0x254   : > { %v3216_v15 = vmax.f32 %v3214_v57, %v3215_v53  ;;  %v3221_v18 = vmax.f32 %v3219_v62, %v3220_v14  ;;  %v3228_v3 = vmax.f32 %v3226_v63, %v3227_v41  ;;  %v3234_v30 = vrot.slane %v3233_v1, 4  ;;  %v6408_v32 = vpop.permute.xlu1 %1206 }
 0x255   : > { %v2769_v35 = vrot.slane %v2768_v16, 1  ;;  %v2775_v54 = vmax.f32 %v2773_v42, %v2774_v48  ;;  %v2782_v44 = vmax.f32 %v2780_v19, %v2781_v40  ;;  %v2788_v51 = vrot.slane %v2787_v37, 2  ;;  %v6410_v9 = vpop.permute.xlu0 %785 }
 0x256   : > { %v3217_v31 = vrot.slane %v3216_v15, 1  ;;  %v3222_v22 = vrot.slane %v3221_v18, 2  ;;  %v3229_v39 = vrot.slane %v3228_v3, 2  ;;  %v3235_v0 = vmax.f32 %v3233_v1, %v3234_v30 }
 0x257   : > { %v2770_v55 = vmax.f32 %v2768_v16, %v2769_v35  ;;  %v2776_v34 = vrot.slane %v2775_v54, 1  ;;  %v2783_v26 = vrot.slane %v2782_v44, 1  ;;  %v2789_v33 = vmax.f32 %v2787_v37, %v2788_v51 }
 0x258   : > { %v3218_v57 = vmax.f32 %v3216_v15, %v3217_v31  ;;  %v3223_v62 = vmax.f32 %v3221_v18, %v3222_v22  ;;  %v3230_v63 = vmax.f32 %v3228_v3, %v3229_v39  ;;  %v3236_v49 = vrot.slane %v3235_v0, 2  ;;  %v6412_v53 = vpop.permute.xlu1 %817 }
 0x259   : > { %v2777_v14 = vmax.f32 %v2775_v54, %v2776_v34  ;;  %v2784_v42 = vmax.f32 %v2782_v44, %v2783_v26  ;;  %v2790_v19 = vrot.slane %v2789_v33, 1  ;;  %v6415_v41 = vsel %vm3576_vm0, %v2770_v55, -inf  ;;  %v6417_v48 = vpop.permute.xlu0 %885 }
 0x25a   : > { %v3224_v16 = vrot.slane %v3223_v62, 1  ;;  %v3231_v40 = vrot.slane %v3230_v63, 1  ;;  %v3237_v37 = vmax.f32 %v3235_v0, %v3236_v49  ;;  %v6428_v26 = vsel %vm3576_vm0, %v3218_v57, -inf }
 0x25b   : > { %v2791_v31 = vmax.f32 %v2789_v33, %v2790_v19  ;;  %v6422_v22 = vsel %vm3576_vm0, %v2777_v14, -inf  ;;  %v6425_v39 = vsel %vm3576_vm0, %v2784_v42, -inf  ;;  %7691 = vst [vmem:[#allocation28_spill] sm:$0xff] %v6428_v26  ;;  %v7693_v0 = vcombine.high %v6368_v43, %v6368_v43 }
 0x25c   : > { %7689 = vst [vmem:[#allocation9_spill] sm:$0xff] %v6422_v22  ;;  %7690 = vst [vmem:[#allocation72_spill] sm:$0xff] %v6425_v39  ;;  %v3225_v3 = vmax.f32 %v3223_v62, %v3224_v16  ;;  %v3232_v30 = vmax.f32 %v3230_v63, %v3231_v40  ;;  %v6434_v35 = vpop.permute.xlu1 %917  ;;  %v3238_v44 = vrot.slane %v3237_v37, 1  ;;  %v2056_v63 = vcombine.high %v6386_v50, %v6386_v50 }
 0x25d   : > { %v6437_v54 = vsel %vm3576_vm0, %v2791_v31, -inf  ;;  %v2055_v55 = vrot.slane %v7693_v0, %v7684_v36  ;;  %v6445_v34 = vpop.permute.xlu0 %1176  ;;  %v2736_v19 = vsel %vm2679_vm15, %v6386_v50, -inf  ;;  %v2320_v31 = vrot.slane %v6375_v56, %v7684_v36 }
 0x25e   : > { %7692 = vst [vmem:[#allocation84_spill] sm:$0xff] %v6437_v54  ;;  %v6450_v57 = vsel %vm3576_vm0, %v3225_v3, -inf  ;;  %v6453_v62 = vsel %vm3576_vm0, %v3232_v30, -inf  ;;  %v3239_v49 = vmax.f32 %v3237_v37, %v3238_v44  ;;  %v2743_v16 = vsel %vm2679_vm15, %v2056_v63, -inf }
 0x25f   : > { %7694 = vst [vmem:[#allocation14_spill] sm:$0xff] %v6450_v57  ;;  %7695 = vst [vmem:[#allocation44_spill] sm:$0xff] %v6453_v62  ;;  %v2057_v42 = vcombine.high %v2055_v55, %v2055_v55  ;;  %v2750_v40 = vsel %vm2679_vm15, %v2055_v55, -inf  ;;  %v2737_v30 = vrot.slane %v2736_v19, 4  ;;  %v2744_v44 = vrot.slane %v2743_v16, 4 }
 0x260   : > { %v6467_v3 = vpop.permute.xlu1 %1208  ;;  %v6470_v37 = vsel %vm3576_vm0, %v3239_v49, -inf  ;;  %v2751_v0 = vrot.slane %v2750_v40, 4  ;;  %v7697_v55 = vcombine.high %v6375_v56, %v6375_v56  ;;  %v2328_v14 = vcombine.high %v2320_v31, %v2320_v31 }
 0x261   : > { %7696 = vst [vmem:[#allocation53_spill] sm:$0xff] %v6470_v37  ;;  %v2757_v50 = vsel %vm2679_vm15, %v2057_v42, -inf  ;;  %v6479_v33 = vpop.permute.xlu0 %1270  ;;  %v2738_v18 = vmax.f32 %v2736_v19, %v2737_v30  ;;  %v2745_v51 = vmax.f32 %v2743_v16, %v2744_v44  ;;  %v3184_v62 = vsel %vm2679_vm15, %v2320_v31, -inf }
 0x262   : > { %v2327_v63 = vrot.slane %v7697_v55, %v7684_v36  ;;  %v2752_v49 = vmax.f32 %v2750_v40, %v2751_v0  ;;  %v2758_v15 = vrot.slane %v2757_v50, 4  ;;  %v3191_v46 = vsel %vm2679_vm15, %v2328_v14, -inf }
 0x263   : > { %v2739_v37 = vrot.slane %v2738_v18, 2  ;;  %v2746_v12 = vrot.slane %v2745_v51, 2  ;;  %v3185_v57 = vrot.slane %v3184_v62, 4  ;;  %v3192_v19 = vrot.slane %v3191_v46, 4 }
 0x264   : > { %v2329_v1 = vcombine.high %v2327_v63, %v2327_v63  ;;  %v3198_v43 = vsel %vm2679_vm15, %v2327_v63, -inf  ;;  %v6484_v42 = vpop.permute.xlu1 %1302  ;;  %v2753_v56 = vrot.slane %v2752_v49, 2  ;;  %v2759_v55 = vmax.f32 %v2757_v50, %v2758_v15 }
 0x265   : > { %v3199_v16 = vrot.slane %v3198_v43, 4  ;;  %v2740_v30 = vmax.f32 %v2738_v18, %v2739_v37  ;;  %v2747_v44 = vmax.f32 %v2745_v51, %v2746_v12  ;;  %v3186_v14 = vmax.f32 %v3184_v62, %v3185_v57  ;;  %v6487_v5 = vpop.permute.xlu0 %887 }
 0x266   : > { %v3205_v40 = vsel %vm2679_vm15, %v2329_v1, -inf  ;;  %v2754_v31 = vmax.f32 %v2752_v49, %v2753_v56  ;;  %v2760_v0 = vrot.slane %v2759_v55, 2  ;;  %v3193_v63 = vmax.f32 %v3191_v46, %v3192_v19 }
 0x267   : > { %v3200_v45 = vmax.f32 %v3198_v43, %v3199_v16  ;;  %v3206_v54 = vrot.slane %v3205_v40, 4  ;;  %v2741_v15 = vrot.slane %v2740_v30, 1  ;;  %v2748_v50 = vrot.slane %v2747_v44, 1 }
 0x268   : > { %v6489_v39 = vpop.permute.xlu1 %919  ;;  %v2755_v7 = vrot.slane %v2754_v31, 1  ;;  %v2761_v26 = vmax.f32 %v2759_v55, %v2760_v0  ;;  %v3187_v2 = vrot.slane %v3186_v14, 2  ;;  %v3194_v22 = vrot.slane %v3193_v63, 2 }
 0x269   : > { %v3201_v1 = vrot.slane %v3200_v45, 2  ;;  %v3207_v18 = vmax.f32 %v3205_v40, %v3206_v54  ;;  %v2742_v12 = vmax.f32 %v2740_v30, %v2741_v15  ;;  %v2749_v51 = vmax.f32 %v2747_v44, %v2748_v50 }
 0x26a   : > { %v2756_v37 = vmax.f32 %v2754_v31, %v2755_v7  ;;  %v2762_v49 = vrot.slane %v2761_v26, 1  ;;  %v3188_v57 = vmax.f32 %v3186_v14, %v3187_v2  ;;  %v3195_v46 = vmax.f32 %v3193_v63, %v3194_v22  ;;  %v6499_v2 = vpop.permute.xlu0 %986 }
 0x26b   : > { %v3202_v62 = vmax.f32 %v3200_v45, %v3201_v1  ;;  %v3208_v43 = vrot.slane %v3207_v18, 2  ;;  %v3578_v16 = vsel %vm3576_vm0, %v2742_v12, -inf  ;;  %v3581_v20 = vsel %vm3576_vm0, %v2749_v51, -inf }
 0x26c   : > { %v6491_v56 = vpop.permute.xlu1 %1018  ;;  %v2763_v19 = vmax.f32 %v2761_v26, %v2762_v49  ;;  %v3584_v55 = vsel %vm3576_vm0, %v2756_v37, -inf  ;;  %v3579_v0 = vmax.f32 %v6324_v13, %v3578_v16  ;;  %v3582_v54 = vmax.f32 %v6327_v11, %v3581_v20 }
 0x26d   : > { %v3585_v7 = vmax.f32 %v6330_v29, %v3584_v55  ;;  %v3189_v40 = vrot.slane %v3188_v57, 1  ;;  %v3196_v22 = vrot.slane %v3195_v46, 1  ;;  %v3203_v30 = vrot.slane %v3202_v62, 1 }
 0x26e   : > { %v3587_v45 = vsel %vm3576_vm0, %v2763_v19, -inf  ;;  %v3209_v26 = vmax.f32 %v3207_v18, %v3208_v43  ;;  %v3834_v31 = vsel %vm3833_vm1, %v3582_v54, %v3579_v0  ;;  %v1439_v13 = vsel %vm1408_vm7, %v6305_v27, %v6392_v47  ;;  %v1273_v49 = vpop.permute.xlu0 %1272  ;;  %v7699_v19 = vld [vmem:[#allocation52_spill] sm:$0xff] }
 0x26f   : > { %v3588_v44 = vmax.f32 %v6333_v21, %v3587_v45  ;;  %v3190_v14 = vmax.f32 %v3188_v57, %v3189_v40  ;;  %v3836_v20 = vsel %vm3835_vm2, %v3585_v7, %v3834_v31  ;;  %v3197_v11 = vmax.f32 %v3195_v46, %v3196_v22  ;;  %v7701_v40 = vld [vmem:[#allocation19_spill] sm:$0xff] }
 0x270   : > { %v3204_v29 = vmax.f32 %v3202_v62, %v3203_v30  ;;  %v3210_v63 = vrot.slane %v3209_v26, 1  ;;  %v1305_v15 = vpop.permute.xlu1 %1304  ;;  %v3682_v50 = vsel %vm3576_vm0, %v6337_v60, -inf  ;;  %v1488_v21 = vsel %vm1474_vm10, %v6351_v28, %v6285_v24  ;;  %v7703_v30 = vld [vmem:[#allocation5_spill] sm:$0xff] }
 0x271   : > { %v3838_v1 = vsel %vm3837_vm3, %v3588_v44, %v3836_v20  ;;  %v3674_v18 = vsel %vm3576_vm0, %v3190_v14, -inf  ;;  %v3677_v47 = vsel %vm3576_vm0, %v3197_v11, -inf  ;;  %v1504_v37 = vsel %vm1474_vm10, %v6357_v52, %v6293_v61  ;;  %v7704_v14 = vld [vmem:[#allocation49_spill] sm:$0xff] }
 0x272   : > { %v3211_v12 = vmax.f32 %v3209_v26, %v3210_v63  ;;  %v3675_v27 = vmax.f32 %v6340_v8, %v3674_v18  ;;  %v3680_v51 = vsel %vm3576_vm0, %v3204_v29, -inf  ;;  %v1520_v60 = vsel %vm1507_vm11, %v6361_v4, %v6321_v10  ;;  %v7698_v4 = vld [vmem:[#allocation60_spill] sm:$0xff]  ;;  %v989_v22 = vpop.permute.xlu0 %988 }
 0x273   : > { %v3678_v24 = vmax.f32 %v6343_v59, %v3677_v47  ;;  %v3681_v28 = vmax.f32 %v6347_v6, %v3680_v51  ;;  %v1536_v8 = vsel %vm1507_vm11, %v6366_v23, %v6335_v38  ;;  %v1521_v46 = vsel %vm1507_vm11, %v1488_v21, %v6396_v17 }
 0x274   : > { %v3683_v57 = vsel %vm3576_vm0, %v3211_v12, -inf  ;;  %v1440_v61 = vsel %vm1408_vm7, %v6372_v25, %v6412_v53  ;;  %v1553_v6 = vsel %vm1540_vm12, %v1520_v60, %v7698_v4  ;;  %v1569_v62 = vsel %vm1540_vm12, %v1536_v8, %v6408_v32  ;;  %v1021_v16 = vpop.permute.xlu1 %1020 }
 0x275   : > { %v4253_v52 = vpop.f32.mrb[4].mxu0  ;;  %v3684_v10 = vmax.f32 %v3682_v50, %v3683_v57  ;;  %v3868_v59 = vsel %vm3833_vm1, %v3678_v24, %v3675_v27  ;;  %v1537_v17 = vsel %vm1507_vm11, %v1504_v37, %v7699_v19  ;;  %v1586_v25 = vsel %vm1573_vm13, %v1553_v6, %v6479_v33 }
 0x276   : > { %v4277_v38 = vpop.f32.mrb[4].mxu1  ;;  %v1804_v23 = vpop.f32.mrb[5].mxu0  ;;  %v3869_v43 = vsel %vm3835_vm2, %v3681_v28, %v3868_v59  ;;  %v1602_v53 = vsel %vm1573_vm13, %v1569_v62, %v6484_v42  ;;  %v1554_v32 = vsel %vm1540_vm12, %v1521_v46, %v6445_v34  ;;  %v1570_v54 = vsel %vm1540_vm12, %v1537_v17, %v6467_v3  ;;  %4263 = vmatprep.mubr.msk.f32.mxu0 %vm1617_vm14, %v1586_v25  ;;  %v7700_v42 = vld [vmem:[#allocation71_spill] sm:$0xff]  ;;  %v7702_v34 = vld [vmem:[#allocation94_spill] sm:$0xff] }
 0x277   : > { %v1884_v55 = vpop.f32.mrb[5].mxu1  ;;  %v6548_v0 = vsel %vm3837_vm3, %v3684_v10, %v3869_v43  ;;  %4287 = vmatprep.mubr.msk.f32.mxu1 %vm1617_vm14, %v1602_v53  ;;  %v1587_v33 = vsel %vm1573_vm13, %v1554_v32, %v1273_v49  ;;  %v1603_v7 = vsel %vm1573_vm13, %v1570_v54, %v1305_v15  ;;  %v1358_v45 = vsel %vm1342_vm6, %v7701_v40, %v7700_v42  ;;  %v1083_v27 = vpop.permute.xlu0 %1082 }
 0x278   : > { %4264 = vmatmul.mubr.msk.f32.gmra.mrb[12].mxu0 %vm1617_vm14, %v1587_v33  ;;  %4288 = vmatmul.mubr.msk.f32.gmra.mrb[12].mxu1 %vm1617_vm14, %v1603_v7  ;;  %v1391_v3 = vsel %vm1375_vm8, %v1358_v45, %v7702_v34  ;;  %v1810_v26 = vadd.f32 %v4253_v52, %v7703_v30  ;;  %v1890_v44 = vadd.f32 %v4277_v38, %v7703_v30  ;;  %v6584_v18 = vpop.permute.xlu1 %4375  ;;  %vm3843_vm6 = vcmask 1046534  }
 0x279   : > { %v1424_v31 = vsel %vm1408_vm7, %v1391_v3, %v6410_v9  ;;  %v1456_v20 = vsel %vm1441_vm9, %v7704_v14, %v6417_v48  ;;  %v1472_v11 = vsel %vm1441_vm9, %v1439_v13, %v6434_v35  ;;  %v7705_v29 = vmax.f32 %v6251_v58, %v6415_v41 }
 0x27a   : > { %v1457_v15 = vsel %vm1441_vm9, %v1424_v31, %v6487_v5  ;;  %v1473_v50 = vsel %vm1441_vm9, %v1440_v61, %v6489_v39  ;;  %v1948_v9 = vmax.f32 %v1810_v26, 0.0  ;;  %v1964_v21 = vmax.f32 %v1890_v44, 0.0 }
 0x27b   : > { %v6578_v63 = vsel %vm3839_vm4, %v7705_v29, %v3838_v1  ;;  %v1489_v48 = vsel %vm1474_vm10, %v1456_v20, %v6499_v2  ;;  %v6590_v35 = vsel %vm1474_vm10, %v1472_v11, %v6491_v56  ;;  %v1490_v58 = vsel %vm1474_vm10, %v1457_v15, %v989_v22 }
 0x27c   : > { %v1805_v41 = vadd.f32 %v7703_v30, %v1804_v23  ;;  %v2092_v13 = vcombine.high %v1948_v9, %v1948_v9  ;;  %v2099_v5 = vrot.slane %v1948_v9, %v7684_v36  ;;  %v2364_v1 = vcombine.high %v1964_v21, %v1964_v21  ;;  %v1179_v9 = vpop.permute.xlu1 %1178 }
 0x27d   : > { %v2371_v39 = vrot.slane %v1964_v21, %v7684_v36  ;;  %v1506_v12 = vsel %vm1474_vm10, %v1473_v50, %v1021_v16  ;;  %v1885_v47 = vadd.f32 %v7703_v30, %v1884_v55  ;;  %v4378_v2 = vunpack.i.h.bf16 %v6584_v18  ;;  %v1085_v55 = vpop.permute.xlu0 %1084 }
 0x27e   : > { %v4377_v56 = vunpack.i.l.bf16 %v6584_v18  ;;  %v2106_v51 = vrot.slane %v2092_v13, %v7684_v36  ;;  %v2107_v37 = vcombine.high %v2099_v5, %v2099_v5  ;;  %v2820_v60 = vsel %vm2679_vm15, %v2099_v5, -inf }
 0x27f   : > { %v2378_v24 = vrot.slane %v2364_v1, %v7684_v36  ;;  %v2821_v28 = vrot.slane %v2820_v60, 4  ;;  %v2379_v49 = vcombine.high %v2371_v39, %v2371_v39  ;;  %v3268_v8 = vsel %vm2679_vm15, %v2371_v39, -inf }
 0x280   : > { %v1947_v57 = vmax.f32 %v1805_v41, 0.0  ;;  %v2108_v46 = vcombine.high %v2106_v51, %v2106_v51  ;;  %v2827_v61 = vsel %vm2679_vm15, %v2107_v37, -inf  ;;  %v2834_v52 = vsel %vm2679_vm15, %v2106_v51, -inf }
 0x281   : > { %v2380_v10 = vcombine.high %v2378_v24, %v2378_v24  ;;  %v2822_v59 = vmax.f32 %v2820_v60, %v2821_v28  ;;  %v2828_v4 = vrot.slane %v2827_v61, 4  ;;  %v2835_v6 = vrot.slane %v2834_v52, 4  ;;  %v6618_v5 = vpop.permute.xlu0 %4380 }
 0x282   : > { %v3269_v62 = vrot.slane %v3268_v8, 4  ;;  %v2841_v38 = vsel %vm2679_vm15, %v2108_v46, -inf  ;;  %v3275_v23 = vsel %vm2679_vm15, %v2379_v49, -inf  ;;  %v3282_v43 = vsel %vm2679_vm15, %v2378_v24, -inf }
 0x283   : > { %v3289_v19 = vsel %vm2679_vm15, %v2380_v10, -inf  ;;  %v2823_v17 = vrot.slane %v2822_v59, 2  ;;  %v2829_v25 = vmax.f32 %v2827_v61, %v2828_v4  ;;  %v2836_v53 = vmax.f32 %v2834_v52, %v2835_v6 }
 0x284   : > { %v2842_v16 = vrot.slane %v2841_v38, 4  ;;  %v3270_v32 = vmax.f32 %v3268_v8, %v3269_v62  ;;  %v3276_v54 = vrot.slane %v3275_v23, 4  ;;  %v3283_v33 = vrot.slane %v3282_v43, 4 }
 0x285   : > { %v3290_v7 = vrot.slane %v3289_v19, 4  ;;  %v2824_v42 = vmax.f32 %v2822_v59, %v2823_v17  ;;  %v2830_v40 = vrot.slane %v2829_v25, 2  ;;  %v2837_v45 = vrot.slane %v2836_v53, 2 }
 0x286   : > { %v2843_v22 = vmax.f32 %v2841_v38, %v2842_v16  ;;  %v3271_v34 = vrot.slane %v3270_v32, 2  ;;  %v3277_v3 = vmax.f32 %v3275_v23, %v3276_v54  ;;  %v3284_v30 = vmax.f32 %v3282_v43, %v3283_v33 }
 0x287   : > { %v3291_v26 = vmax.f32 %v3289_v19, %v3290_v7  ;;  %v2831_v44 = vmax.f32 %v2829_v25, %v2830_v40  ;;  %v2838_v31 = vmax.f32 %v2836_v53, %v2837_v45  ;;  %v2075_v20 = vcombine.high %v1947_v57, %v1947_v57 }
 0x288   : > { %v2844_v14 = vrot.slane %v2843_v22, 2  ;;  %v1522_v11 = vsel %vm1507_vm11, %v1489_v48, %v1083_v27  ;;  %v3278_v29 = vrot.slane %v3277_v3, 2  ;;  %v3285_v15 = vrot.slane %v3284_v30, 2 }
 0x289   : > { %v3292_v50 = vrot.slane %v3291_v26, 2  ;;  %v2082_v21 = vrot.slane %v1947_v57, %v7684_v36  ;;  %v1963_v18 = vmax.f32 %v1885_v47, 0.0  ;;  %v6613_v41 = vsel %vm1507_vm11, %v1506_v12, %v4378_v2 }
 0x28a   : > { %v6616_v13 = vsel %vm1507_vm11, %v1490_v58, %v1085_v55  ;;  %v2825_v1 = vrot.slane %v2824_v42, 1  ;;  %v2832_v39 = vrot.slane %v2831_v44, 1  ;;  %v2839_v51 = vrot.slane %v2838_v31, 1 }
 0x28b   : > { %v3272_v37 = vmax.f32 %v3270_v32, %v3271_v34  ;;  %v2845_v48 = vmax.f32 %v2843_v22, %v2844_v14  ;;  %v2089_v27 = vrot.slane %v2075_v20, %v7684_v36  ;;  %v6623_v60 = vsel %vm1507_vm11, %v6590_v35, %v4377_v56 }
 0x28c   : > { %v6626_v47 = vsel %vm1540_vm12, %v1522_v11, %v1179_v9  ;;  %v3279_v12 = vmax.f32 %v3277_v3, %v3278_v29  ;;  %v3286_v2 = vmax.f32 %v3284_v30, %v3285_v15  ;;  %v3293_v58 = vmax.f32 %v3291_v26, %v3292_v50 }
 0x28d   : > { %v4383_v24 = vunpack.i.h.bf16 %v6618_v5  ;;  %v2090_v28 = vcombine.high %v2082_v21, %v2082_v21  ;;  %v2347_v49 = vcombine.high %v1963_v18, %v1963_v18  ;;  %v2354_v8 = vrot.slane %v1963_v18, %v7684_v36  ;;  %v1275_v18 = vpop.permute.xlu0 %1274 }
 0x28e   : > { %v4382_v57 = vunpack.i.l.bf16 %v6618_v5  ;;  %v2826_v46 = vmax.f32 %v2824_v42, %v2825_v1  ;;  %v2833_v61 = vmax.f32 %v2831_v44, %v2832_v39  ;;  %v2840_v52 = vmax.f32 %v2838_v31, %v2839_v51 }
 0x28f   : > { %v3273_v10 = vrot.slane %v3272_v37, 1  ;;  %v2846_v35 = vrot.slane %v2845_v48, 1  ;;  %v2091_v56 = vcombine.high %v2089_v27, %v2089_v27  ;;  %v2792_v59 = vsel %vm2679_vm15, %v2082_v21, -inf  ;;  %v1181_v21 = vpop.permute.xlu1 %1180 }
 0x290   : > { %v2799_v4 = vsel %vm2679_vm15, %v2090_v28, -inf  ;;  %v3280_v6 = vrot.slane %v3279_v12, 1  ;;  %v3287_v62 = vrot.slane %v3286_v2, 1  ;;  %v3294_v38 = vrot.slane %v3293_v58, 1 }
 0x291   : > { %v2793_v23 = vrot.slane %v2792_v59, 4  ;;  %v2800_v43 = vrot.slane %v2799_v4, 4  ;;  %v2806_v19 = vsel %vm2679_vm15, %v2089_v27, -inf  ;;  %v2813_v17 = vsel %vm2679_vm15, %v2091_v56, -inf }
 0x292   : > { %v2361_v25 = vrot.slane %v2347_v49, %v7684_v36  ;;  %v2807_v16 = vrot.slane %v2806_v19, 4  ;;  %v2814_v55 = vrot.slane %v2813_v17, 4  ;;  %v2362_v32 = vcombine.high %v2354_v8, %v2354_v8 }
 0x293   : > { %v2794_v53 = vmax.f32 %v2792_v59, %v2793_v23  ;;  %v2801_v54 = vmax.f32 %v2799_v4, %v2800_v43  ;;  %v3240_v7 = vsel %vm2679_vm15, %v2354_v8, -inf  ;;  %v2847_v1 = vmax.f32 %v2845_v48, %v2846_v35 }
 0x294   : > { %v2363_v33 = vcombine.high %v2361_v25, %v2361_v25  ;;  %v3254_v42 = vsel %vm2679_vm15, %v2361_v25, -inf  ;;  %v2808_v45 = vmax.f32 %v2806_v19, %v2807_v16  ;;  %v2815_v22 = vmax.f32 %v2813_v17, %v2814_v55 }
 0x295   : > { %v2795_v40 = vrot.slane %v2794_v53, 2  ;;  %v3241_v34 = vrot.slane %v3240_v7, 4  ;;  %v2802_v3 = vrot.slane %v2801_v54, 2  ;;  %v3247_v30 = vsel %vm2679_vm15, %v2362_v32, -inf }
 0x296   : > { %v3255_v26 = vrot.slane %v3254_v42, 4  ;;  %v3261_v44 = vsel %vm2679_vm15, %v2363_v33, -inf  ;;  %v2809_v14 = vrot.slane %v2808_v45, 2  ;;  %v2816_v20 = vrot.slane %v2815_v22, 2 }
 0x297   : > { %v2796_v31 = vmax.f32 %v2794_v53, %v2795_v40  ;;  %v3242_v11 = vmax.f32 %v3240_v7, %v3241_v34  ;;  %v2803_v29 = vmax.f32 %v2801_v54, %v2802_v3  ;;  %v3248_v15 = vrot.slane %v3247_v30, 4 }
 0x298   : > { %v3256_v50 = vmax.f32 %v3254_v42, %v3255_v26  ;;  %v3262_v9 = vrot.slane %v3261_v44, 4  ;;  %v3274_v39 = vmax.f32 %v3272_v37, %v3273_v10  ;;  %v2810_v51 = vmax.f32 %v2808_v45, %v2809_v14  ;;  %v7706_v26 = vld [vmem:[#allocation15_spill] sm:$0xff] }
 0x299   : > { %v3243_v27 = vrot.slane %v3242_v11, 2  ;;  %v3281_v28 = vmax.f32 %v3279_v12, %v3280_v6  ;;  %v2797_v49 = vrot.slane %v2796_v31, 1  ;;  %v2817_v8 = vmax.f32 %v2815_v22, %v2816_v20  ;;  %v7709_v20 = vld [vmem:[#allocation16_spill] sm:$0xff] }
 0x29a   : > { %v3249_v56 = vmax.f32 %v3247_v30, %v3248_v15  ;;  %vm3845_vm7 = vcmask 1047559   ;;  %v3288_v59 = vmax.f32 %v3286_v2, %v3287_v62  ;;  %v3295_v4 = vmax.f32 %v3293_v58, %v3294_v38  ;;  %v1277_v38 = vpop.permute.xlu0 %1276 }
 0x29b   : > { %v2804_v23 = vrot.slane %v2803_v29, 1  ;;  %v3257_v43 = vrot.slane %v3256_v50, 2  ;;  %v6641_v19 = vsel %vm3576_vm0, %v2826_v46, -inf  ;;  %v6644_v17 = vsel %vm3576_vm0, %v2833_v61, -inf  ;;  %v4386_v61 = vpop.permute.xlu1 %4385 }
 0x29c   : > { %v2811_v48 = vrot.slane %v2810_v51, 1  ;;  %v3263_v37 = vmax.f32 %v3261_v44, %v3262_v9  ;;  %v6647_v10 = vsel %vm3576_vm0, %v2840_v52, -inf  ;;  %v6650_v12 = vsel %vm3576_vm0, %v2847_v1, -inf  ;;  %v7707_v44 = vld [vmem:[#allocation9_spill] sm:$0xff] }
 0x29d   : > { %v6653_v35 = vsel %vm3576_vm0, %v3274_v39, -inf  ;;  %v3244_v2 = vmax.f32 %v3242_v11, %v3243_v27  ;;  %v6656_v58 = vsel %vm3576_vm0, %v3281_v28, -inf  ;;  %v2798_v46 = vmax.f32 %v2796_v31, %v2797_v49  ;;  %v7710_v11 = vld [vmem:[#allocation28_spill] sm:$0xff]  ;;  %v7715_v39 = vld [vmem:[#allocation43_spill] sm:$0xff]  ;;  %v7718_v49 = vld [vmem:[#allocation22_spill] sm:$0xff] }
 0x29e   : > { %v2818_v6 = vrot.slane %v2817_v8, 1  ;;  %v3250_v62 = vrot.slane %v3249_v56, 2  ;;  %v6659_v25 = vsel %vm3576_vm0, %v3288_v59, -inf  ;;  %v6662_v52 = vsel %vm3576_vm0, %v3295_v4, -inf }
 0x29f   : > { %v2805_v53 = vmax.f32 %v2803_v29, %v2804_v23  ;;  %v3258_v16 = vmax.f32 %v3256_v50, %v3257_v43  ;;  %v2812_v55 = vmax.f32 %v2810_v51, %v2811_v48  ;;  %v3264_v32 = vrot.slane %v3263_v37, 2  ;;  %v7713_v50 = vld [vmem:[#allocation72_spill] sm:$0xff] }
 0x2a0   : > { %v1556_v54 = vsel %vm1540_vm12, %v6616_v13, %v1181_v21  ;;  %v1588_v33 = vsel %vm1573_vm13, %v6626_v47, %v1275_v18  ;;  %v3245_v7 = vrot.slane %v3244_v2, 1  ;;  %v4388_v42 = vunpack.i.h.bf16 %v4386_v61  ;;  %v7716_v51 = vld [vmem:[#allocation84_spill] sm:$0xff] }
 0x2a1   : > { %4266 = vmatprep.mubr.msk.f32.mxu0 %vm1617_vm14, %v1588_v33  ;;  %v4387_v40 = vunpack.i.l.bf16 %v4386_v61  ;;  %v1589_v45 = vsel %vm1573_vm13, %v1556_v54, %v1277_v38  ;;  %v2819_v22 = vmax.f32 %v2817_v8, %v2818_v6  ;;  %v6671_v34 = vsel %vm3576_vm0, %v2798_v46, -inf  ;;  %v7719_v8 = vld [vmem:[#allocation14_spill] sm:$0xff]  ;;  %v7721_v48 = vld [vmem:[#allocation48_spill] sm:$0xff]  ;;  %v7725_v54 = vld [vmem:[#allocation53_spill] sm:$0xff] }
 0x2a2   : > { %v3251_v3 = vmax.f32 %v3249_v56, %v3250_v62  ;;  %4267 = vmatmul.mubr.msk.f32.gmra.mrb[14].mxu0 %vm1617_vm14, %v1589_v45  ;;  %v1571_v13 = vsel %vm1540_vm12, %v6623_v60, %v4382_v57  ;;  %v1572_v30 = vsel %vm1540_vm12, %v6613_v41, %v4383_v24  ;;  %v7708_v31 = vmax.f32 %v7706_v26, %v7707_v44  ;;  %v7712_v24 = vld [vmem:[#allocation17_spill] sm:$0xff] }
 0x2a3   : > { %v1604_v47 = vsel %vm1573_vm13, %v1571_v13, %v4387_v40  ;;  %v7711_v29 = vmax.f32 %v7709_v20, %v7710_v11  ;;  %v3259_v60 = vrot.slane %v3258_v16, 1  ;;  %v6693_v57 = vmax.f32 %v3263_v37, %v3264_v32  ;;  %v7722_v37 = vld [vmem:[#allocation44_spill] sm:$0xff]  ;;  %v7724_v32 = vld [vmem:[#allocation23_spill] sm:$0xff] }
 0x2a4   : > { %v3842_v14 = vsel %vm3841_vm5, %v7708_v31, %v6578_v63  ;;  %4290 = vmatprep.mubr.msk.f32.mxu1 %vm1617_vm14, %v1604_v47  ;;  %v1605_v5 = vsel %vm1573_vm13, %v1572_v30, %v4388_v42  ;;  %v7714_v9 = vmax.f32 %v7712_v24, %v7713_v50  ;;  %v3246_v63 = vmax.f32 %v3244_v2, %v3245_v7 }
 0x2a5   : > { %v3871_v15 = vsel %vm3839_vm4, %v7711_v29, %v6548_v0  ;;  %4291 = vmatmul.mubr.msk.f32.gmra.mrb[14].mxu1 %vm1617_vm14, %v1605_v5  ;;  %v6705_v0 = vld [vmem:[%s7360_s2] ss:$0 sm:$0xff]  ;;  %v7717_v27 = vmax.f32 %v7715_v39, %v7716_v51  ;;  %v7720_v56 = vmax.f32 %v7718_v49, %v7719_v8  ;;  %v6719_v4 = vsel %vm3576_vm0, %v2805_v53, -inf }
 0x2a6   : > { %v4256_v41 = vpop.f32.mrb[6].mxu0  ;;  %v3844_v21 = vsel %vm3843_vm6, %v7714_v9, %v3842_v14  ;;  %v3252_v23 = vrot.slane %v3251_v3, 1  ;;  %v7723_v2 = vmax.f32 %v7721_v48, %v7722_v37  ;;  %v6727_v6 = vsel %vm3576_vm0, %v2812_v55, -inf }
 0x2a7   : > { %v1820_v18 = vadd.f32 %v6705_v0, %v4256_v41  ;;  %v1814_v1 = vpop.f32.mrb[7].mxu0  ;;  %v6712_v28 = vsel %vm3845_vm7, %v7717_v27, %v3844_v21  ;;  %v3872_v59 = vsel %vm3841_vm5, %v7720_v56, %v3871_v15  ;;  %v6730_v62 = vsel %vm3576_vm0, %v2819_v22, -inf }
 0x2a8   : > { %v1815_v43 = vadd.f32 %v6705_v0, %v1814_v1  ;;  %v3873_v46 = vsel %vm3843_vm6, %v7723_v2, %v3872_v59  ;;  %v7726_v53 = vmax.f32 %v7724_v32, %v7725_v54  ;;  %v6738_v7 = vmax.f32 %v3258_v16, %v3259_v60 }
 0x2a9   : > { %v1950_v61 = vmax.f32 %v1820_v18, 0.0  ;;  %v4280_v38 = vpop.f32.mrb[6].mxu1  ;;  %v3266_v42 = vrot.slane %v6693_v57, 1  ;;  %v6743_v13 = vsel %vm3576_vm0, %v3246_v63, -inf  ;;  %v6747_v26 = vmax.f32 %v3251_v3, %v3252_v23 }
 0x2aa   : > { %v6736_v33 = vsel %vm3845_vm7, %v7726_v53, %v3873_v46  ;;  %v1949_v40 = vmax.f32 %v1815_v43, 0.0  ;;  %v1900_v45 = vadd.f32 %v6705_v0, %v4280_v38  ;;  %v1894_v55 = vpop.f32.mrb[7].mxu1  ;;  %vm4069_vm8 = vcmask 130048  }
 0x2ab   : > { %v2126_v22 = vcombine.high %v1950_v61, %v1950_v61  ;;  %v2133_v47 = vrot.slane %v1950_v61, %v7684_v36  ;;  %v1895_v30 = vadd.f32 %v6705_v0, %v1894_v55  ;;  %vm4072_vm9 = vcmask 261120  }
 0x2ac   : > { %v2109_v44 = vcombine.high %v1949_v40, %v1949_v40  ;;  %v2116_v16 = vrot.slane %v1949_v40, %v7684_v36  ;;  %v6750_v31 = vmax.f32 %v1900_v45, 0.0  ;;  %vm4074_vm10 = vcmask 326656  }
 0x2ad   : > { %v2140_v14 = vrot.slane %v2126_v22, %v7684_v36  ;;  %v2141_v20 = vcombine.high %v2133_v47, %v2133_v47  ;;  %v2876_v11 = vsel %vm2679_vm15, %v2133_v47, -inf  ;;  %v6754_v29 = vmax.f32 %v1895_v30, 0.0 }
 0x2ae   : > { %v2877_v15 = vrot.slane %v2876_v11, 4  ;;  %v2123_v60 = vrot.slane %v2109_v44, %v7684_v36  ;;  %v2124_v5 = vcombine.high %v2116_v16, %v2116_v16  ;;  %v2848_v41 = vsel %vm2679_vm15, %v2116_v16, -inf }
 0x2af   : > { %v2142_v3 = vcombine.high %v2140_v14, %v2140_v14  ;;  %v2883_v24 = vsel %vm2679_vm15, %v2141_v20, -inf  ;;  %v2890_v50 = vsel %vm2679_vm15, %v2140_v14, -inf  ;;  %v2849_v9 = vrot.slane %v2848_v41, 4 }
 0x2b0   : > { %v2878_v21 = vmax.f32 %v2876_v11, %v2877_v15  ;;  %v2884_v63 = vrot.slane %v2883_v24, 4  ;;  %v2891_v18 = vrot.slane %v2890_v50, 4  ;;  %v2125_v1 = vcombine.high %v2123_v60, %v2123_v60 }
 0x2b1   : > { %v2897_v39 = vsel %vm2679_vm15, %v2142_v3, -inf  ;;  %v2850_v51 = vmax.f32 %v2848_v41, %v2849_v9  ;;  %v2855_v27 = vsel %vm2679_vm15, %v2124_v5, -inf  ;;  %v2862_v49 = vsel %vm2679_vm15, %v2123_v60, -inf }
 0x2b2   : > { %v2879_v8 = vrot.slane %v2878_v21, 2  ;;  %v2885_v56 = vmax.f32 %v2883_v24, %v2884_v63  ;;  %v2892_v59 = vmax.f32 %v2890_v50, %v2891_v18  ;;  %v2898_v23 = vrot.slane %v2897_v39, 4 }
 0x2b3   : > { %v2851_v43 = vrot.slane %v2850_v51, 2  ;;  %v2856_v48 = vrot.slane %v2855_v27, 4  ;;  %v2863_v37 = vrot.slane %v2862_v49, 4  ;;  %v2869_v2 = vsel %vm2679_vm15, %v2125_v1, -inf }
 0x2b4   : > { %v2880_v46 = vmax.f32 %v2878_v21, %v2879_v8  ;;  %v2886_v61 = vrot.slane %v2885_v56, 2  ;;  %v2893_v38 = vrot.slane %v2892_v59, 2  ;;  %v2899_v32 = vmax.f32 %v2897_v39, %v2898_v23 }
 0x2b5   : > { %v2852_v54 = vmax.f32 %v2850_v51, %v2851_v43  ;;  %v2857_v53 = vmax.f32 %v2855_v27, %v2856_v48  ;;  %v2864_v40 = vmax.f32 %v2862_v49, %v2863_v37  ;;  %v2870_v45 = vrot.slane %v2869_v2, 4 }
 0x2b6   : > { %v2881_v55 = vrot.slane %v2880_v46, 1  ;;  %v2887_v22 = vmax.f32 %v2885_v56, %v2886_v61  ;;  %v2894_v47 = vmax.f32 %v2892_v59, %v2893_v38  ;;  %v2900_v30 = vrot.slane %v2899_v32, 2 }
 0x2b7   : > { %v2853_v44 = vrot.slane %v2852_v54, 1  ;;  %v2858_v16 = vrot.slane %v2857_v53, 2  ;;  %v2865_v14 = vrot.slane %v2864_v40, 2  ;;  %v2871_v20 = vmax.f32 %v2869_v2, %v2870_v45 }
 0x2b8   : > { %v2882_v11 = vmax.f32 %v2880_v46, %v2881_v55  ;;  %v2888_v15 = vrot.slane %v2887_v22, 1  ;;  %v2895_v60 = vrot.slane %v2894_v47, 1  ;;  %v2901_v5 = vmax.f32 %v2899_v32, %v2900_v30 }
 0x2b9   : > { %v2854_v41 = vmax.f32 %v2852_v54, %v2853_v44  ;;  %v2859_v3 = vmax.f32 %v2857_v53, %v2858_v16  ;;  %v2866_v24 = vmax.f32 %v2864_v40, %v2865_v14  ;;  %v2872_v50 = vrot.slane %v2871_v20, 2 }
 0x2ba   : > { %v2889_v9 = vmax.f32 %v2887_v22, %v2888_v15  ;;  %v2896_v21 = vmax.f32 %v2894_v47, %v2895_v60  ;;  %v2902_v63 = vrot.slane %v2901_v5, 1  ;;  %v6765_v18 = vsel %vm3576_vm0, %v2882_v11, -inf }
 0x2bb   : > { %v3615_v1 = vmax.f32 %v6641_v19, %v6765_v18  ;;  %v2860_v39 = vrot.slane %v2859_v3, 1  ;;  %v2867_v51 = vrot.slane %v2866_v24, 1  ;;  %v2873_v27 = vmax.f32 %v2871_v20, %v2872_v50 }
 0x2bc   : > { %v2903_v49 = vmax.f32 %v2901_v5, %v2902_v63  ;;  %v6770_v8 = vsel %vm3576_vm0, %v2889_v9, -inf  ;;  %v6773_v56 = vsel %vm3576_vm0, %v2896_v21, -inf  ;;  %v3602_v59 = vsel %vm3576_vm0, %v2854_v41, -inf }
 0x2bd   : > { %v3618_v23 = vmax.f32 %v6644_v17, %v6770_v8  ;;  %v3621_v43 = vmax.f32 %v6647_v10, %v6773_v56  ;;  %v2861_v48 = vmax.f32 %v2859_v3, %v2860_v39  ;;  %v2868_v37 = vmax.f32 %v2866_v24, %v2867_v51 }
 0x2be   : > { %v6781_v2 = vsel %vm3576_vm0, %v2903_v49, -inf  ;;  %v2874_v46 = vrot.slane %v2873_v27, 1  ;;  %v3603_v61 = vmax.f32 %v6671_v34, %v3602_v59  ;;  %v2398_v38 = vcombine.high %v6750_v31, %v6750_v31 }
 0x2bf   : > { %v3624_v32 = vmax.f32 %v6650_v12, %v6781_v2  ;;  %v3605_v54 = vsel %vm3576_vm0, %v2861_v48, -inf  ;;  %v3608_v53 = vsel %vm3576_vm0, %v2868_v37, -inf  ;;  %v2405_v40 = vrot.slane %v6750_v31, %v7684_v36 }
 0x2c0   : > { %v2875_v45 = vmax.f32 %v2873_v27, %v2874_v46  ;;  %v3606_v55 = vmax.f32 %v6719_v4, %v3605_v54  ;;  %v3609_v22 = vmax.f32 %v6727_v6, %v3608_v53  ;;  %v2412_v34 = vrot.slane %v2398_v38, %v7684_v36 }
 0x2c1   : > { %v2413_v47 = vcombine.high %v2405_v40, %v2405_v40  ;;  %v3324_v30 = vsel %vm2679_vm15, %v2405_v40, -inf  ;;  %v2381_v44 = vcombine.high %v6754_v29, %v6754_v29  ;;  %v2388_v16 = vrot.slane %v6754_v29, %v7684_v36 }
 0x2c2   : > { %v3611_v14 = vsel %vm3576_vm0, %v2875_v45, -inf  ;;  %v3847_v31 = vsel %vm3833_vm1, %v3606_v55, %v3603_v61  ;;  %v2414_v20 = vcombine.high %v2412_v34, %v2412_v34  ;;  %v3325_v11 = vrot.slane %v3324_v30, 4 }
 0x2c3   : > { %v3612_v4 = vmax.f32 %v6730_v62, %v3611_v14  ;;  %v3848_v6 = vsel %vm3835_vm2, %v3609_v22, %v3847_v31  ;;  %v3331_v15 = vsel %vm2679_vm15, %v2413_v47, -inf  ;;  %v3338_v60 = vsel %vm2679_vm15, %v2412_v34, -inf }
 0x2c4   : > { %v3326_v5 = vmax.f32 %v3324_v30, %v3325_v11  ;;  %v3332_v41 = vrot.slane %v3331_v15, 4  ;;  %v3339_v3 = vrot.slane %v3338_v60, 4  ;;  %v3345_v24 = vsel %vm2679_vm15, %v2414_v20, -inf }
 0x2c5   : > { %v3849_v29 = vsel %vm3837_vm3, %v3612_v4, %v3848_v6  ;;  %v3346_v50 = vrot.slane %v3345_v24, 4  ;;  %v2395_v9 = vrot.slane %v2381_v44, %v7684_v36  ;;  %v2396_v21 = vcombine.high %v2388_v16, %v2388_v16 }
 0x2c6   : > { %v3327_v63 = vrot.slane %v3326_v5, 2  ;;  %v3333_v39 = vmax.f32 %v3331_v15, %v3332_v41  ;;  %v3340_v62 = vmax.f32 %v3338_v60, %v3339_v3  ;;  %v3296_v51 = vsel %vm2679_vm15, %v2388_v16, -inf }
 0x2c7   : > { %v3347_v27 = vmax.f32 %v3345_v24, %v3346_v50  ;;  %v2397_v49 = vcombine.high %v2395_v9, %v2395_v9  ;;  %v3297_v59 = vrot.slane %v3296_v51, 4  ;;  %v3303_v48 = vsel %vm2679_vm15, %v2396_v21, -inf }
 0x2c8   : > { %v3328_v37 = vmax.f32 %v3326_v5, %v3327_v63  ;;  %v3334_v46 = vrot.slane %v3333_v39, 2  ;;  %v3341_v61 = vrot.slane %v3340_v62, 2  ;;  %v3304_v38 = vrot.slane %v3303_v48, 4 }
 0x2c9   : > { %v3348_v54 = vrot.slane %v3347_v27, 2  ;;  %v3298_v53 = vmax.f32 %v3296_v51, %v3297_v59  ;;  %v3310_v40 = vsel %vm2679_vm15, %v2395_v9, -inf  ;;  %v3317_v45 = vsel %vm2679_vm15, %v2397_v49, -inf }
 0x2ca   : > { %v3329_v55 = vrot.slane %v3328_v37, 1  ;;  %v3335_v22 = vmax.f32 %v3333_v39, %v3334_v46  ;;  %v3342_v34 = vmax.f32 %v3340_v62, %v3341_v61  ;;  %v3305_v47 = vmax.f32 %v3303_v48, %v3304_v38 }
 0x2cb   : > { %v3349_v30 = vmax.f32 %v3347_v27, %v3348_v54  ;;  %v3299_v44 = vrot.slane %v3298_v53, 2  ;;  %v3311_v16 = vrot.slane %v3310_v40, 4  ;;  %v3318_v14 = vrot.slane %v3317_v45, 4 }
 0x2cc   : > { %v3330_v31 = vmax.f32 %v3328_v37, %v3329_v55  ;;  %v3336_v20 = vrot.slane %v3335_v22, 1  ;;  %v3343_v11 = vrot.slane %v3342_v34, 1  ;;  %v3306_v4 = vrot.slane %v3305_v47, 2 }
 0x2cd   : > { %v3350_v6 = vrot.slane %v3349_v30, 1  ;;  %v3300_v15 = vmax.f32 %v3298_v53, %v3299_v44  ;;  %v3312_v60 = vmax.f32 %v3310_v40, %v3311_v16  ;;  %v3319_v5 = vmax.f32 %v3317_v45, %v3318_v14 }
 0x2ce   : > { %v3337_v41 = vmax.f32 %v3335_v22, %v3336_v20  ;;  %v3344_v3 = vmax.f32 %v3342_v34, %v3343_v11  ;;  %v3710_v24 = vsel %vm3576_vm0, %v3330_v31, -inf  ;;  %v3307_v50 = vmax.f32 %v3305_v47, %v3306_v4 }
 0x2cf   : > { %v3351_v9 = vmax.f32 %v3349_v30, %v3350_v6  ;;  %v3711_v21 = vmax.f32 %v6653_v35, %v3710_v24  ;;  %v3301_v63 = vrot.slane %v3300_v15, 1  ;;  %v3313_v39 = vrot.slane %v3312_v60, 2 }
 0x2d0   : > { %v3713_v62 = vsel %vm3576_vm0, %v3337_v41, -inf  ;;  %v3716_v51 = vsel %vm3576_vm0, %v3344_v3, -inf  ;;  %v3308_v27 = vrot.slane %v3307_v50, 1  ;;  %v3320_v49 = vrot.slane %v3319_v5, 2 }
 0x2d1   : > { %v3714_v59 = vmax.f32 %v6656_v58, %v3713_v62  ;;  %v3717_v48 = vmax.f32 %v6659_v25, %v3716_v51  ;;  %v3719_v37 = vsel %vm3576_vm0, %v3351_v9, -inf  ;;  %v3302_v46 = vmax.f32 %v3300_v15, %v3301_v63 }
 0x2d2   : > { %v3720_v61 = vmax.f32 %v6662_v52, %v3719_v37  ;;  %v3309_v38 = vmax.f32 %v3307_v50, %v3308_v27  ;;  %v3314_v54 = vmax.f32 %v3312_v60, %v3313_v39  ;;  %v3321_v35 = vmax.f32 %v3319_v5, %v3320_v49 }
 0x2d3   : > { %v3267_v53 = vmax.f32 %v6693_v57, %v3266_v42  ;;  %v3700_v40 = vsel %vm3576_vm0, %v6747_v26, -inf  ;;  %v3698_v45 = vsel %vm3576_vm0, %v3302_v46, -inf  ;;  %v3850_v58 = vsel %vm3839_vm4, %v3615_v1, %v3849_v29 }
 0x2d4   : > { %v3315_v25 = vrot.slane %v3314_v54, 1  ;;  %v3322_v55 = vrot.slane %v3321_v35, 1  ;;  %v3699_v52 = vmax.f32 %v6743_v13, %v3698_v45  ;;  %v3701_v22 = vsel %vm3576_vm0, %v3309_v38, -inf }
 0x2d5   : > { %v3702_v34 = vmax.f32 %v3700_v40, %v3701_v22  ;;  %v3851_v57 = vsel %vm3841_vm5, %v3618_v23, %v3850_v58  ;;  %v3703_v17 = vsel %vm3576_vm0, %v6738_v7, -inf  ;;  %v3706_v1 = vsel %vm3576_vm0, %v3267_v53, -inf }
 0x2d6   : > { %v3316_v42 = vmax.f32 %v3314_v54, %v3315_v25  ;;  %v3323_v26 = vmax.f32 %v3321_v35, %v3322_v55  ;;  %v3852_v19 = vsel %vm3843_vm6, %v3621_v43, %v3851_v57  ;;  %vm4076_vm11 = vcmask 392192  }
 0x2d7   : > { %v3875_v18 = vsel %vm3833_vm1, %v3702_v34, %v3699_v52  ;;  %v6846_v13 = vsel %vm3845_vm7, %v3624_v32, %v3852_v19  ;;  %vm4078_vm12 = vcmask 457728   ;;  %vm4080_vm14 = vcmask 523264  }
 0x2d8   : > { %v3704_v8 = vsel %vm3576_vm0, %v3316_v42, -inf  ;;  %v3707_v23 = vsel %vm3576_vm0, %v3323_v26, -inf }
 0x2d9   : > { %v3705_v10 = vmax.f32 %v3703_v17, %v3704_v8  ;;  %v3708_v56 = vmax.f32 %v3706_v1, %v3707_v23 }
 0x2da   : > { %v4259_v43 = vpop.f32.mrb[8].mxu0 }
 0x2db   : > { %v3876_v29 = vsel %vm3835_vm2, %v3705_v10, %v3875_v18  ;;  %v1824_v47 = vpop.f32.mrb[9].mxu0  ;;  %v1830_v14 = vadd.f32 %v6705_v0, %v4259_v43 }
 0x2dc   : > { %v3877_v12 = vsel %vm3837_vm3, %v3708_v56, %v3876_v29  ;;  %v1825_v31 = vadd.f32 %v6705_v0, %v1824_v47 }
 0x2dd   : > { %v4283_v2 = vpop.f32.mrb[8].mxu1  ;;  %v3878_v32 = vsel %vm3839_vm4, %v3711_v21, %v3877_v12  ;;  %v1952_v20 = vmax.f32 %v1830_v14, 0.0 }
 0x2de   : > { %v1904_v30 = vpop.f32.mrb[9].mxu1  ;;  %v3879_v7 = vsel %vm3841_vm5, %v3714_v59, %v3878_v32  ;;  %v1910_v11 = vadd.f32 %v6705_v0, %v4283_v2  ;;  %v1951_v4 = vmax.f32 %v1825_v31, 0.0 }
 0x2df   : > { %v3880_v44 = vsel %vm3843_vm6, %v3717_v48, %v3879_v7  ;;  %v2160_v6 = vcombine.high %v1952_v20, %v1952_v20  ;;  %v2167_v15 = vrot.slane %v1952_v20, %v7684_v36  ;;  %v1905_v21 = vadd.f32 %v6705_v0, %v1904_v30 }
 0x2e0   : > { %v6859_v16 = vsel %vm3845_vm7, %v3720_v61, %v3880_v44  ;;  %v1968_v60 = vmax.f32 %v1910_v11, 0.0  ;;  %v2143_v5 = vcombine.high %v1951_v4, %v1951_v4  ;;  %v2150_v24 = vrot.slane %v1951_v4, %v7684_v36 }
 0x2e1   : > { %v2174_v41 = vrot.slane %v2160_v6, %v7684_v36  ;;  %v2932_v3 = vsel %vm2679_vm15, %v2167_v15, -inf  ;;  %v2175_v63 = vcombine.high %v2167_v15, %v2167_v15  ;;  %v1967_v37 = vmax.f32 %v1905_v21, 0.0 }
 0x2e2   : > { %v2432_v50 = vcombine.high %v1968_v60, %v1968_v60  ;;  %v2157_v9 = vrot.slane %v2143_v5, %v7684_v36  ;;  %v2933_v39 = vrot.slane %v2932_v3, 4  ;;  %v2439_v62 = vrot.slane %v1968_v60, %v7684_v36 }
 0x2e3   : > { %v2176_v51 = vcombine.high %v2174_v41, %v2174_v41  ;;  %v2158_v27 = vcombine.high %v2150_v24, %v2150_v24  ;;  %v2904_v49 = vsel %vm2679_vm15, %v2150_v24, -inf  ;;  %v2939_v46 = vsel %vm2679_vm15, %v2175_v63, -inf }
 0x2e4   : > { %v2446_v59 = vrot.slane %v2432_v50, %v7684_v36  ;;  %v2159_v48 = vcombine.high %v2157_v9, %v2157_v9  ;;  %v2946_v61 = vsel %vm2679_vm15, %v2174_v41, -inf  ;;  %v2905_v38 = vrot.slane %v2904_v49, 4 }
 0x2e5   : > { %v2447_v54 = vcombine.high %v2439_v62, %v2439_v62  ;;  %v2934_v35 = vmax.f32 %v2932_v3, %v2933_v39  ;;  %v2953_v53 = vsel %vm2679_vm15, %v2176_v51, -inf  ;;  %v2911_v40 = vsel %vm2679_vm15, %v2158_v27, -inf }
 0x2e6   : > { %v2448_v45 = vcombine.high %v2446_v59, %v2446_v59  ;;  %v2918_v58 = vsel %vm2679_vm15, %v2157_v9, -inf  ;;  %v2925_v25 = vsel %vm2679_vm15, %v2159_v48, -inf  ;;  %v2415_v55 = vcombine.high %v1967_v37, %v1967_v37 }
 0x2e7   : > { %v2422_v52 = vrot.slane %v1967_v37, %v7684_v36  ;;  %v2940_v22 = vrot.slane %v2939_v46, 4  ;;  %v2947_v34 = vrot.slane %v2946_v61, 4  ;;  %v3380_v57 = vsel %vm2679_vm15, %v2439_v62, -inf }
 0x2e8   : > { %v3394_v42 = vsel %vm2679_vm15, %v2446_v59, -inf  ;;  %v2954_v26 = vrot.slane %v2953_v53, 4  ;;  %v2912_v19 = vrot.slane %v2911_v40, 4  ;;  %v3387_v18 = vsel %vm2679_vm15, %v2447_v54, -inf }
 0x2e9   : > { %v2906_v17 = vmax.f32 %v2904_v49, %v2905_v38  ;;  %v2919_v1 = vrot.slane %v2918_v58, 4  ;;  %v2926_v8 = vrot.slane %v2925_v25, 4  ;;  %v3401_v23 = vsel %vm2679_vm15, %v2448_v45, -inf }
 0x2ea   : > { %v3381_v10 = vrot.slane %v3380_v57, 4  ;;  %v3395_v56 = vrot.slane %v3394_v42, 4  ;;  %v2429_v43 = vrot.slane %v2415_v55, %v7684_v36  ;;  %v2430_v29 = vcombine.high %v2422_v52, %v2422_v52 }
 0x2eb   : > { %v2935_v47 = vrot.slane %v2934_v35, 2  ;;  %v2941_v12 = vmax.f32 %v2939_v46, %v2940_v22  ;;  %v2948_v2 = vmax.f32 %v2946_v61, %v2947_v34  ;;  %v3388_v32 = vrot.slane %v3387_v18, 4 }
 0x2ec   : > { %v2955_v30 = vmax.f32 %v2953_v53, %v2954_v26  ;;  %v2913_v7 = vmax.f32 %v2911_v40, %v2912_v19  ;;  %v3402_v44 = vrot.slane %v3401_v23, 4  ;;  %v3352_v14 = vsel %vm2679_vm15, %v2422_v52, -inf }
 0x2ed   : > { %v2907_v31 = vrot.slane %v2906_v17, 2  ;;  %v2920_v20 = vmax.f32 %v2918_v58, %v2919_v1  ;;  %v2927_v11 = vmax.f32 %v2925_v25, %v2926_v8  ;;  %v3382_v4 = vmax.f32 %v3380_v57, %v3381_v10 }
 0x2ee   : > { %v3396_v6 = vmax.f32 %v3394_v42, %v3395_v56  ;;  %v2431_v15 = vcombine.high %v2429_v43, %v2429_v43  ;;  %v3359_v60 = vsel %vm2679_vm15, %v2430_v29, -inf  ;;  %v2942_v5 = vrot.slane %v2941_v12, 2 }
 0x2ef   : > { %v2949_v41 = vrot.slane %v2948_v2, 2  ;;  %v3389_v3 = vmax.f32 %v3387_v18, %v3388_v32  ;;  %v3353_v24 = vrot.slane %v3352_v14, 4  ;;  %v2936_v50 = vmax.f32 %v2934_v35, %v2935_v47 }
 0x2f0   : > { %v2956_v9 = vrot.slane %v2955_v30, 2  ;;  %v2914_v21 = vrot.slane %v2913_v7, 2  ;;  %v3403_v63 = vmax.f32 %v3401_v23, %v3402_v44  ;;  %v2921_v39 = vrot.slane %v2920_v20, 2 }
 0x2f1   : > { %v2928_v62 = vrot.slane %v2927_v11, 2  ;;  %v3360_v51 = vrot.slane %v3359_v60, 4  ;;  %v3366_v27 = vsel %vm2679_vm15, %v2429_v43, -inf  ;;  %v2908_v49 = vmax.f32 %v2906_v17, %v2907_v31 }
 0x2f2   : > { %v3383_v59 = vrot.slane %v3382_v4, 2  ;;  %v3397_v48 = vrot.slane %v3396_v6, 2  ;;  %v3373_v37 = vsel %vm2679_vm15, %v2431_v15, -inf  ;;  %v2943_v46 = vmax.f32 %v2941_v12, %v2942_v5 }
 0x2f3   : > { %v2950_v61 = vmax.f32 %v2948_v2, %v2949_v41  ;;  %v3390_v38 = vrot.slane %v3389_v3, 2  ;;  %v3354_v54 = vmax.f32 %v3352_v14, %v3353_v24  ;;  %v2957_v53 = vmax.f32 %v2955_v30, %v2956_v9 }
 0x2f4   : > { %v2915_v40 = vmax.f32 %v2913_v7, %v2914_v21  ;;  %v3404_v35 = vrot.slane %v3403_v63, 2  ;;  %v3367_v45 = vrot.slane %v3366_v27, 4  ;;  %v2922_v58 = vmax.f32 %v2920_v20, %v2921_v39 }
 0x2f5   : > { %v2929_v25 = vmax.f32 %v2927_v11, %v2928_v62  ;;  %v3361_v55 = vmax.f32 %v3359_v60, %v3360_v51  ;;  %v3374_v52 = vrot.slane %v3373_v37, 4  ;;  %v2937_v22 = vrot.slane %v2936_v50, 1 }
 0x2f6   : > { %v2909_v34 = vrot.slane %v2908_v49, 1  ;;  %v3384_v57 = vmax.f32 %v3382_v4, %v3383_v59  ;;  %v3398_v42 = vmax.f32 %v3396_v6, %v3397_v48  ;;  %v2944_v26 = vrot.slane %v2943_v46, 1 }
 0x2f7   : > { %v2951_v19 = vrot.slane %v2950_v61, 1  ;;  %v3391_v18 = vmax.f32 %v3389_v3, %v3390_v38  ;;  %v3355_v17 = vrot.slane %v3354_v54, 2  ;;  %v2958_v1 = vrot.slane %v2957_v53, 1 }
 0x2f8   : > { %v2916_v8 = vrot.slane %v2915_v40, 1  ;;  %v3405_v23 = vmax.f32 %v3403_v63, %v3404_v35  ;;  %v3368_v10 = vmax.f32 %v3366_v27, %v3367_v45  ;;  %v2923_v56 = vrot.slane %v2922_v58, 1 }
 0x2f9   : > { %v2930_v43 = vrot.slane %v2929_v25, 1  ;;  %v3362_v29 = vrot.slane %v3361_v55, 2  ;;  %v3375_v47 = vmax.f32 %v3373_v37, %v3374_v52  ;;  %v2938_v12 = vmax.f32 %v2936_v50, %v2937_v22 }
 0x2fa   : > { %v2910_v2 = vmax.f32 %v2908_v49, %v2909_v34  ;;  %v3385_v32 = vrot.slane %v3384_v57, 1  ;;  %v3399_v30 = vrot.slane %v3398_v42, 1  ;;  %v2945_v7 = vmax.f32 %v2943_v46, %v2944_v26 }
 0x2fb   : > { %v2952_v44 = vmax.f32 %v2950_v61, %v2951_v19  ;;  %v3392_v14 = vrot.slane %v3391_v18, 1  ;;  %v3356_v31 = vmax.f32 %v3354_v54, %v3355_v17  ;;  %v2959_v20 = vmax.f32 %v2957_v53, %v2958_v1 }
 0x2fc   : > { %v2917_v11 = vmax.f32 %v2915_v40, %v2916_v8  ;;  %v3406_v4 = vrot.slane %v3405_v23, 1  ;;  %v3369_v6 = vrot.slane %v3368_v10, 2  ;;  %v2924_v15 = vmax.f32 %v2922_v58, %v2923_v56 }
 0x2fd   : > { %v2931_v60 = vmax.f32 %v2929_v25, %v2930_v43  ;;  %v3363_v5 = vmax.f32 %v3361_v55, %v3362_v29  ;;  %v3376_v41 = vrot.slane %v3375_v47, 2  ;;  %v6890_v3 = vsel %vm3576_vm0, %v2938_v12, -inf }
 0x2fe   : > { %v6893_v24 = vsel %vm3576_vm0, %v2910_v2, -inf  ;;  %v3386_v50 = vmax.f32 %v3384_v57, %v3385_v32  ;;  %v3400_v9 = vmax.f32 %v3398_v42, %v3399_v30  ;;  %v6896_v21 = vsel %vm3576_vm0, %v2945_v7, -inf }
 0x2ff   : > { %v6899_v63 = vsel %vm3576_vm0, %v2952_v44, -inf  ;;  %v3393_v39 = vmax.f32 %v3391_v18, %v3392_v14  ;;  %v3357_v62 = vrot.slane %v3356_v31, 1  ;;  %v6902_v51 = vsel %vm3576_vm0, %v2959_v20, -inf }
 0x300   : > { %v6905_v27 = vsel %vm3576_vm0, %v2917_v11, -inf  ;;  %v3407_v49 = vmax.f32 %v3405_v23, %v3406_v4  ;;  %v6907_v59 = vmax.f32 %v3368_v10, %v3369_v6  ;;  %v6910_v48 = vsel %vm3576_vm0, %v2924_v15, -inf }
 0x301   : > { %v6913_v37 = vsel %vm3576_vm0, %v2931_v60, -inf  ;;  %v3364_v46 = vrot.slane %v3363_v5, 1  ;;  %v6915_v61 = vmax.f32 %v3375_v47, %v3376_v41  ;;  %v6918_v53 = vsel %vm3576_vm0, %v3386_v50, -inf }
 0x302   : > { %v6921_v40 = vsel %vm3576_vm0, %v3400_v9, -inf  ;;  %v6926_v55 = vsel %vm3576_vm0, %v3393_v39, -inf  ;;  %v6928_v52 = vmax.f32 %v3356_v31, %v3357_v62  ;;  %v6933_v57 = vsel %vm3576_vm0, %v3407_v49, -inf }
 0x303   : > { %v3371_v42 = vrot.slane %v6907_v59, 1  ;;  %v6936_v18 = vmax.f32 %v3363_v5, %v3364_v46  ;;  %v3378_v17 = vrot.slane %v6915_v61, 1 }
 0x317   : > { %v4262_v38 = vpop.f32.mrb[10].mxu0  ;;  %v4286_v54 = vpop.f32.mrb[10].mxu1 }
 0x318   : > { %v1840_v35 = vadd.f32 %v6705_v0, %v4262_v38  ;;  %v1834_v45 = vpop.f32.mrb[11].mxu0  ;;  %v1920_v58 = vadd.f32 %v6705_v0, %v4286_v54  ;;  %v1914_v25 = vpop.f32.mrb[11].mxu1 }
 0x319   : > { %v1835_v22 = vadd.f32 %v6705_v0, %v1834_v45  ;;  %v1915_v34 = vadd.f32 %v6705_v0, %v1914_v25 }
 0x31a   : > { %v1954_v26 = vmax.f32 %v1840_v35, 0.0  ;;  %v1970_v19 = vmax.f32 %v1920_v58, 0.0 }
 0x31b   : > { %v1953_v1 = vmax.f32 %v1835_v22, 0.0  ;;  %v6939_v8 = vmax.f32 %v1915_v34, 0.0 }
 0x31c   : > { %v2194_v23 = vcombine.high %v1954_v26, %v1954_v26  ;;  %v2201_v10 = vrot.slane %v1954_v26, %v7684_v36  ;;  %v2466_v56 = vcombine.high %v1970_v19, %v1970_v19  ;;  %v6943_v0 = vrot.slane %v1970_v19, %v7684_v36 }
 0x31d   : > { %v2177_v43 = vcombine.high %v1953_v1, %v1953_v1  ;;  %v2184_v29 = vrot.slane %v1953_v1, %v7684_v36  ;;  %v2449_v47 = vcombine.high %v6939_v8, %v6939_v8  ;;  %v6950_v12 = vrot.slane %v6939_v8, %v7684_v36 }
 0x31e   : > { %v2208_v2 = vrot.slane %v2194_v23, %v7684_v36  ;;  %v2209_v32 = vcombine.high %v2201_v10, %v2201_v10  ;;  %v2988_v30 = vsel %vm2679_vm15, %v2201_v10, -inf  ;;  %v6955_v7 = vrot.slane %v2466_v56, %v7684_v36 }
 0x31f   : > { %v2989_v44 = vrot.slane %v2988_v30, 4  ;;  %v2191_v14 = vrot.slane %v2177_v43, %v7684_v36  ;;  %v2192_v31 = vcombine.high %v2184_v29, %v2184_v29  ;;  %v2960_v20 = vsel %vm2679_vm15, %v2184_v29, -inf }
 0x320   : > { %v2210_v11 = vcombine.high %v2208_v2, %v2208_v2  ;;  %v2995_v4 = vsel %vm2679_vm15, %v2209_v32, -inf  ;;  %v3002_v6 = vsel %vm2679_vm15, %v2208_v2, -inf  ;;  %v2961_v15 = vrot.slane %v2960_v20, 4 }
 0x321   : > { %v2990_v60 = vmax.f32 %v2988_v30, %v2989_v44  ;;  %v2996_v5 = vrot.slane %v2995_v4, 4  ;;  %v3003_v41 = vrot.slane %v3002_v6, 4  ;;  %v2193_v50 = vcombine.high %v2191_v14, %v2191_v14 }
 0x322   : > { %v3009_v9 = vsel %vm2679_vm15, %v2210_v11, -inf  ;;  %v2962_v39 = vmax.f32 %v2960_v20, %v2961_v15  ;;  %v2967_v62 = vsel %vm2679_vm15, %v2192_v31, -inf  ;;  %v2974_v49 = vsel %vm2679_vm15, %v2191_v14, -inf }
 0x323   : > { %v2991_v46 = vrot.slane %v2990_v60, 2  ;;  %v2997_v38 = vmax.f32 %v2995_v4, %v2996_v5  ;;  %v3004_v54 = vmax.f32 %v3002_v6, %v3003_v41  ;;  %v3010_v35 = vrot.slane %v3009_v9, 4 }
 0x324   : > { %v2963_v45 = vrot.slane %v2962_v39, 2  ;;  %v2968_v58 = vrot.slane %v2967_v62, 4  ;;  %v2975_v25 = vrot.slane %v2974_v49, 4  ;;  %v2981_v22 = vsel %vm2679_vm15, %v2193_v50, -inf }
 0x325   : > { %v2992_v34 = vmax.f32 %v2990_v60, %v2991_v46  ;;  %v2998_v26 = vrot.slane %v2997_v38, 2  ;;  %v3005_v19 = vrot.slane %v3004_v54, 2  ;;  %v3011_v1 = vmax.f32 %v3009_v9, %v3010_v35 }
 0x326   : > { %v2964_v23 = vmax.f32 %v2962_v39, %v2963_v45  ;;  %v2969_v10 = vmax.f32 %v2967_v62, %v2968_v58  ;;  %v2976_v56 = vmax.f32 %v2974_v49, %v2975_v25  ;;  %v2982_v43 = vrot.slane %v2981_v22, 4 }
 0x327   : > { %v2993_v29 = vrot.slane %v2992_v34, 1  ;;  %v2999_v2 = vmax.f32 %v2997_v38, %v2998_v26  ;;  %v3006_v32 = vmax.f32 %v3004_v54, %v3005_v19  ;;  %v3012_v30 = vrot.slane %v3011_v1, 2 }
 0x328   : > { %v2965_v44 = vrot.slane %v2964_v23, 1  ;;  %v2970_v14 = vrot.slane %v2969_v10, 2  ;;  %v2977_v31 = vrot.slane %v2976_v56, 2  ;;  %v2983_v20 = vmax.f32 %v2981_v22, %v2982_v43 }
 0x329   : > { %v2994_v11 = vmax.f32 %v2992_v34, %v2993_v29  ;;  %v3000_v4 = vrot.slane %v2999_v2, 1  ;;  %v3007_v6 = vrot.slane %v3006_v32, 1  ;;  %v3013_v15 = vmax.f32 %v3011_v1, %v3012_v30 }
 0x32a   : > { %v2966_v60 = vmax.f32 %v2964_v23, %v2965_v44  ;;  %v2971_v5 = vmax.f32 %v2969_v10, %v2970_v14  ;;  %v2978_v41 = vmax.f32 %v2976_v56, %v2977_v31  ;;  %v2984_v50 = vrot.slane %v2983_v20, 2 }
 0x32b   : > { %v3001_v9 = vmax.f32 %v2999_v2, %v3000_v4  ;;  %v3008_v39 = vmax.f32 %v3006_v32, %v3007_v6  ;;  %v3014_v62 = vrot.slane %v3013_v15, 1  ;;  %v6966_v49 = vsel %vm3576_vm0, %v2994_v11, -inf }
 0x32c   : > { %v3639_v46 = vmax.f32 %v6890_v3, %v6966_v49  ;;  %v2972_v38 = vrot.slane %v2971_v5, 1  ;;  %v2979_v54 = vrot.slane %v2978_v41, 1  ;;  %v2985_v35 = vmax.f32 %v2983_v20, %v2984_v50 }
 0x32d   : > { %v3015_v45 = vmax.f32 %v3013_v15, %v3014_v62  ;;  %v6971_v58 = vsel %vm3576_vm0, %v3001_v9, -inf  ;;  %v6974_v25 = vsel %vm3576_vm0, %v3008_v39, -inf  ;;  %v3626_v22 = vsel %vm3576_vm0, %v2966_v60, -inf }
 0x32e   : > { %v3642_v34 = vmax.f32 %v6896_v21, %v6971_v58  ;;  %v3645_v26 = vmax.f32 %v6899_v63, %v6974_v25  ;;  %v2973_v19 = vmax.f32 %v2971_v5, %v2972_v38  ;;  %v2980_v1 = vmax.f32 %v2978_v41, %v2979_v54 }
 0x32f   : > { %v6982_v23 = vsel %vm3576_vm0, %v3015_v45, -inf  ;;  %v2986_v10 = vrot.slane %v2985_v35, 1  ;;  %v3627_v56 = vmax.f32 %v6893_v24, %v3626_v22  ;;  %v2481_v43 = vcombine.high %v6943_v0, %v6943_v0 }
 0x330   : > { %v3648_v29 = vmax.f32 %v6902_v51, %v6982_v23  ;;  %v3629_v2 = vsel %vm3576_vm0, %v2973_v19, -inf  ;;  %v3632_v32 = vsel %vm3576_vm0, %v2980_v1, -inf  ;;  %v2482_v30 = vcombine.high %v6955_v7, %v6955_v7 }
 0x331   : > { %v2987_v44 = vmax.f32 %v2985_v35, %v2986_v10  ;;  %v3630_v14 = vmax.f32 %v6905_v27, %v3629_v2  ;;  %v3633_v31 = vmax.f32 %v6910_v48, %v3632_v32  ;;  %v3436_v24 = vsel %vm2679_vm15, %v6943_v0, -inf }
 0x332   : > { %v3437_v20 = vrot.slane %v3436_v24, 4  ;;  %v3443_v11 = vsel %vm2679_vm15, %v2481_v43, -inf  ;;  %v3450_v4 = vsel %vm2679_vm15, %v6955_v7, -inf  ;;  %v3457_v6 = vsel %vm2679_vm15, %v2482_v30, -inf }
 0x333   : > { %v3635_v15 = vsel %vm3576_vm0, %v2987_v44, -inf  ;;  %v3854_v60 = vsel %vm3833_vm1, %v3630_v14, %v3627_v56  ;;  %v3444_v5 = vrot.slane %v3443_v11, 4  ;;  %v3451_v41 = vrot.slane %v3450_v4, 4 }
 0x334   : > { %v3636_v27 = vmax.f32 %v6913_v37, %v3635_v15  ;;  %v3855_v48 = vsel %vm3835_vm2, %v3633_v31, %v3854_v60  ;;  %v3438_v50 = vmax.f32 %v3436_v24, %v3437_v20  ;;  %v3458_v0 = vrot.slane %v3457_v6, 4 }
 0x335   : > { %v3445_v9 = vmax.f32 %v3443_v11, %v3444_v5  ;;  %v3452_v39 = vmax.f32 %v3450_v4, %v3451_v41  ;;  %v2463_v7 = vrot.slane %v2449_v47, %v7684_v36  ;;  %v2464_v62 = vcombine.high %v6950_v12, %v6950_v12 }
 0x336   : > { %v3856_v38 = vsel %vm3837_vm3, %v3636_v27, %v3855_v48  ;;  %v3439_v54 = vrot.slane %v3438_v50, 2  ;;  %v3459_v35 = vmax.f32 %v3457_v6, %v3458_v0  ;;  %v3408_v37 = vsel %vm2679_vm15, %v6950_v12, -inf }
 0x337   : > { %v3446_v45 = vrot.slane %v3445_v9, 2  ;;  %v3453_v22 = vrot.slane %v3452_v39, 2  ;;  %v2465_v19 = vcombine.high %v2463_v7, %v2463_v7  ;;  %v3409_v1 = vrot.slane %v3408_v37, 4 }
 0x338   : > { %v3440_v10 = vmax.f32 %v3438_v50, %v3439_v54  ;;  %v3460_v56 = vrot.slane %v3459_v35, 2  ;;  %v3415_v43 = vsel %vm2679_vm15, %v2464_v62, -inf  ;;  %v3422_v8 = vsel %vm2679_vm15, %v2463_v7, -inf }
 0x339   : > { %v3447_v47 = vmax.f32 %v3445_v9, %v3446_v45  ;;  %v3454_v2 = vmax.f32 %v3452_v39, %v3453_v22  ;;  %v3410_v32 = vmax.f32 %v3408_v37, %v3409_v1  ;;  %v3416_v30 = vrot.slane %v3415_v43, 4 }
 0x33a   : > { %v3441_v44 = vrot.slane %v3440_v10, 1  ;;  %v3461_v14 = vmax.f32 %v3459_v35, %v3460_v56  ;;  %v3423_v31 = vrot.slane %v3422_v8, 4  ;;  %v3429_v24 = vsel %vm2679_vm15, %v2465_v19, -inf }
 0x33b   : > { %v3448_v12 = vrot.slane %v3447_v47, 1  ;;  %v3455_v20 = vrot.slane %v3454_v2, 1  ;;  %v3411_v11 = vrot.slane %v3410_v32, 2  ;;  %v3417_v4 = vmax.f32 %v3415_v43, %v3416_v30 }
 0x33c   : > { %v3442_v6 = vmax.f32 %v3440_v10, %v3441_v44  ;;  %v3462_v15 = vrot.slane %v3461_v14, 1  ;;  %v3424_v60 = vmax.f32 %v3422_v8, %v3423_v31  ;;  %v3430_v5 = vrot.slane %v3429_v24, 4 }
 0x33d   : > { %v3449_v41 = vmax.f32 %v3447_v47, %v3448_v12  ;;  %v3456_v27 = vmax.f32 %v3454_v2, %v3455_v20  ;;  %v3412_v48 = vmax.f32 %v3410_v32, %v3411_v11  ;;  %v3418_v50 = vrot.slane %v3417_v4, 2  ;;  %v7070_v11 = vld [vmem:[%s7360_s2] ss:$0 sm:$0xff] }
 0x33e   : > { %v3463_v0 = vmax.f32 %v3461_v14, %v3462_v15  ;;  %v3734_v9 = vsel %vm3576_vm0, %v3442_v6, -inf  ;;  %v3425_v39 = vrot.slane %v3424_v60, 2  ;;  %v3431_v7 = vmax.f32 %v3429_v24, %v3430_v5 }
 0x33f   : > { %v3735_v62 = vmax.f32 %v6918_v53, %v3734_v9  ;;  %v3737_v54 = vsel %vm3576_vm0, %v3449_v41, -inf  ;;  %v3740_v35 = vsel %vm3576_vm0, %v3456_v27, -inf  ;;  %v3413_v37 = vrot.slane %v3412_v48, 1 }
 0x340   : > { %v3738_v45 = vmax.f32 %v6926_v55, %v3737_v54  ;;  %v3741_v22 = vmax.f32 %v6921_v40, %v3740_v35  ;;  %v3743_v19 = vsel %vm3576_vm0, %v3463_v0, -inf  ;;  %v3419_v1 = vmax.f32 %v3417_v4, %v3418_v50 }
 0x341   : > { %v3744_v10 = vmax.f32 %v6933_v57, %v3743_v19  ;;  %v3414_v56 = vmax.f32 %v3412_v48, %v3413_v37  ;;  %v3426_v43 = vmax.f32 %v3424_v60, %v3425_v39  ;;  %v3432_v8 = vrot.slane %v3431_v7, 2 }
 0x342   : > { %v3372_v53 = vmax.f32 %v6907_v59, %v3371_v42  ;;  %v3721_v47 = vsel %vm3576_vm0, %v6928_v52, -inf  ;;  %v3420_v2 = vrot.slane %v3419_v1, 1  ;;  %v3857_v40 = vsel %vm3839_vm4, %v3639_v46, %v3856_v38 }
 0x343   : > { %v3427_v55 = vrot.slane %v3426_v43, 1  ;;  %v3433_v32 = vmax.f32 %v3431_v7, %v3432_v8  ;;  %v3722_v57 = vsel %vm3576_vm0, %v3414_v56, -inf  ;;  %v3858_v30 = vsel %vm3841_vm5, %v3642_v34, %v3857_v40 }
 0x344   : > { %v3421_v44 = vmax.f32 %v3419_v1, %v3420_v2  ;;  %v3723_v59 = vmax.f32 %v3721_v47, %v3722_v57  ;;  %v3859_v52 = vsel %vm3843_vm6, %v3645_v26, %v3858_v30  ;;  %v3379_v3 = vmax.f32 %v6915_v61, %v3378_v17 }
 0x345   : > { %v3428_v42 = vmax.f32 %v3426_v43, %v3427_v55  ;;  %v3434_v49 = vrot.slane %v3433_v32, 1  ;;  %v7050_v21 = vsel %vm3845_vm7, %v3648_v29, %v3859_v52  ;;  %v3724_v46 = vsel %vm3576_vm0, %v6936_v18, -inf }
 0x346   : > { %v3725_v58 = vsel %vm3576_vm0, %v3421_v44, -inf  ;;  %v3904_v63 = vcombine.low %v6712_v28, %v7050_v21  ;;  %v3905_v25 = vcombine.high %v6712_v28, %v7050_v21  ;;  %v3727_v61 = vsel %vm3576_vm0, %v3372_v53, -inf }
 0x347   : > { %v3435_v17 = vmax.f32 %v3433_v32, %v3434_v49  ;;  %v3726_v34 = vmax.f32 %v3724_v46, %v3725_v58  ;;  %v3728_v51 = vsel %vm3576_vm0, %v3428_v42, -inf  ;;  %v3730_v23 = vsel %vm3576_vm0, %v3379_v3, -inf }
 0x348   : > { %v3729_v26 = vmax.f32 %v3727_v61, %v3728_v51 }
 0x349   : > { %v3731_v29 = vsel %vm3576_vm0, %v3435_v17, -inf  ;;  %v3882_v18 = vsel %vm3833_vm1, %v3726_v34, %v3723_v59 }
 0x34a   : > { %v3732_v38 = vmax.f32 %v3730_v23, %v3731_v29  ;;  %v3883_v14 = vsel %vm3835_vm2, %v3729_v26, %v3882_v18 }
 0x34b   : > { %v4265_v24 = vpop.f32.mrb[12].mxu0  ;;  %v4289_v12 = vpop.f32.mrb[12].mxu1 }
 0x34c   : > { %v3884_v31 = vsel %vm3837_vm3, %v3732_v38, %v3883_v14  ;;  %v1850_v4 = vadd.f32 %v7070_v11, %v4265_v24  ;;  %v1844_v6 = vpop.f32.mrb[13].mxu0  ;;  %v1924_v15 = vpop.f32.mrb[13].mxu1  ;;  %v1930_v35 = vadd.f32 %v7070_v11, %v4289_v12 }
 0x34d   : > { %v3885_v20 = vsel %vm3839_vm4, %v3735_v62, %v3884_v31  ;;  %v1845_v5 = vadd.f32 %v7070_v11, %v1844_v6  ;;  %v1925_v17 = vadd.f32 %v7070_v11, %v1924_v15 }
 0x34e   : > { %v3886_v60 = vsel %vm3841_vm5, %v3738_v45, %v3885_v20  ;;  %v1956_v27 = vmax.f32 %v1850_v4, 0.0  ;;  %v1972_v32 = vmax.f32 %v1930_v35, 0.0 }
 0x34f   : > { %v3887_v41 = vsel %vm3843_vm6, %v3741_v22, %v3886_v60  ;;  %v1955_v50 = vmax.f32 %v1845_v5, 0.0  ;;  %v1971_v12 = vmax.f32 %v1925_v17, 0.0 }
 0x350   : > { %v7077_v48 = vsel %vm3845_vm7, %v3744_v10, %v3887_v41  ;;  %v2228_v39 = vcombine.high %v1956_v27, %v1956_v27  ;;  %v2235_v7 = vrot.slane %v1956_v27, %v7684_v36  ;;  %v2500_v26 = vcombine.high %v1972_v32, %v1972_v32 }
 0x351   : > { %v3936_v0 = vcombine.low %v6736_v33, %v7077_v48  ;;  %v2211_v62 = vcombine.high %v1955_v50, %v1955_v50  ;;  %v2218_v54 = vrot.slane %v1955_v50, %v7684_v36  ;;  %v2507_v24 = vrot.slane %v1972_v32, %v7684_v36 }
 0x352   : > { %v2242_v37 = vrot.slane %v2228_v39, %v7684_v36  ;;  %v2243_v45 = vcombine.high %v2235_v7, %v2235_v7  ;;  %v3044_v22 = vsel %vm2679_vm15, %v2235_v7, -inf  ;;  %v2514_v60 = vrot.slane %v2500_v26, %v7684_v36 }
 0x353   : > { %v3045_v19 = vrot.slane %v3044_v22, 4  ;;  %v2225_v1 = vrot.slane %v2211_v62, %v7684_v36  ;;  %v2226_v10 = vcombine.high %v2218_v54, %v2218_v54  ;;  %v3016_v56 = vsel %vm2679_vm15, %v2218_v54, -inf }
 0x354   : > { %v2244_v43 = vcombine.high %v2242_v37, %v2242_v37  ;;  %v3051_v8 = vsel %vm2679_vm15, %v2243_v45, -inf  ;;  %v3058_v53 = vsel %vm2679_vm15, %v2242_v37, -inf  ;;  %v3017_v47 = vrot.slane %v3016_v56, 4 }
 0x355   : > { %v3046_v2 = vmax.f32 %v3044_v22, %v3045_v19  ;;  %v3052_v40 = vrot.slane %v3051_v8, 4  ;;  %v3059_v55 = vrot.slane %v3058_v53, 4  ;;  %v3023_v44 = vsel %vm2679_vm15, %v2226_v10, -inf }
 0x356   : > { %v3065_v57 = vsel %vm2679_vm15, %v2244_v43, -inf  ;;  %v3018_v30 = vmax.f32 %v3016_v56, %v3017_v47  ;;  %v3030_v59 = vsel %vm2679_vm15, %v2225_v1, -inf  ;;  %v2227_v42 = vcombine.high %v2225_v1, %v2225_v1 }
 0x357   : > { %v3047_v52 = vrot.slane %v3046_v2, 2  ;;  %v3053_v3 = vmax.f32 %v3051_v8, %v3052_v40  ;;  %v3066_v49 = vrot.slane %v3065_v57, 4  ;;  %v3024_v46 = vrot.slane %v3023_v44, 4 }
 0x358   : > { %v3031_v58 = vrot.slane %v3030_v59, 4  ;;  %v3060_v61 = vmax.f32 %v3058_v53, %v3059_v55  ;;  %v3019_v51 = vrot.slane %v3018_v30, 2  ;;  %v3037_v29 = vsel %vm2679_vm15, %v2227_v42, -inf }
 0x359   : > { %v3048_v34 = vmax.f32 %v3046_v2, %v3047_v52  ;;  %v3054_v23 = vrot.slane %v3053_v3, 2  ;;  %v3067_v18 = vmax.f32 %v3065_v57, %v3066_v49  ;;  %v3025_v38 = vmax.f32 %v3023_v44, %v3024_v46 }
 0x35a   : > { %v3032_v14 = vmax.f32 %v3030_v59, %v3031_v58  ;;  %v3061_v31 = vrot.slane %v3060_v61, 2  ;;  %v7098_v4 = vmax.f32 %v3018_v30, %v3019_v51  ;;  %v3038_v6 = vrot.slane %v3037_v29, 4 }
 0x35b   : > { %v3049_v20 = vrot.slane %v3048_v34, 1  ;;  %v7101_v15 = vmax.f32 %v3053_v3, %v3054_v23  ;;  %v3068_v5 = vrot.slane %v3067_v18, 2  ;;  %v3026_v41 = vrot.slane %v3025_v38, 2 }
 0x35c   : > { %v3033_v27 = vrot.slane %v3032_v14, 2  ;;  %v7103_v50 = vmax.f32 %v3060_v61, %v3061_v31  ;;  %v2515_v39 = vcombine.high %v2507_v24, %v2507_v24  ;;  %v2483_v7 = vcombine.high %v1971_v12, %v1971_v12 }
 0x35d   : > { %v2490_v62 = vrot.slane %v1971_v12, %v7684_v36  ;;  %v7106_v54 = vmax.f32 %v3048_v34, %v3049_v20  ;;  %v3021_v35 = vrot.slane %v7098_v4, 1  ;;  %v3039_v37 = vmax.f32 %v3037_v29, %v3038_v6 }
 0x35e   : > { %v2516_v45 = vcombine.high %v2514_v60, %v2514_v60  ;;  %v3056_v22 = vrot.slane %v7101_v15, 1  ;;  %v3492_v19 = vsel %vm2679_vm15, %v2507_v24, -inf  ;;  %v3499_v1 = vsel %vm2679_vm15, %v2515_v39, -inf }
 0x35f   : > { %v3506_v10 = vsel %vm2679_vm15, %v2514_v60, -inf  ;;  %v3069_v56 = vmax.f32 %v3067_v18, %v3068_v5  ;;  %v3027_v43 = vmax.f32 %v3025_v38, %v3026_v41  ;;  %v3034_v8 = vmax.f32 %v3032_v14, %v3033_v27 }
 0x360   : > { %v3493_v53 = vrot.slane %v3492_v19, 4  ;;  %v3500_v47 = vrot.slane %v3499_v1, 4  ;;  %v3507_v2 = vrot.slane %v3506_v10, 4  ;;  %v3513_v40 = vsel %vm2679_vm15, %v2516_v45, -inf }
 0x361   : > { %v2497_v55 = vrot.slane %v2483_v7, %v7684_v36  ;;  %v3040_v32 = vrot.slane %v3039_v37, 2  ;;  %v3514_v30 = vrot.slane %v3513_v40, 4  ;;  %v2498_v44 = vcombine.high %v2490_v62, %v2490_v62 }
 0x362   : > { %v3494_v57 = vmax.f32 %v3492_v19, %v3493_v53  ;;  %v3501_v59 = vmax.f32 %v3499_v1, %v3500_v47  ;;  %v3508_v52 = vmax.f32 %v3506_v10, %v3507_v2  ;;  %v3464_v42 = vsel %vm2679_vm15, %v2490_v62, -inf }
 0x363   : > { %v2499_v3 = vcombine.high %v2497_v55, %v2497_v55  ;;  %v3515_v46 = vmax.f32 %v3513_v40, %v3514_v30  ;;  %v3465_v58 = vrot.slane %v3464_v42, 4  ;;  %v3471_v61 = vsel %vm2679_vm15, %v2498_v44, -inf }
 0x364   : > { %v3495_v49 = vrot.slane %v3494_v57, 2  ;;  %v3502_v17 = vrot.slane %v3501_v59, 2  ;;  %v3509_v34 = vrot.slane %v3508_v52, 2  ;;  %v3472_v51 = vrot.slane %v3471_v61, 4 }
 0x365   : > { %v3478_v26 = vsel %vm2679_vm15, %v2497_v55, -inf  ;;  %v3041_v23 = vmax.f32 %v3039_v37, %v3040_v32  ;;  %v3516_v29 = vrot.slane %v3515_v46, 2  ;;  %v3466_v18 = vmax.f32 %v3464_v42, %v3465_v58 }
 0x366   : > { %v3479_v38 = vrot.slane %v3478_v26, 4  ;;  %v3496_v14 = vmax.f32 %v3494_v57, %v3495_v49  ;;  %v3503_v31 = vmax.f32 %v3501_v59, %v3502_v17  ;;  %v3473_v24 = vmax.f32 %v3471_v61, %v3472_v51 }
 0x367   : > { %v3485_v12 = vsel %vm2679_vm15, %v2499_v3, -inf  ;;  %v3510_v20 = vmax.f32 %v3508_v52, %v3509_v34  ;;  %v3517_v6 = vmax.f32 %v3515_v46, %v3516_v29  ;;  %v3467_v60 = vrot.slane %v3466_v18, 2 }
 0x368   : > { %v3480_v5 = vmax.f32 %v3478_v26, %v3479_v38  ;;  %v3063_v41 = vrot.slane %v7103_v50, 1  ;;  %v3070_v27 = vrot.slane %v3069_v56, 1  ;;  %v3474_v39 = vrot.slane %v3473_v24, 2 }
 0x369   : > { %v3486_v7 = vrot.slane %v3485_v12, 4  ;;  %v3028_v62 = vrot.slane %v3027_v43, 1  ;;  %v3035_v45 = vrot.slane %v3034_v8, 1  ;;  %v3468_v37 = vmax.f32 %v3466_v18, %v3467_v60 }
 0x36a   : > { %v3481_v19 = vrot.slane %v3480_v5, 2  ;;  %v3022_v1 = vmax.f32 %v7098_v4, %v3021_v35  ;;  %v3042_v10 = vrot.slane %v3041_v23, 1  ;;  %v3497_v53 = vrot.slane %v3496_v14, 1 }
 0x36b   : > { %v3487_v47 = vmax.f32 %v3485_v12, %v3486_v7  ;;  %v3057_v2 = vmax.f32 %v7101_v15, %v3056_v22  ;;  %v3504_v40 = vrot.slane %v3503_v31, 1  ;;  %v3511_v55 = vrot.slane %v3510_v20, 1 }
 0x36c   : > { %v3518_v32 = vrot.slane %v3517_v6, 1  ;;  %v3064_v57 = vmax.f32 %v7103_v50, %v3063_v41  ;;  %v3071_v30 = vmax.f32 %v3069_v56, %v3070_v27  ;;  %v3475_v44 = vmax.f32 %v3473_v24, %v3474_v39 }
 0x36d   : > { %v3482_v59 = vmax.f32 %v3480_v5, %v3481_v19  ;;  %v7125_v52 = vsel %vm3576_vm0, %v7106_v54, -inf  ;;  %v3029_v3 = vmax.f32 %v3027_v43, %v3028_v62  ;;  %v3036_v42 = vmax.f32 %v3034_v8, %v3035_v45 }
 0x36e   : > { %v3469_v4 = vrot.slane %v3468_v37, 1  ;;  %v3043_v35 = vmax.f32 %v3041_v23, %v3042_v10  ;;  %v7128_v49 = vsel %vm3576_vm0, %v3022_v1, -inf  ;;  %v3498_v15 = vmax.f32 %v3496_v14, %v3497_v53 }
 0x36f   : > { %v3488_v22 = vrot.slane %v3487_v47, 2  ;;  %v7131_v46 = vsel %vm3576_vm0, %v3057_v2, -inf  ;;  %v3505_v50 = vmax.f32 %v3503_v31, %v3504_v40  ;;  %v3512_v56 = vmax.f32 %v3510_v20, %v3511_v55 }
 0x370   : > { %v3519_v58 = vmax.f32 %v3517_v6, %v3518_v32  ;;  %v7134_v61 = vsel %vm3576_vm0, %v3064_v57, -inf  ;;  %v7137_v54 = vsel %vm3576_vm0, %v3071_v30, -inf  ;;  %v3476_v43 = vrot.slane %v3475_v44, 1 }
 0x371   : > { %v3483_v8 = vrot.slane %v3482_v59, 1  ;;  %v7140_v34 = vsel %vm3576_vm0, %v3029_v3, -inf  ;;  %v7143_v51 = vsel %vm3576_vm0, %v3036_v42, -inf  ;;  %v3470_v26 = vmax.f32 %v3468_v37, %v3469_v4 }
 0x372   : > { %v7147_v18 = vsel %vm3576_vm0, %v3043_v35, -inf  ;;  %v7150_v38 = vsel %vm3576_vm0, %v3498_v15, -inf  ;;  %v7152_v14 = vmax.f32 %v3487_v47, %v3488_v22  ;;  %v7156_v24 = vsel %vm3576_vm0, %v3505_v50, -inf }
 0x373   : > { %v7159_v12 = vsel %vm3576_vm0, %v3512_v56, -inf  ;;  %v7162_v20 = vsel %vm3576_vm0, %v3519_v58, -inf  ;;  %v7164_v5 = vmax.f32 %v3475_v44, %v3476_v43  ;;  %v7166_v41 = vmax.f32 %v3482_v59, %v3483_v8 }
 0x374   : > { %v7170_v62 = vsel %vm3576_vm0, %v3470_v26, -inf  ;;  %v3490_v1 = vrot.slane %v7152_v14, 1 }
 0x375   : > { %v4268_v17 = vpop.f32.mrb[14].mxu0 }
 0x376   : > { %v1860_v23 = vadd.f32 %v7070_v11, %v4268_v17  ;;  %v1854_v29 = vpop.f32.mrb[15].mxu0 }
 0x377   : > { %v1855_v31 = vadd.f32 %v7070_v11, %v1854_v29 }
 0x378   : > { %v1958_v6 = vmax.f32 %v1860_v23, 0.0  ;;  %v4292_v60 = vpop.f32.mrb[14].mxu1 }
 0x379   : > { %v1957_v27 = vmax.f32 %v1855_v31, 0.0  ;;  %v1940_v39 = vadd.f32 %v7070_v11, %v4292_v60  ;;  %v1934_v7 = vpop.f32.mrb[15].mxu1 }
 0x37a   : > { %v2262_v45 = vcombine.high %v1958_v6, %v1958_v6  ;;  %v2269_v37 = vrot.slane %v1958_v6, %v7684_v36  ;;  %v1935_v19 = vadd.f32 %v7070_v11, %v1934_v7 }
 0x37b   : > { %v2245_v10 = vcombine.high %v1957_v27, %v1957_v27  ;;  %v2252_v53 = vrot.slane %v1957_v27, %v7684_v36  ;;  %v7176_v47 = vmax.f32 %v1940_v39, 0.0 }
 0x37c   : > { %v2276_v2 = vrot.slane %v2262_v45, %v7684_v36  ;;  %v2277_v40 = vcombine.high %v2269_v37, %v2269_v37  ;;  %v3100_v55 = vsel %vm2679_vm15, %v2269_v37, -inf  ;;  %v7180_v32 = vmax.f32 %v1935_v19, 0.0 }
 0x37d   : > { %v3101_v57 = vrot.slane %v3100_v55, 4  ;;  %v2259_v30 = vrot.slane %v2245_v10, %v7684_v36  ;;  %v2260_v44 = vcombine.high %v2252_v53, %v2252_v53  ;;  %v3072_v11 = vsel %vm2679_vm15, %v2252_v53, -inf }
 0x37e   : > { %v2278_v59 = vcombine.high %v2276_v2, %v2276_v2  ;;  %v3107_v3 = vsel %vm2679_vm15, %v2277_v40, -inf  ;;  %v3114_v42 = vsel %vm2679_vm15, %v2276_v2, -inf  ;;  %v3073_v4 = vrot.slane %v3072_v11, 4 }
 0x37f   : > { %v3102_v35 = vmax.f32 %v3100_v55, %v3101_v57  ;;  %v3108_v15 = vrot.slane %v3107_v3, 4  ;;  %v3115_v22 = vrot.slane %v3114_v42, 4  ;;  %v2261_v50 = vcombine.high %v2259_v30, %v2259_v30 }
 0x380   : > { %v3121_v56 = vsel %vm2679_vm15, %v2278_v59, -inf  ;;  %v3074_v58 = vmax.f32 %v3072_v11, %v3073_v4  ;;  %v3079_v43 = vsel %vm2679_vm15, %v2260_v44, -inf  ;;  %v3086_v8 = vsel %vm2679_vm15, %v2259_v30, -inf }
 0x381   : > { %v3103_v17 = vrot.slane %v3102_v35, 2  ;;  %v3109_v26 = vmax.f32 %v3107_v3, %v3108_v15  ;;  %v3116_v23 = vmax.f32 %v3114_v42, %v3115_v22  ;;  %v3122_v29 = vrot.slane %v3121_v56, 4 }
 0x382   : > { %v3075_v31 = vrot.slane %v3074_v58, 2  ;;  %v3080_v6 = vrot.slane %v3079_v43, 4  ;;  %v3087_v60 = vrot.slane %v3086_v8, 4  ;;  %v3093_v27 = vsel %vm2679_vm15, %v2261_v50, -inf }
 0x383   : > { %v3104_v39 = vmax.f32 %v3102_v35, %v3103_v17  ;;  %v3110_v7 = vrot.slane %v3109_v26, 2  ;;  %v3117_v45 = vrot.slane %v3116_v23, 2  ;;  %v3123_v37 = vmax.f32 %v3121_v56, %v3122_v29 }
 0x384   : > { %v3076_v19 = vmax.f32 %v3074_v58, %v3075_v31  ;;  %v3081_v10 = vmax.f32 %v3079_v43, %v3080_v6  ;;  %v3088_v53 = vmax.f32 %v3086_v8, %v3087_v60  ;;  %v3094_v2 = vrot.slane %v3093_v27, 4 }
 0x385   : > { %v3105_v40 = vrot.slane %v3104_v39, 1  ;;  %v3111_v55 = vmax.f32 %v3109_v26, %v3110_v7  ;;  %v3118_v57 = vmax.f32 %v3116_v23, %v3117_v45  ;;  %v3124_v30 = vrot.slane %v3123_v37, 2 }
 0x386   : > { %v3077_v44 = vrot.slane %v3076_v19, 1  ;;  %v3082_v11 = vrot.slane %v3081_v10, 2  ;;  %v3089_v59 = vrot.slane %v3088_v53, 2  ;;  %v3095_v3 = vmax.f32 %v3093_v27, %v3094_v2 }
 0x387   : > { %v3106_v42 = vmax.f32 %v3104_v39, %v3105_v40  ;;  %v3112_v4 = vrot.slane %v3111_v55, 1  ;;  %v3119_v15 = vrot.slane %v3118_v57, 1  ;;  %v3125_v22 = vmax.f32 %v3123_v37, %v3124_v30 }
 0x388   : > { %v3078_v35 = vmax.f32 %v3076_v19, %v3077_v44  ;;  %v3083_v50 = vmax.f32 %v3081_v10, %v3082_v11  ;;  %v3090_v17 = vmax.f32 %v3088_v53, %v3089_v59  ;;  %v3096_v56 = vrot.slane %v3095_v3, 2 }
 0x389   : > { %v3113_v58 = vmax.f32 %v3111_v55, %v3112_v4  ;;  %v3120_v43 = vmax.f32 %v3118_v57, %v3119_v15  ;;  %v3126_v8 = vrot.slane %v3125_v22, 1  ;;  %v7191_v29 = vsel %vm3576_vm0, %v3106_v42, -inf }
 0x38a   : > { %v3663_v26 = vmax.f32 %v7125_v52, %v7191_v29  ;;  %v3084_v23 = vrot.slane %v3083_v50, 1  ;;  %v3091_v31 = vrot.slane %v3090_v17, 1  ;;  %v3097_v6 = vmax.f32 %v3095_v3, %v3096_v56 }
 0x38b   : > { %v3127_v60 = vmax.f32 %v3125_v22, %v3126_v8  ;;  %v7196_v27 = vsel %vm3576_vm0, %v3113_v58, -inf  ;;  %v7199_v39 = vsel %vm3576_vm0, %v3120_v43, -inf  ;;  %v3650_v7 = vsel %vm3576_vm0, %v3078_v35, -inf }
 0x38c   : > { %v3666_v45 = vmax.f32 %v7131_v46, %v7196_v27  ;;  %v3669_v37 = vmax.f32 %v7134_v61, %v7199_v39  ;;  %v3085_v19 = vmax.f32 %v3083_v50, %v3084_v23  ;;  %v3092_v10 = vmax.f32 %v3090_v17, %v3091_v31 }
 0x38d   : > { %v7207_v53 = vsel %vm3576_vm0, %v3127_v60, -inf  ;;  %v3098_v2 = vrot.slane %v3097_v6, 1  ;;  %v3651_v40 = vmax.f32 %v7128_v49, %v3650_v7  ;;  %v2534_v55 = vcombine.high %v7176_v47, %v7176_v47 }
 0x38e   : > { %v3672_v57 = vmax.f32 %v7137_v54, %v7207_v53  ;;  %v3653_v30 = vsel %vm3576_vm0, %v3085_v19, -inf  ;;  %v3656_v44 = vsel %vm3576_vm0, %v3092_v10, -inf  ;;  %v2541_v11 = vrot.slane %v7176_v47, %v7684_v36 }
 0x38f   : > { %v3099_v59 = vmax.f32 %v3097_v6, %v3098_v2  ;;  %v3654_v3 = vmax.f32 %v7140_v34, %v3653_v30  ;;  %v3657_v42 = vmax.f32 %v7143_v51, %v3656_v44  ;;  %v2548_v49 = vrot.slane %v2534_v55, %v7684_v36 }
 0x390   : > { %v2549_v4 = vcombine.high %v2541_v11, %v2541_v11  ;;  %v3548_v15 = vsel %vm2679_vm15, %v2541_v11, -inf  ;;  %v2517_v22 = vcombine.high %v7180_v32, %v7180_v32  ;;  %v2524_v35 = vrot.slane %v7180_v32, %v7684_v36 }
 0x391   : > { %v3659_v50 = vsel %vm3576_vm0, %v3099_v59, -inf  ;;  %v3861_v47 = vsel %vm3833_vm1, %v3654_v3, %v3651_v40  ;;  %v2550_v17 = vcombine.high %v2548_v49, %v2548_v49  ;;  %v3549_v56 = vrot.slane %v3548_v15, 4 }
 0x392   : > { %v3660_v34 = vmax.f32 %v7147_v18, %v3659_v50  ;;  %v3862_v51 = vsel %vm3835_vm2, %v3657_v42, %v3861_v47  ;;  %v3555_v58 = vsel %vm2679_vm15, %v2549_v4, -inf  ;;  %v3562_v43 = vsel %vm2679_vm15, %v2548_v49, -inf }
 0x393   : > { %v3550_v8 = vmax.f32 %v3548_v15, %v3549_v56  ;;  %v3556_v23 = vrot.slane %v3555_v58, 4  ;;  %v3563_v31 = vrot.slane %v3562_v43, 4  ;;  %v3569_v6 = vsel %vm2679_vm15, %v2550_v17, -inf }
 0x394   : > { %v3863_v32 = vsel %vm3837_vm3, %v3660_v34, %v3862_v51  ;;  %v3570_v60 = vrot.slane %v3569_v6, 4  ;;  %v2531_v7 = vrot.slane %v2517_v22, %v7684_v36  ;;  %v2532_v19 = vcombine.high %v2524_v35, %v2524_v35 }
 0x395   : > { %v3551_v10 = vrot.slane %v3550_v8, 2  ;;  %v3557_v2 = vmax.f32 %v3555_v58, %v3556_v23  ;;  %v3564_v18 = vmax.f32 %v3562_v43, %v3563_v31  ;;  %v3520_v40 = vsel %vm2679_vm15, %v2524_v35, -inf }
 0x396   : > { %v3571_v55 = vmax.f32 %v3569_v6, %v3570_v60  ;;  %v2533_v30 = vcombine.high %v2531_v7, %v2531_v7  ;;  %v3521_v44 = vrot.slane %v3520_v40, 4  ;;  %v3527_v11 = vsel %vm2679_vm15, %v2532_v19, -inf }
 0x397   : > { %v3552_v59 = vmax.f32 %v3550_v8, %v3551_v10  ;;  %v3558_v3 = vrot.slane %v3557_v2, 2  ;;  %v3565_v42 = vrot.slane %v3564_v18, 2  ;;  %v3528_v49 = vrot.slane %v3527_v11, 4 }
 0x398   : > { %v3572_v4 = vrot.slane %v3571_v55, 2  ;;  %v3522_v15 = vmax.f32 %v3520_v40, %v3521_v44  ;;  %v3534_v50 = vsel %vm2679_vm15, %v2531_v7, -inf  ;;  %v3541_v22 = vsel %vm2679_vm15, %v2533_v30, -inf }
 0x399   : > { %v3553_v47 = vrot.slane %v3552_v59, 1  ;;  %v3559_v17 = vmax.f32 %v3557_v2, %v3558_v3  ;;  %v3566_v56 = vmax.f32 %v3564_v18, %v3565_v42  ;;  %v3529_v34 = vmax.f32 %v3527_v11, %v3528_v49 }
 0x39a   : > { %v3573_v35 = vmax.f32 %v3571_v55, %v3572_v4  ;;  %v3523_v51 = vrot.slane %v3522_v15, 2  ;;  %v3535_v58 = vrot.slane %v3534_v50, 4  ;;  %v3542_v43 = vrot.slane %v3541_v22, 4 }
 0x39b   : > { %v3554_v23 = vmax.f32 %v3552_v59, %v3553_v47  ;;  %v3560_v31 = vrot.slane %v3559_v17, 1  ;;  %v3567_v8 = vrot.slane %v3566_v56, 1  ;;  %v3530_v6 = vrot.slane %v3529_v34, 2 }
 0x39c   : > { %v3574_v60 = vrot.slane %v3573_v35, 1  ;;  %v3524_v19 = vmax.f32 %v3522_v15, %v3523_v51  ;;  %v3536_v10 = vmax.f32 %v3534_v50, %v3535_v58  ;;  %v3543_v40 = vmax.f32 %v3541_v22, %v3542_v43 }
 0x39d   : > { %v3561_v44 = vmax.f32 %v3559_v17, %v3560_v31  ;;  %v3568_v7 = vmax.f32 %v3566_v56, %v3567_v8  ;;  %v3758_v30 = vsel %vm3576_vm0, %v3554_v23, -inf  ;;  %v3531_v9 = vmax.f32 %v3529_v34, %v3530_v6 }
 0x39e   : > { %v3575_v2 = vmax.f32 %v3573_v35, %v3574_v60  ;;  %v3759_v18 = vmax.f32 %v7150_v38, %v3758_v30  ;;  %v3525_v55 = vrot.slane %v3524_v19, 1  ;;  %v3537_v11 = vrot.slane %v3536_v10, 2  ;;  %v7727_v30 = vld [vmem:[#allocation38_spill] sm:$0xff] }
 0x39f   : > { %v3761_v3 = vsel %vm3576_vm0, %v3561_v44, -inf  ;;  %v3764_v59 = vsel %vm3576_vm0, %v3568_v7, -inf  ;;  %v3532_v42 = vrot.slane %v3531_v9, 1  ;;  %v3544_v49 = vrot.slane %v3543_v40, 2 }
 0x3a0   : > { %v3762_v4 = vmax.f32 %v7156_v24, %v3761_v3  ;;  %v3765_v15 = vmax.f32 %v7159_v12, %v3764_v59  ;;  %v3767_v50 = vsel %vm3576_vm0, %v3575_v2, -inf  ;;  %v3526_v22 = vmax.f32 %v3524_v19, %v3525_v55 }
 0x3a1   : > { %v3768_v47 = vmax.f32 %v7162_v20, %v3767_v50  ;;  %v3533_v17 = vmax.f32 %v3531_v9, %v3532_v42  ;;  %v3538_v56 = vmax.f32 %v3536_v10, %v3537_v11  ;;  %v3545_v38 = vmax.f32 %v3543_v40, %v3544_v49 }
 0x3a2   : > { %v3491_v34 = vmax.f32 %v7152_v14, %v3490_v1  ;;  %v3748_v35 = vsel %vm3576_vm0, %v7164_v5, -inf  ;;  %v3746_v51 = vsel %vm3576_vm0, %v3526_v22, -inf  ;;  %v3864_v24 = vsel %vm3839_vm4, %v3663_v26, %v3863_v32 }
 0x3a3   : > { %v3539_v12 = vrot.slane %v3538_v56, 1  ;;  %v3546_v58 = vrot.slane %v3545_v38, 1  ;;  %v3747_v9 = vmax.f32 %v7170_v62, %v3746_v51  ;;  %v3749_v20 = vsel %vm3576_vm0, %v3533_v17, -inf }
 0x3a4   : > { %v3750_v43 = vmax.f32 %v3748_v35, %v3749_v20  ;;  %v3865_v14 = vsel %vm3841_vm5, %v3666_v45, %v3864_v24  ;;  %v3751_v29 = vsel %vm3576_vm0, %v7166_v41, -inf  ;;  %v3754_v62 = vsel %vm3576_vm0, %v3491_v34, -inf }
 0x3a5   : > { %v3540_v5 = vmax.f32 %v3538_v56, %v3539_v12  ;;  %v3547_v1 = vmax.f32 %v3545_v38, %v3546_v58  ;;  %v3866_v52 = vsel %vm3843_vm6, %v3669_v37, %v3865_v14  ;;  %v4466_v41 = vmov 1934713408  }
 0x3a6   : > { %v3889_v26 = vsel %vm3833_vm1, %v3750_v43, %v3747_v9  ;;  %v3867_v46 = vsel %vm3845_vm7, %v3672_v57, %v3866_v52  ;;  %v3971_v23 = vunpack.c.l.s4 %v4466_v41  ;;  %v3912_v31 = vrot.slane %v3904_v63, %v7684_v36 }
 0x3a7   : > { %v3752_v27 = vsel %vm3576_vm0, %v3540_v5, -inf  ;;  %v3755_v45 = vsel %vm3576_vm0, %v3547_v1, -inf  ;;  %v3920_v61 = vcombine.low %v6846_v13, %v3867_v46  ;;  %v3921_v39 = vcombine.high %v6846_v13, %v3867_v46 }
 0x3a8   : > { %v3753_v37 = vmax.f32 %v3751_v29, %v3752_v27  ;;  %v3756_v32 = vmax.f32 %v3754_v62, %v3755_v45  ;;  %v3919_v53 = vrot.slane %v3905_v25, %v7684_v36  ;;  %v3972_v44 = vunpack.c.0.s8 %v3971_v23 }
 0x3a9   : > { %v3928_v54 = vrot.slane %v3920_v61, %v7684_v36  ;;  %v3935_v57 = vrot.slane %v3921_v39, %v7684_v36  ;;  %v3944_v55 = vrot.slane %v3936_v0, %v7684_v36  ;;  %v7728_v11 = vcombine.high %v6736_v33, %v7077_v48 }
 0x3aa   : > { %v3890_v13 = vsel %vm3835_vm2, %v3753_v37, %v3889_v26  ;;  %v3975_v2 = vsub.s32 %v3972_v44, %v7727_v30 }
 0x3ab   : > { %v3891_v8 = vsel %vm3837_vm3, %v3756_v32, %v3890_v13  ;;  %v3969_v6 = vcombine.high %v3912_v31, %v3928_v54  ;;  %v3968_v60 = vcombine.low %v3912_v31, %v3928_v54  ;;  %v3984_v19 = vcombine.low %v3919_v53, %v3935_v57 }
 0x3ac   : > { %v3892_v10 = vsel %vm3839_vm4, %v3759_v18, %v3891_v8  ;;  %v3985_v40 = vcombine.high %v3919_v53, %v3935_v57  ;;  %v3951_v3 = vrot.slane %v7728_v11, %v7684_v36 }
 0x3ad   : > { %v3893_v63 = vsel %vm3841_vm5, %v3762_v4, %v3892_v10  ;;  %v3976_v50 = vrot.slane %v3968_v60, %v3975_v2  ;;  %v3992_v22 = vrot.slane %v3984_v19, %v3975_v2 }
 0x3ae   : > { %v3894_v7 = vsel %vm3843_vm6, %v3765_v15, %v3893_v63  ;;  %v3983_v15 = vrot.slane %v3969_v6, %v3975_v2  ;;  %v3999_v38 = vrot.slane %v3985_v40, %v3975_v2 }
 0x3af   : > { %v3895_v28 = vsel %vm3845_vm7, %v3768_v47, %v3894_v7 }
 0x3b0   : > { %v3952_v21 = vcombine.low %v6859_v16, %v3895_v28  ;;  %v3953_v25 = vcombine.high %v6859_v16, %v3895_v28 }
 0x3b2   : > { %v3960_v18 = vrot.slane %v3952_v21, %v7684_v36  ;;  %v3967_v59 = vrot.slane %v3953_v25, %v7684_v36 }
 0x3b4   : > { %v4001_v42 = vcombine.high %v3944_v55, %v3960_v18  ;;  %v4000_v49 = vcombine.low %v3944_v55, %v3960_v18  ;;  %v4016_v4 = vcombine.low %v3951_v3, %v3967_v59  ;;  %v4017_v16 = vcombine.high %v3951_v3, %v3967_v59 }
 0x3b6   : > { %v4015_v47 = vrot.slane %v4001_v42, %v3975_v2  ;;  %v4008_v17 = vrot.slane %v4000_v49, %v3975_v2  ;;  %v4024_v56 = vrot.slane %v4016_v4, %v3975_v2  ;;  %v4031_v0 = vrot.slane %v4017_v16, %v3975_v2 }
 0x3b8   : > { %v4034_v34 = vcombine.low %v3983_v15, %v4015_v47  ;;  %v4033_v35 = vcombine.high %v3976_v50, %v4008_v17  ;;  %v4036_v51 = vcombine.low %v3992_v22, %v4024_v56  ;;  %v4035_v24 = vcombine.high %v3983_v15, %v4015_v47 }
 0x3b9   : > { %v4038_v33 = vcombine.low %v3999_v38, %v4031_v0  ;;  %v4037_v48 = vcombine.high %v3992_v22, %v4024_v56  ;;  %v4039_v12 = vcombine.high %v3999_v38, %v4031_v0  ;;  %v4032_v36 = vcombine.low %v3976_v50, %v4008_v17 }
 0x3ba   : > { %4045 = vrot.lane.b32.xlu0 %v4034_v34, %s4467_s6  ;;  %4041 = vrot.lane.b32.xlu1 %v4033_v35, %s4468_s7 }
 0x3be   : > { %4053 = vrot.lane.b32.xlu0 %v4036_v51, %s4469_s8  ;;  %4049 = vrot.lane.b32.xlu1 %v4035_v24, %s4464_s26 }
 0x3c2   : > { %4061 = vrot.lane.b32.xlu0 %v4038_v33, %s4470_s9  ;;  %4057 = vrot.lane.b32.xlu1 %v4037_v48, %s4471_s10 }
 0x3c6   : > { %4065 = vrot.lane.b32.xlu1 %v4039_v12, %s4472_s11 }
 0x42c   : > { %v4046_v58 = vpop.permute.xlu0 %4045  ;;  %v4042_v9 = vpop.permute.xlu1 %4041 }
 0x42d   : > { %v4068_v20 = vsel %vm3576_vm0, %v4032_v36, %v4042_v9 }
 0x42e   : > { %v4070_v5 = vsel %vm4069_vm8, %v4068_v20, %v4046_v58 }
 0x430   : > { %v4054_v43 = vpop.permute.xlu0 %4053  ;;  %v4050_v14 = vpop.permute.xlu1 %4049 }
 0x431   : > { %v4071_v1 = vsel %vm1573_vm13, %v4070_v5, %v4050_v14 }
 0x432   : > { %v4073_v29 = vsel %vm4072_vm9, %v4071_v1, %v4054_v43 }
 0x434   : > { %v4058_v52 = vpop.permute.xlu1 %4057  ;;  %v4062_v62 = vpop.permute.xlu0 %4061 }
 0x435   : > { %v4075_v26 = vsel %vm4074_vm10, %v4073_v29, %v4058_v52 }
 0x436   : > { %v4077_v27 = vsel %vm4076_vm11, %v4075_v26, %v4062_v62 }
 0x438   : > { %v4066_v46 = vpop.permute.xlu1 %4065 }
 0x439   : > { %v4079_v45 = vsel %vm4078_vm12, %v4077_v27, %v4066_v46 }
 0x43a   : > { %4081 = vst.msk [vmem:[%s163_s24] sm:$0xff] %vm4080_vm14, %v4079_v45 }
 0x43b   : > { %4404 = shalt.err (!%p4401_p3)
}
 0x43c   : > { %s4405_s6 = scalar_lea.hbm %s7316_s28, 128  ;;  %s4409_s9 = scalar_lea.hbm %s7361_s3, 256 }
 0x43d   : > { %p4406_p4 = scmp.ne.s32.totalorder %s7316_s28, %s4405_s6  ;;  %p4410_p9 = scmp.lt.u32.totalorder %s7316_s28, %s7361_s3 }
 0x43e   : > { %p4411_p10 = scmp.lt.u32.totalorder %s4409_s9, %s4405_s6  ;;  %p4413_p12 = scmp.lt.u32.totalorder %s4405_s6, %s7316_s28 }
 0x43f   : > { %p4407_p7 = pnand %p4406_p4, %p4532_p5 }
 0x440   : > { %p4412_p11 = por %p4411_p10, %p4410_p9 }
 0x441   : > { %p4408_p8 = pneg %p4407_p7 }
 0x442   : > { %p4414_p13 = por %p4413_p12, %p4412_p11 }
 0x444   : > { %p4415_p0 = pnand %p4414_p13, %p4408_p8 }
 0x446   : > { %4418 = shalt.err (!%p4415_p0)
}
 0x447   : > { %4307 = dma.vmem_to_hbm [thread:$0]  (%p4532_p5), %s7318_s25, 128, %s7316_s28, %s4083_s29  }
 0x448 PF: > { %p4313_p1 = scmp.ge.s32.totalorder %s4453_s15, 2  ;;  %s4108_s17 = sand.u32 1, %s4441_s12  }
 0x449   : > { %s4109_s19 = scalar_lea.sflag [#allocation3], %s4108_s17 }
 0x44a   : > { %p4310_p2 = pnand %p4313_p1, %p4536_p6 }
 0x44c   : > { %4436 = dma.done.wait (!%p4310_p2), %s4109_s19, 128  }
 0x44d   : > { %4438 = vsyncadd (!%p4310_p2), %s4109_s19, 4294967168  ;;  %p13_p3 = scmp.ge.s32.totalorder %s4519_s18, 4   ;;  %s7729_s12 = smov %s4445_s13 }
 0x44e   : > { %s7730_s13 = smov %s4449_s14  ;;  %s7731_s14 = smov %s4530_s21 }
 0x44f   : > { %s7732_s15 = smov %s4519_s18  ;;  %15 = sbr.rel (!%p13_p3) target bundleno = 3 (0x3), region = 67 }
 0x456   :  { %4114 = vsyncpa [#allocation3], 1 }
 0x457   :  { %4116 = vsyncpa [#allocation3 + $0x1], 1 }

</bundles_post_ra>
